<compile_context>
chip_gen: v5e
topology: v5e:2x2
jax: 0.10.0
libtpu: 0.0.40
codegen_flags: <defaults>
</compile_context>

<pallas_src>
import functools

import jax
import jax.numpy as jnp
from jax.experimental import pallas as pl
from jax.experimental.pallas import tpu as pltpu


MATMUL_DTYPE = jnp.bfloat16   # conv matmul operand dtype (accumulation is f32)
LN_EPS = 1e-5


# ----------------------------------------------------------------------------
# Stage 1 kernel: one stacked gate matmul + LayerNorms/activations + attention
# recall + c / m updates, all fused in VMEM.
# ----------------------------------------------------------------------------

def _cell_stage1_kernel(xg_ref, wg_ref, bg_ref, ch_ref, m_ref,
                        c_ref, mnew_ref, opart_ref, *, eps, scale):
    B, hid, S = m_ref.shape
    tau = ch_ref.shape[0]
    wg = wg_ref[...]                       # (7*hid, Kg)  bf16
    bg = bg_ref[...]                       # (7*hid, 1)   f32

    def ln(v):                             # LayerNorm over the spatial (lane) axis
        mu = jnp.mean(v, axis=-1, keepdims=True)
        d = v - mu
        var = jnp.mean(d * d, axis=-1, keepdims=True)
        return d * jax.lax.rsqrt(var + eps)

    def full_sum(v):                       # (rows, S) -> (1, 1)
        return jnp.sum(jnp.sum(v, axis=-1, keepdims=True), axis=-2, keepdims=True)

    gates = []
    scores = []                            # scores[b][l] : (1, 1)
    for b in range(B):
        # all 7 gate groups (r, i, g, i', g', f', o) in ONE MXU matmul;
        # channel-major orientation keeps S=128 dense in lanes.
        g_all = jnp.dot(wg, xg_ref[b],
                        preferred_element_type=jnp.float32) + bg      # (7h, S)
        r = jax.nn.sigmoid(ln(g_all[0 * hid:1 * hid]))
        i = jax.nn.sigmoid(ln(g_all[1 * hid:2 * hid]))
        g = jnp.tanh(ln(g_all[2 * hid:3 * hid]))
        ip = jax.nn.sigmoid(ln(g_all[3 * hid:4 * hid]))
        gp = jnp.tanh(ln(g_all[4 * hid:5 * hid]))
        fp = jax.nn.sigmoid(ln(g_all[5 * hid:6 * hid]))
        o_part = g_all[6 * hid:7 * hid]    # LayerNorm applied later, once co is added
        gates.append((r, i, g, ip, gp, fp, o_part))
        scores.append([full_sum(r * ch_ref[l, b]) * scale for l in range(tau)])

    # self_attention_fast: softmax over the *batch* axis (reference-impl quirk,
    # kept identical to the previous version's semantics).
    att = [[None] * B for _ in range(tau)]
    for l in range(tau):
        mx = scores[0][l]
        for b in range(1, B):
            mx = jnp.maximum(mx, scores[b][l])
        es = [jnp.exp(scores[b][l] - mx) for b in range(B)]
        tot = es[0]
        for b in range(1, B):
            tot = tot + es[b]
        for b in range(B):
            att[l][b] = es[b] / tot

    inv_n = 1.0 / float(hid * S)
    for b in range(B):
        r, i, g, ip, gp, fp, o_part = gates[b]
        recall = att[0][b] * ch_ref[0, b]
        for l in range(1, tau):
            recall = recall + att[l][b] * ch_ref[l, b]       # (hid, S)
        # LayerNorm over (C, T, H, W) per batch element (affine = identity)
        c_in = ch_ref[tau - 1, b] + recall
        mu = full_sum(c_in) * inv_n
        d = c_in - mu
        var = full_sum(d * d) * inv_n
        c_norm = d * jax.lax.rsqrt(var + eps)

        c_new = i * g + c_norm
        m_new = ip * gp + fp * m_ref[b]
        c_ref[b] = c_new
        mnew_ref[b] = m_new
        opart_ref[b] = o_part


# ----------------------------------------------------------------------------
# Stage 2 kernel: co conv matmul + output-gate LN/sigmoid + 1x1x1 conv + h.
# Gridded over batch (independent per batch element) -> "parallel" semantics.
# ----------------------------------------------------------------------------

def _cell_stage2_kernel(cp_ref, wc_ref, op_ref, c_ref, m_ref,
                        w111_ref, b111_ref, h_ref, *, eps):
    co = jnp.dot(wc_ref[...], cp_ref[0],
                 preferred_element_type=jnp.float32)           # (hid, S)
    o_in = op_ref[0] + co                                      # xo + ho + mo + co
    mu = jnp.mean(o_in, axis=-1, keepdims=True)
    d = o_in - mu
    var = jnp.mean(d * d, axis=-1, keepdims=True)
    o = jax.nn.sigmoid(d * jax.lax.rsqrt(var + eps))
    cm = jnp.concatenate([c_ref[0], m_ref[0]], axis=0)         # (2*hid, S)
    y = jnp.dot(w111_ref[...], cm,
                preferred_element_type=jnp.float32) + b111_ref[...]
    h_ref[0] = o * jnp.tanh(y)


# ----------------------------------------------------------------------------
# Glue: im2col patch rows with the nearest "deconv" upsample folded in.
# ----------------------------------------------------------------------------

def build_patches(x, ksize):
    """x: (B, C, T, H, W) -> (B, C*kt*kh*kw, T*H*W).

    Row (b, :, s) is the conv3d-valid patch feeding output voxel s AFTER the
    nearest-neighbour upsample (interp folded into the gather, so the matmul
    directly produces full-resolution, lane-dense outputs)."""
    B, C, T, H, W = x.shape
    kt, kh, kw = ksize
    To, Ho, Wo = T - kt + 1, H - kh + 1, W - kw + 1
    taps = []
    for dt in range(kt):
        for dy in range(kh):
            for dx in range(kw):
                taps.append(x[:, :, dt:dt + To, dy:dy + Ho, dx:dx + Wo])
    p = jnp.stack(taps, axis=2)                    # (B, C, taps, To, Ho, Wo)
    it = (jnp.arange(T) * To) // T                 # F.interpolate 'nearest' idx
    ih = (jnp.arange(H) * Ho) // H
    iw = (jnp.arange(W) * Wo) // W
    p = jnp.take(p, it, axis=3)
    p = jnp.take(p, ih, axis=4)
    p = jnp.take(p, iw, axis=5)                    # (B, C, taps, T, H, W)
    # TODO(synk): at production shapes generate these patch rows inside the
    # kernel from a VMEM-resident input instead of materializing the
    # taps-expanded tensor in HBM.
    return p.reshape(B, C * kt * kh * kw, T * H * W)


# ----------------------------------------------------------------------------
# Per-cell weight preparation (hoisted out of the step loop).
# ----------------------------------------------------------------------------

def prepare_cell_params(p):
    hid = p["wc"].shape[0]
    in_ch = p["wx"].shape[1]
    kt, kh, kw = p["wc"].shape[-3:]
    ntaps = kt * kh * kw
    Kx, Kh, Km = in_ch * ntaps, hid * ntaps, hid * ntaps
    wx = p["wx"].reshape(7 * hid, Kx).astype(jnp.float32)
    wh = p["wh"].reshape(4 * hid, Kh).astype(jnp.float32)
    wm = p["wm"].reshape(4 * hid, Km).astype(jnp.float32)
    # Combined gate weight: rows = [r, i, g, i', g', f', o] * hid,
    # cols = [x-patches | h-patches | m-patches]; zero blocks where a gate
    # takes no contribution from that stream.
    wg = jnp.zeros((7 * hid, Kx + Kh + Km), jnp.float32)
    wg = wg.at[:, :Kx].set(wx)
    wg = wg.at[0 * hid:3 * hid, Kx:Kx + Kh].set(wh[0 * hid:3 * hid])   # hr,hi,hg
    wg = wg.at[6 * hid:7 * hid, Kx:Kx + Kh].set(wh[3 * hid:4 * hid])   # ho
    wg = wg.at[3 * hid:6 * hid, Kx + Kh:].set(wm[0 * hid:3 * hid])     # mi',mg',mf'
    wg = wg.at[6 * hid:7 * hid, Kx + Kh:].set(wm[3 * hid:4 * hid])     # mo
    return {
        "hid": hid,
        "ksize": (kt, kh, kw),
        "wg": wg.astype(MATMUL_DTYPE),
        "bg": p["bx"].reshape(7 * hid, 1).astype(jnp.float32),
        "wc": p["wc"].reshape(hid, Km).astype(MATMUL_DTYPE),
        "w111": p["w111"].reshape(hid, 2 * hid).astype(jnp.float32),
        "b111": p["b111"].reshape(hid, 1).astype(jnp.float32),
    }


# ----------------------------------------------------------------------------
# E3D-LSTM cell and stack
# ----------------------------------------------------------------------------

def cell_forward(cp, x, c_hist, m, h):
    """x: (B, Cin, T, H, W); c_hist: (tau, B, hid, S); m, h: (B, hid, S)."""
    B, _, T, H, W = x.shape
    S = T * H * W
    hid = cp["hid"]

    xhm = jnp.concatenate(
        [x, h.reshape(B, hid, T, H, W), m.reshape(B, hid, T, H, W)], axis=1)
    xg = build_patches(xhm, cp["ksize"]).astype(MATMUL_DTYPE)   # (B, Kg, S)

    scale = float(B * hid * S) ** -0.5          # 1 / sqrt(numel(r))
    vmem = pl.BlockSpec(memory_space=pltpu.MemorySpace.VMEM)
    c_new, m_new, o_part = pl.pallas_call(
        functools.partial(_cell_stage1_kernel, eps=LN_EPS, scale=scale),
        out_shape=(jax.ShapeDtypeStruct((B, hid, S), jnp.float32),) * 3,
        in_specs=[vmem] * 5,
        out_specs=(vmem,) * 3,
    )(xg, cp["wg"], cp["bg"], c_hist, m)

    cpat = build_patches(c_new.reshape(B, hid, T, H, W),
                         cp["ksize"]).astype(MATMUL_DTYPE)      # (B, Kc, S)
    Kc = cpat.shape[1]
    h_new = pl.pallas_call(
        functools.partial(_cell_stage2_kernel, eps=LN_EPS),
        grid=(B,),
        out_shape=jax.ShapeDtypeStruct((B, hid, S), jnp.float32),
        in_specs=[
            pl.BlockSpec((1, Kc, S), lambda b: (b, 0, 0)),
            pl.BlockSpec((hid, Kc), lambda b: (0, 0)),
            pl.BlockSpec((1, hid, S), lambda b: (b, 0, 0)),
            pl.BlockSpec((1, hid, S), lambda b: (b, 0, 0)),
            pl.BlockSpec((1, hid, S), lambda b: (b, 0, 0)),
            pl.BlockSpec((hid, 2 * hid), lambda b: (0, 0)),
            pl.BlockSpec((hid, 1), lambda b: (0, 0)),
        ],
        out_specs=pl.BlockSpec((1, hid, S), lambda b: (b, 0, 0)),
        compiler_params=pltpu.CompilerParams(
            dimension_semantics=("parallel",)),
    )(cpat, cp["wc"], o_part, c_new, m_new, cp["w111"], cp["b111"])

    c_hist = jnp.concatenate([c_hist[1:], c_new[None]], axis=0)
    return c_hist, m_new, h_new


def e3d_lstm_forward(params, inputs, tau):
    """inputs: (S, B, C, T, H, W) -> (B, S*hidden, T, H, W)."""
    steps, B = inputs.shape[:2]
    T, H, W = inputs.shape[-3:]
    S = T * H * W
    num_layers = len(params)
    preps = [prepare_cell_params(p) for p in params]   # hoisted out of the loop
    hid = preps[0]["hid"]

    c_hist = [jnp.zeros((tau, B, hid, S), jnp.float32) for _ in range(num_layers)]
    h_states = [jnp.zeros((B, hid, S), jnp.float32) for _ in range(num_layers)]
    m = jnp.zeros((B, hid, S), jnp.float32)

    # TODO(synk): swap the unrolled Python step loop for lax.scan at large
    # sequence lengths (compile-time only; numerics are identical).
    outputs = []
    for step in range(steps):
        x = inputs[step]                               # (B, Cin, T, H, W)
        for li in range(num_layers):
            if step == 0:
                # init_hidden resets m for every cell at step 0
                m = jnp.zeros_like(m)
            c_hist[li], m, h_states[li] = cell_forward(
                preps[li], x, c_hist[li], m, h_states[li])
            x = h_states[li].reshape(B, hid, T, H, W)
        outputs.append(h_states[-1].reshape(B, hid, T, H, W))
    return jnp.concatenate(outputs, axis=1)            # torch.cat(outputs, dim=1)


# ----------------------------------------------------------------------------
# Deterministic parameter init (identical to the previous version)
# ----------------------------------------------------------------------------

def init_cell_params(key, in_channels, hidden, ksize):
    kt, kh, kw = ksize
    keys = jax.random.split(key, 7)

    def u(k, shape, fan_in):
        bound = 1.0 / (fan_in ** 0.5)
        return jax.random.uniform(k, shape, jnp.float32, -bound, bound)

    fan_x = in_channels * kt * kh * kw
    fan_h = hidden * kt * kh * kw
    return {
        # stacked x-convs: xr, xi, xg, xi', xg', xf', xo  (with bias)
        "wx": u(keys[0], (7 * hidden, in_channels, kt, kh, kw), fan_x),
        "bx": u(keys[1], (7 * hidden,), fan_x),
        # stacked h-convs: hr, hi, hg, ho  (bias=False)
        "wh": u(keys[2], (4 * hidden, hidden, kt, kh, kw), fan_h),
        # stacked m-convs: mi', mg', mf', mo  (bias=False)
        "wm": u(keys[3], (4 * hidden, hidden, kt, kh, kw), fan_h),
        # co conv (bias=False)
        "wc": u(keys[4], (hidden, hidden, kt, kh, kw), fan_h),
        # 1x1x1 output conv
        "w111": u(keys[5], (hidden, 2 * hidden, 1, 1, 1), 2 * hidden),
        "b111": u(keys[6], (hidden,), 2 * hidden),
    }


# ----------------------------------------------------------------------------
# Main
# ----------------------------------------------------------------------------

if __name__ == "__main__":
    key = jax.random.PRNGKey(0)
    S, B, Cin, T, H, W = 3, 2, 4, 2, 8, 8
    hidden, num_layers, tau = 8, 2, 2
    ksize = (2, 3, 3)

    kp, kx = jax.random.split(key)
    layer_keys = jax.random.split(kp, num_layers)
    params = []
    in_ch = Cin
    for li in range(num_layers):
        params.append(init_cell_params(layer_keys[li], in_ch, hidden, ksize))
        in_ch = hidden

    inputs = jax.random.normal(kx, (S, B, Cin, T, H, W), jnp.float32)

    fwd = jax.jit(functools.partial(e3d_lstm_forward, tau=tau))
    out = fwd(params, inputs)
    out = jax.block_until_ready(out)

    assert out.shape == (B, S * hidden, T, H, W), out.shape
    assert bool(jnp.all(jnp.isfinite(out)))
    print("KERNEL_OK")
</pallas_src>

<mosaic_0001>
module attributes {stable_mosaic.version = 11 : i64} {
  func.func @_cell_stage1_kernel(%arg0: memref<2x360x128xbf16, #tpu.memory_space<vmem>>, %arg1: memref<56x360xbf16, #tpu.memory_space<vmem>>, %arg2: memref<56x1xf32, #tpu.memory_space<vmem>>, %arg3: memref<2x2x8x128xf32, #tpu.memory_space<vmem>>, %arg4: memref<2x8x128xf32, #tpu.memory_space<vmem>>, %arg5: memref<2x8x128xf32, #tpu.memory_space<vmem>>, %arg6: memref<2x8x128xf32, #tpu.memory_space<vmem>>, %arg7: memref<2x8x128xf32, #tpu.memory_space<vmem>>) attributes {dimension_semantics = [], scalar_prefetch = 0 : i64, scratch_operands = 0 : i64, tpu.core_type = #tpu.core_type<tc>} {
    %c0 = arith.constant 0 : index
    %c0_0 = arith.constant 0 : index
    %0 = vector.load %arg1[%c0, %c0_0] : memref<56x360xbf16, #tpu.memory_space<vmem>>, vector<56x360xbf16>
    %c0_1 = arith.constant 0 : index
    %c0_2 = arith.constant 0 : index
    %1 = vector.load %arg2[%c0_1, %c0_2] : memref<56x1xf32, #tpu.memory_space<vmem>>, vector<56x1xf32>
    %c0_3 = arith.constant 0 : index
    %c0_4 = arith.constant 0 : index
    %c0_5 = arith.constant 0 : index
    %2 = vector.load %arg0[%c0_3, %c0_4, %c0_5] : memref<2x360x128xbf16, #tpu.memory_space<vmem>>, vector<1x360x128xbf16>
    %3 = vector.shape_cast %2 : vector<1x360x128xbf16> to vector<360x128xbf16>
    %cst = arith.constant dense<0.000000e+00> : vector<56x128xf32>
    %4 = tpu.matmul %0, %3, %cst {dimension_numbers = #tpu.dot_dimension_numbers<[1], [0], [0], [1], [0, 0, 1, 1], [], []>} : vector<56x360xbf16>, vector<360x128xbf16>, vector<56x128xf32> -> vector<56x128xf32>
    %5 = vector.broadcast %1 : vector<56x1xf32> to vector<56x128xf32>
    %6 = arith.addf %4, %5 : vector<56x128xf32>
    %7 = vector.extract_strided_slice %6 {offsets = [0, 0], sizes = [8, 128], strides = [1, 1]} : vector<56x128xf32> to vector<8x128xf32>
    %cst_6 = arith.constant dense<0.000000e+00> : vector<8xf32>
    %8 = vector.multi_reduction <add>, %7, %cst_6 [1] : vector<8x128xf32> to vector<8xf32>
    %9 = vector.shape_cast %8 : vector<8xf32> to vector<8x1xf32>
    %cst_7 = arith.constant 1.280000e+02 : f32
    %10 = vector.broadcast %cst_7 : f32 to vector<8x1xf32>
    %11 = arith.divf %9, %10 : vector<8x1xf32>
    %12 = vector.broadcast %11 : vector<8x1xf32> to vector<8x128xf32>
    %13 = arith.subf %7, %12 : vector<8x128xf32>
    %14 = arith.mulf %13, %13 : vector<8x128xf32>
    %cst_8 = arith.constant dense<0.000000e+00> : vector<8xf32>
    %15 = vector.multi_reduction <add>, %14, %cst_8 [1] : vector<8x128xf32> to vector<8xf32>
    %16 = vector.shape_cast %15 : vector<8xf32> to vector<8x1xf32>
    %cst_9 = arith.constant 1.280000e+02 : f32
    %17 = vector.broadcast %cst_9 : f32 to vector<8x1xf32>
    %18 = arith.divf %16, %17 : vector<8x1xf32>
    %cst_10 = arith.constant 9.99999974E-6 : f32
    %19 = vector.broadcast %cst_10 : f32 to vector<8x1xf32>
    %20 = arith.addf %18, %19 : vector<8x1xf32>
    %21 = math.rsqrt %20 : vector<8x1xf32>
    %22 = vector.broadcast %21 : vector<8x1xf32> to vector<8x128xf32>
    %23 = arith.mulf %13, %22 : vector<8x128xf32>
    %24 = arith.negf %23 : vector<8x128xf32>
    %25 = math.exp %24 : vector<8x128xf32>
    %cst_11 = arith.constant 1.000000e+00 : f32
    %26 = vector.broadcast %cst_11 : f32 to vector<8x128xf32>
    %27 = arith.addf %26, %25 : vector<8x128xf32>
    %28 = arith.divf %26, %27 : vector<8x128xf32>
    %29 = vector.extract_strided_slice %6 {offsets = [8, 0], sizes = [8, 128], strides = [1, 1]} : vector<56x128xf32> to vector<8x128xf32>
    %cst_12 = arith.constant dense<0.000000e+00> : vector<8xf32>
    %30 = vector.multi_reduction <add>, %29, %cst_12 [1] : vector<8x128xf32> to vector<8xf32>
    %31 = vector.shape_cast %30 : vector<8xf32> to vector<8x1xf32>
    %cst_13 = arith.constant 1.280000e+02 : f32
    %32 = vector.broadcast %cst_13 : f32 to vector<8x1xf32>
    %33 = arith.divf %31, %32 : vector<8x1xf32>
    %34 = vector.broadcast %33 : vector<8x1xf32> to vector<8x128xf32>
    %35 = arith.subf %29, %34 : vector<8x128xf32>
    %36 = arith.mulf %35, %35 : vector<8x128xf32>
    %cst_14 = arith.constant dense<0.000000e+00> : vector<8xf32>
    %37 = vector.multi_reduction <add>, %36, %cst_14 [1] : vector<8x128xf32> to vector<8xf32>
    %38 = vector.shape_cast %37 : vector<8xf32> to vector<8x1xf32>
    %cst_15 = arith.constant 1.280000e+02 : f32
    %39 = vector.broadcast %cst_15 : f32 to vector<8x1xf32>
    %40 = arith.divf %38, %39 : vector<8x1xf32>
    %cst_16 = arith.constant 9.99999974E-6 : f32
    %41 = vector.broadcast %cst_16 : f32 to vector<8x1xf32>
    %42 = arith.addf %40, %41 : vector<8x1xf32>
    %43 = math.rsqrt %42 : vector<8x1xf32>
    %44 = vector.broadcast %43 : vector<8x1xf32> to vector<8x128xf32>
    %45 = arith.mulf %35, %44 : vector<8x128xf32>
    %46 = arith.negf %45 : vector<8x128xf32>
    %47 = math.exp %46 : vector<8x128xf32>
    %cst_17 = arith.constant 1.000000e+00 : f32
    %48 = vector.broadcast %cst_17 : f32 to vector<8x128xf32>
    %49 = arith.addf %48, %47 : vector<8x128xf32>
    %50 = arith.divf %48, %49 : vector<8x128xf32>
    %51 = vector.extract_strided_slice %6 {offsets = [16, 0], sizes = [8, 128], strides = [1, 1]} : vector<56x128xf32> to vector<8x128xf32>
    %cst_18 = arith.constant dense<0.000000e+00> : vector<8xf32>
    %52 = vector.multi_reduction <add>, %51, %cst_18 [1] : vector<8x128xf32> to vector<8xf32>
    %53 = vector.shape_cast %52 : vector<8xf32> to vector<8x1xf32>
    %cst_19 = arith.constant 1.280000e+02 : f32
    %54 = vector.broadcast %cst_19 : f32 to vector<8x1xf32>
    %55 = arith.divf %53, %54 : vector<8x1xf32>
    %56 = vector.broadcast %55 : vector<8x1xf32> to vector<8x128xf32>
    %57 = arith.subf %51, %56 : vector<8x128xf32>
    %58 = arith.mulf %57, %57 : vector<8x128xf32>
    %cst_20 = arith.constant dense<0.000000e+00> : vector<8xf32>
    %59 = vector.multi_reduction <add>, %58, %cst_20 [1] : vector<8x128xf32> to vector<8xf32>
    %60 = vector.shape_cast %59 : vector<8xf32> to vector<8x1xf32>
    %cst_21 = arith.constant 1.280000e+02 : f32
    %61 = vector.broadcast %cst_21 : f32 to vector<8x1xf32>
    %62 = arith.divf %60, %61 : vector<8x1xf32>
    %cst_22 = arith.constant 9.99999974E-6 : f32
    %63 = vector.broadcast %cst_22 : f32 to vector<8x1xf32>
    %64 = arith.addf %62, %63 : vector<8x1xf32>
    %65 = math.rsqrt %64 : vector<8x1xf32>
    %66 = vector.broadcast %65 : vector<8x1xf32> to vector<8x128xf32>
    %67 = arith.mulf %57, %66 : vector<8x128xf32>
    %68 = math.tanh %67 : vector<8x128xf32>
    %69 = vector.extract_strided_slice %6 {offsets = [24, 0], sizes = [8, 128], strides = [1, 1]} : vector<56x128xf32> to vector<8x128xf32>
    %cst_23 = arith.constant dense<0.000000e+00> : vector<8xf32>
    %70 = vector.multi_reduction <add>, %69, %cst_23 [1] : vector<8x128xf32> to vector<8xf32>
    %71 = vector.shape_cast %70 : vector<8xf32> to vector<8x1xf32>
    %cst_24 = arith.constant 1.280000e+02 : f32
    %72 = vector.broadcast %cst_24 : f32 to vector<8x1xf32>
    %73 = arith.divf %71, %72 : vector<8x1xf32>
    %74 = vector.broadcast %73 : vector<8x1xf32> to vector<8x128xf32>
    %75 = arith.subf %69, %74 : vector<8x128xf32>
    %76 = arith.mulf %75, %75 : vector<8x128xf32>
    %cst_25 = arith.constant dense<0.000000e+00> : vector<8xf32>
    %77 = vector.multi_reduction <add>, %76, %cst_25 [1] : vector<8x128xf32> to vector<8xf32>
    %78 = vector.shape_cast %77 : vector<8xf32> to vector<8x1xf32>
    %cst_26 = arith.constant 1.280000e+02 : f32
    %79 = vector.broadcast %cst_26 : f32 to vector<8x1xf32>
    %80 = arith.divf %78, %79 : vector<8x1xf32>
    %cst_27 = arith.constant 9.99999974E-6 : f32
    %81 = vector.broadcast %cst_27 : f32 to vector<8x1xf32>
    %82 = arith.addf %80, %81 : vector<8x1xf32>
    %83 = math.rsqrt %82 : vector<8x1xf32>
    %84 = vector.broadcast %83 : vector<8x1xf32> to vector<8x128xf32>
    %85 = arith.mulf %75, %84 : vector<8x128xf32>
    %86 = arith.negf %85 : vector<8x128xf32>
    %87 = math.exp %86 : vector<8x128xf32>
    %cst_28 = arith.constant 1.000000e+00 : f32
    %88 = vector.broadcast %cst_28 : f32 to vector<8x128xf32>
    %89 = arith.addf %88, %87 : vector<8x128xf32>
    %90 = arith.divf %88, %89 : vector<8x128xf32>
    %91 = vector.extract_strided_slice %6 {offsets = [32, 0], sizes = [8, 128], strides = [1, 1]} : vector<56x128xf32> to vector<8x128xf32>
    %cst_29 = arith.constant dense<0.000000e+00> : vector<8xf32>
    %92 = vector.multi_reduction <add>, %91, %cst_29 [1] : vector<8x128xf32> to vector<8xf32>
    %93 = vector.shape_cast %92 : vector<8xf32> to vector<8x1xf32>
    %cst_30 = arith.constant 1.280000e+02 : f32
    %94 = vector.broadcast %cst_30 : f32 to vector<8x1xf32>
    %95 = arith.divf %93, %94 : vector<8x1xf32>
    %96 = vector.broadcast %95 : vector<8x1xf32> to vector<8x128xf32>
    %97 = arith.subf %91, %96 : vector<8x128xf32>
    %98 = arith.mulf %97, %97 : vector<8x128xf32>
    %cst_31 = arith.constant dense<0.000000e+00> : vector<8xf32>
    %99 = vector.multi_reduction <add>, %98, %cst_31 [1] : vector<8x128xf32> to vector<8xf32>
    %100 = vector.shape_cast %99 : vector<8xf32> to vector<8x1xf32>
    %cst_32 = arith.constant 1.280000e+02 : f32
    %101 = vector.broadcast %cst_32 : f32 to vector<8x1xf32>
    %102 = arith.divf %100, %101 : vector<8x1xf32>
    %cst_33 = arith.constant 9.99999974E-6 : f32
    %103 = vector.broadcast %cst_33 : f32 to vector<8x1xf32>
    %104 = arith.addf %102, %103 : vector<8x1xf32>
    %105 = math.rsqrt %104 : vector<8x1xf32>
    %106 = vector.broadcast %105 : vector<8x1xf32> to vector<8x128xf32>
    %107 = arith.mulf %97, %106 : vector<8x128xf32>
    %108 = math.tanh %107 : vector<8x128xf32>
    %109 = vector.extract_strided_slice %6 {offsets = [40, 0], sizes = [8, 128], strides = [1, 1]} : vector<56x128xf32> to vector<8x128xf32>
    %cst_34 = arith.constant dense<0.000000e+00> : vector<8xf32>
    %110 = vector.multi_reduction <add>, %109, %cst_34 [1] : vector<8x128xf32> to vector<8xf32>
    %111 = vector.shape_cast %110 : vector<8xf32> to vector<8x1xf32>
    %cst_35 = arith.constant 1.280000e+02 : f32
    %112 = vector.broadcast %cst_35 : f32 to vector<8x1xf32>
    %113 = arith.divf %111, %112 : vector<8x1xf32>
    %114 = vector.broadcast %113 : vector<8x1xf32> to vector<8x128xf32>
    %115 = arith.subf %109, %114 : vector<8x128xf32>
    %116 = arith.mulf %115, %115 : vector<8x128xf32>
    %cst_36 = arith.constant dense<0.000000e+00> : vector<8xf32>
    %117 = vector.multi_reduction <add>, %116, %cst_36 [1] : vector<8x128xf32> to vector<8xf32>
    %118 = vector.shape_cast %117 : vector<8xf32> to vector<8x1xf32>
    %cst_37 = arith.constant 1.280000e+02 : f32
    %119 = vector.broadcast %cst_37 : f32 to vector<8x1xf32>
    %120 = arith.divf %118, %119 : vector<8x1xf32>
    %cst_38 = arith.constant 9.99999974E-6 : f32
    %121 = vector.broadcast %cst_38 : f32 to vector<8x1xf32>
    %122 = arith.addf %120, %121 : vector<8x1xf32>
    %123 = math.rsqrt %122 : vector<8x1xf32>
    %124 = vector.broadcast %123 : vector<8x1xf32> to vector<8x128xf32>
    %125 = arith.mulf %115, %124 : vector<8x128xf32>
    %126 = arith.negf %125 : vector<8x128xf32>
    %127 = math.exp %126 : vector<8x128xf32>
    %cst_39 = arith.constant 1.000000e+00 : f32
    %128 = vector.broadcast %cst_39 : f32 to vector<8x128xf32>
    %129 = arith.addf %128, %127 : vector<8x128xf32>
    %130 = arith.divf %128, %129 : vector<8x128xf32>
    %131 = vector.extract_strided_slice %6 {offsets = [48, 0], sizes = [8, 128], strides = [1, 1]} : vector<56x128xf32> to vector<8x128xf32>
    %c0_40 = arith.constant 0 : index
    %c0_41 = arith.constant 0 : index
    %c0_42 = arith.constant 0 : index
    %c0_43 = arith.constant 0 : index
    %132 = vector.load %arg3[%c0_40, %c0_41, %c0_42, %c0_43] : memref<2x2x8x128xf32, #tpu.memory_space<vmem>>, vector<1x1x8x128xf32>
    %133 = vector.shape_cast %132 : vector<1x1x8x128xf32> to vector<8x128xf32>
    %134 = arith.mulf %28, %133 : vector<8x128xf32>
    %cst_44 = arith.constant dense<0.000000e+00> : vector<8xf32>
    %135 = vector.multi_reduction <add>, %134, %cst_44 [1] : vector<8x128xf32> to vector<8xf32>
    %136 = vector.shape_cast %135 : vector<8xf32> to vector<8x1xf32>
    %cst_45 = arith.constant dense<0.000000e+00> : vector<1xf32>
    %137 = vector.multi_reduction <add>, %136, %cst_45 [0] : vector<8x1xf32> to vector<1xf32>
    %138 = vector.shape_cast %137 : vector<1xf32> to vector<1x1xf32>
    %cst_46 = arith.constant 0.0220970865 : f32
    %139 = vector.broadcast %cst_46 : f32 to vector<1x1xf32>
    %140 = arith.mulf %138, %139 : vector<1x1xf32>
    %c1 = arith.constant 1 : index
    %c0_47 = arith.constant 0 : index
    %c0_48 = arith.constant 0 : index
    %c0_49 = arith.constant 0 : index
    %141 = vector.load %arg3[%c1, %c0_47, %c0_48, %c0_49] : memref<2x2x8x128xf32, #tpu.memory_space<vmem>>, vector<1x1x8x128xf32>
    %142 = vector.shape_cast %141 : vector<1x1x8x128xf32> to vector<8x128xf32>
    %143 = arith.mulf %28, %142 : vector<8x128xf32>
    %cst_50 = arith.constant dense<0.000000e+00> : vector<8xf32>
    %144 = vector.multi_reduction <add>, %143, %cst_50 [1] : vector<8x128xf32> to vector<8xf32>
    %145 = vector.shape_cast %144 : vector<8xf32> to vector<8x1xf32>
    %cst_51 = arith.constant dense<0.000000e+00> : vector<1xf32>
    %146 = vector.multi_reduction <add>, %145, %cst_51 [0] : vector<8x1xf32> to vector<1xf32>
    %147 = vector.shape_cast %146 : vector<1xf32> to vector<1x1xf32>
    %cst_52 = arith.constant 0.0220970865 : f32
    %148 = vector.broadcast %cst_52 : f32 to vector<1x1xf32>
    %149 = arith.mulf %147, %148 : vector<1x1xf32>
    %c1_53 = arith.constant 1 : index
    %c0_54 = arith.constant 0 : index
    %c0_55 = arith.constant 0 : index
    %150 = vector.load %arg0[%c1_53, %c0_54, %c0_55] : memref<2x360x128xbf16, #tpu.memory_space<vmem>>, vector<1x360x128xbf16>
    %151 = vector.shape_cast %150 : vector<1x360x128xbf16> to vector<360x128xbf16>
    %cst_56 = arith.constant dense<0.000000e+00> : vector<56x128xf32>
    %152 = tpu.matmul %0, %151, %cst_56 {dimension_numbers = #tpu.dot_dimension_numbers<[1], [0], [0], [1], [0, 0, 1, 1], [], []>} : vector<56x360xbf16>, vector<360x128xbf16>, vector<56x128xf32> -> vector<56x128xf32>
    %153 = vector.broadcast %1 : vector<56x1xf32> to vector<56x128xf32>
    %154 = arith.addf %152, %153 : vector<56x128xf32>
    %155 = vector.extract_strided_slice %154 {offsets = [0, 0], sizes = [8, 128], strides = [1, 1]} : vector<56x128xf32> to vector<8x128xf32>
    %cst_57 = arith.constant dense<0.000000e+00> : vector<8xf32>
    %156 = vector.multi_reduction <add>, %155, %cst_57 [1] : vector<8x128xf32> to vector<8xf32>
    %157 = vector.shape_cast %156 : vector<8xf32> to vector<8x1xf32>
    %cst_58 = arith.constant 1.280000e+02 : f32
    %158 = vector.broadcast %cst_58 : f32 to vector<8x1xf32>
    %159 = arith.divf %157, %158 : vector<8x1xf32>
    %160 = vector.broadcast %159 : vector<8x1xf32> to vector<8x128xf32>
    %161 = arith.subf %155, %160 : vector<8x128xf32>
    %162 = arith.mulf %161, %161 : vector<8x128xf32>
    %cst_59 = arith.constant dense<0.000000e+00> : vector<8xf32>
    %163 = vector.multi_reduction <add>, %162, %cst_59 [1] : vector<8x128xf32> to vector<8xf32>
    %164 = vector.shape_cast %163 : vector<8xf32> to vector<8x1xf32>
    %cst_60 = arith.constant 1.280000e+02 : f32
    %165 = vector.broadcast %cst_60 : f32 to vector<8x1xf32>
    %166 = arith.divf %164, %165 : vector<8x1xf32>
    %cst_61 = arith.constant 9.99999974E-6 : f32
    %167 = vector.broadcast %cst_61 : f32 to vector<8x1xf32>
    %168 = arith.addf %166, %167 : vector<8x1xf32>
    %169 = math.rsqrt %168 : vector<8x1xf32>
    %170 = vector.broadcast %169 : vector<8x1xf32> to vector<8x128xf32>
    %171 = arith.mulf %161, %170 : vector<8x128xf32>
    %172 = arith.negf %171 : vector<8x128xf32>
    %173 = math.exp %172 : vector<8x128xf32>
    %cst_62 = arith.constant 1.000000e+00 : f32
    %174 = vector.broadcast %cst_62 : f32 to vector<8x128xf32>
    %175 = arith.addf %174, %173 : vector<8x128xf32>
    %176 = arith.divf %174, %175 : vector<8x128xf32>
    %177 = vector.extract_strided_slice %154 {offsets = [8, 0], sizes = [8, 128], strides = [1, 1]} : vector<56x128xf32> to vector<8x128xf32>
    %cst_63 = arith.constant dense<0.000000e+00> : vector<8xf32>
    %178 = vector.multi_reduction <add>, %177, %cst_63 [1] : vector<8x128xf32> to vector<8xf32>
    %179 = vector.shape_cast %178 : vector<8xf32> to vector<8x1xf32>
    %cst_64 = arith.constant 1.280000e+02 : f32
    %180 = vector.broadcast %cst_64 : f32 to vector<8x1xf32>
    %181 = arith.divf %179, %180 : vector<8x1xf32>
    %182 = vector.broadcast %181 : vector<8x1xf32> to vector<8x128xf32>
    %183 = arith.subf %177, %182 : vector<8x128xf32>
    %184 = arith.mulf %183, %183 : vector<8x128xf32>
    %cst_65 = arith.constant dense<0.000000e+00> : vector<8xf32>
    %185 = vector.multi_reduction <add>, %184, %cst_65 [1] : vector<8x128xf32> to vector<8xf32>
    %186 = vector.shape_cast %185 : vector<8xf32> to vector<8x1xf32>
    %cst_66 = arith.constant 1.280000e+02 : f32
    %187 = vector.broadcast %cst_66 : f32 to vector<8x1xf32>
    %188 = arith.divf %186, %187 : vector<8x1xf32>
    %cst_67 = arith.constant 9.99999974E-6 : f32
    %189 = vector.broadcast %cst_67 : f32 to vector<8x1xf32>
    %190 = arith.addf %188, %189 : vector<8x1xf32>
    %191 = math.rsqrt %190 : vector<8x1xf32>
    %192 = vector.broadcast %191 : vector<8x1xf32> to vector<8x128xf32>
    %193 = arith.mulf %183, %192 : vector<8x128xf32>
    %194 = arith.negf %193 : vector<8x128xf32>
    %195 = math.exp %194 : vector<8x128xf32>
    %cst_68 = arith.constant 1.000000e+00 : f32
    %196 = vector.broadcast %cst_68 : f32 to vector<8x128xf32>
    %197 = arith.addf %196, %195 : vector<8x128xf32>
    %198 = arith.divf %196, %197 : vector<8x128xf32>
    %199 = vector.extract_strided_slice %154 {offsets = [16, 0], sizes = [8, 128], strides = [1, 1]} : vector<56x128xf32> to vector<8x128xf32>
    %cst_69 = arith.constant dense<0.000000e+00> : vector<8xf32>
    %200 = vector.multi_reduction <add>, %199, %cst_69 [1] : vector<8x128xf32> to vector<8xf32>
    %201 = vector.shape_cast %200 : vector<8xf32> to vector<8x1xf32>
    %cst_70 = arith.constant 1.280000e+02 : f32
    %202 = vector.broadcast %cst_70 : f32 to vector<8x1xf32>
    %203 = arith.divf %201, %202 : vector<8x1xf32>
    %204 = vector.broadcast %203 : vector<8x1xf32> to vector<8x128xf32>
    %205 = arith.subf %199, %204 : vector<8x128xf32>
    %206 = arith.mulf %205, %205 : vector<8x128xf32>
    %cst_71 = arith.constant dense<0.000000e+00> : vector<8xf32>
    %207 = vector.multi_reduction <add>, %206, %cst_71 [1] : vector<8x128xf32> to vector<8xf32>
    %208 = vector.shape_cast %207 : vector<8xf32> to vector<8x1xf32>
    %cst_72 = arith.constant 1.280000e+02 : f32
    %209 = vector.broadcast %cst_72 : f32 to vector<8x1xf32>
    %210 = arith.divf %208, %209 : vector<8x1xf32>
    %cst_73 = arith.constant 9.99999974E-6 : f32
    %211 = vector.broadcast %cst_73 : f32 to vector<8x1xf32>
    %212 = arith.addf %210, %211 : vector<8x1xf32>
    %213 = math.rsqrt %212 : vector<8x1xf32>
    %214 = vector.broadcast %213 : vector<8x1xf32> to vector<8x128xf32>
    %215 = arith.mulf %205, %214 : vector<8x128xf32>
    %216 = math.tanh %215 : vector<8x128xf32>
    %217 = vector.extract_strided_slice %154 {offsets = [24, 0], sizes = [8, 128], strides = [1, 1]} : vector<56x128xf32> to vector<8x128xf32>
    %cst_74 = arith.constant dense<0.000000e+00> : vector<8xf32>
    %218 = vector.multi_reduction <add>, %217, %cst_74 [1] : vector<8x128xf32> to vector<8xf32>
    %219 = vector.shape_cast %218 : vector<8xf32> to vector<8x1xf32>
    %cst_75 = arith.constant 1.280000e+02 : f32
    %220 = vector.broadcast %cst_75 : f32 to vector<8x1xf32>
    %221 = arith.divf %219, %220 : vector<8x1xf32>
    %222 = vector.broadcast %221 : vector<8x1xf32> to vector<8x128xf32>
    %223 = arith.subf %217, %222 : vector<8x128xf32>
    %224 = arith.mulf %223, %223 : vector<8x128xf32>
    %cst_76 = arith.constant dense<0.000000e+00> : vector<8xf32>
    %225 = vector.multi_reduction <add>, %224, %cst_76 [1] : vector<8x128xf32> to vector<8xf32>
    %226 = vector.shape_cast %225 : vector<8xf32> to vector<8x1xf32>
    %cst_77 = arith.constant 1.280000e+02 : f32
    %227 = vector.broadcast %cst_77 : f32 to vector<8x1xf32>
    %228 = arith.divf %226, %227 : vector<8x1xf32>
    %cst_78 = arith.constant 9.99999974E-6 : f32
    %229 = vector.broadcast %cst_78 : f32 to vector<8x1xf32>
    %230 = arith.addf %228, %229 : vector<8x1xf32>
    %231 = math.rsqrt %230 : vector<8x1xf32>
    %232 = vector.broadcast %231 : vector<8x1xf32> to vector<8x128xf32>
    %233 = arith.mulf %223, %232 : vector<8x128xf32>
    %234 = arith.negf %233 : vector<8x128xf32>
    %235 = math.exp %234 : vector<8x128xf32>
    %cst_79 = arith.constant 1.000000e+00 : f32
    %236 = vector.broadcast %cst_79 : f32 to vector<8x128xf32>
    %237 = arith.addf %236, %235 : vector<8x128xf32>
    %238 = arith.divf %236, %237 : vector<8x128xf32>
    %239 = vector.extract_strided_slice %154 {offsets = [32, 0], sizes = [8, 128], strides = [1, 1]} : vector<56x128xf32> to vector<8x128xf32>
    %cst_80 = arith.constant dense<0.000000e+00> : vector<8xf32>
    %240 = vector.multi_reduction <add>, %239, %cst_80 [1] : vector<8x128xf32> to vector<8xf32>
    %241 = vector.shape_cast %240 : vector<8xf32> to vector<8x1xf32>
    %cst_81 = arith.constant 1.280000e+02 : f32
    %242 = vector.broadcast %cst_81 : f32 to vector<8x1xf32>
    %243 = arith.divf %241, %242 : vector<8x1xf32>
    %244 = vector.broadcast %243 : vector<8x1xf32> to vector<8x128xf32>
    %245 = arith.subf %239, %244 : vector<8x128xf32>
    %246 = arith.mulf %245, %245 : vector<8x128xf32>
    %cst_82 = arith.constant dense<0.000000e+00> : vector<8xf32>
    %247 = vector.multi_reduction <add>, %246, %cst_82 [1] : vector<8x128xf32> to vector<8xf32>
    %248 = vector.shape_cast %247 : vector<8xf32> to vector<8x1xf32>
    %cst_83 = arith.constant 1.280000e+02 : f32
    %249 = vector.broadcast %cst_83 : f32 to vector<8x1xf32>
    %250 = arith.divf %248, %249 : vector<8x1xf32>
    %cst_84 = arith.constant 9.99999974E-6 : f32
    %251 = vector.broadcast %cst_84 : f32 to vector<8x1xf32>
    %252 = arith.addf %250, %251 : vector<8x1xf32>
    %253 = math.rsqrt %252 : vector<8x1xf32>
    %254 = vector.broadcast %253 : vector<8x1xf32> to vector<8x128xf32>
    %255 = arith.mulf %245, %254 : vector<8x128xf32>
    %256 = math.tanh %255 : vector<8x128xf32>
    %257 = vector.extract_strided_slice %154 {offsets = [40, 0], sizes = [8, 128], strides = [1, 1]} : vector<56x128xf32> to vector<8x128xf32>
    %cst_85 = arith.constant dense<0.000000e+00> : vector<8xf32>
    %258 = vector.multi_reduction <add>, %257, %cst_85 [1] : vector<8x128xf32> to vector<8xf32>
    %259 = vector.shape_cast %258 : vector<8xf32> to vector<8x1xf32>
    %cst_86 = arith.constant 1.280000e+02 : f32
    %260 = vector.broadcast %cst_86 : f32 to vector<8x1xf32>
    %261 = arith.divf %259, %260 : vector<8x1xf32>
    %262 = vector.broadcast %261 : vector<8x1xf32> to vector<8x128xf32>
    %263 = arith.subf %257, %262 : vector<8x128xf32>
    %264 = arith.mulf %263, %263 : vector<8x128xf32>
    %cst_87 = arith.constant dense<0.000000e+00> : vector<8xf32>
    %265 = vector.multi_reduction <add>, %264, %cst_87 [1] : vector<8x128xf32> to vector<8xf32>
    %266 = vector.shape_cast %265 : vector<8xf32> to vector<8x1xf32>
    %cst_88 = arith.constant 1.280000e+02 : f32
    %267 = vector.broadcast %cst_88 : f32 to vector<8x1xf32>
    %268 = arith.divf %266, %267 : vector<8x1xf32>
    %cst_89 = arith.constant 9.99999974E-6 : f32
    %269 = vector.broadcast %cst_89 : f32 to vector<8x1xf32>
    %270 = arith.addf %268, %269 : vector<8x1xf32>
    %271 = math.rsqrt %270 : vector<8x1xf32>
    %272 = vector.broadcast %271 : vector<8x1xf32> to vector<8x128xf32>
    %273 = arith.mulf %263, %272 : vector<8x128xf32>
    %274 = arith.negf %273 : vector<8x128xf32>
    %275 = math.exp %274 : vector<8x128xf32>
    %cst_90 = arith.constant 1.000000e+00 : f32
    %276 = vector.broadcast %cst_90 : f32 to vector<8x128xf32>
    %277 = arith.addf %276, %275 : vector<8x128xf32>
    %278 = arith.divf %276, %277 : vector<8x128xf32>
    %279 = vector.extract_strided_slice %154 {offsets = [48, 0], sizes = [8, 128], strides = [1, 1]} : vector<56x128xf32> to vector<8x128xf32>
    %c0_91 = arith.constant 0 : index
    %c1_92 = arith.constant 1 : index
    %c0_93 = arith.constant 0 : index
    %c0_94 = arith.constant 0 : index
    %280 = vector.load %arg3[%c0_91, %c1_92, %c0_93, %c0_94] : memref<2x2x8x128xf32, #tpu.memory_space<vmem>>, vector<1x1x8x128xf32>
    %281 = vector.shape_cast %280 : vector<1x1x8x128xf32> to vector<8x128xf32>
    %282 = arith.mulf %176, %281 : vector<8x128xf32>
    %cst_95 = arith.constant dense<0.000000e+00> : vector<8xf32>
    %283 = vector.multi_reduction <add>, %282, %cst_95 [1] : vector<8x128xf32> to vector<8xf32>
    %284 = vector.shape_cast %283 : vector<8xf32> to vector<8x1xf32>
    %cst_96 = arith.constant dense<0.000000e+00> : vector<1xf32>
    %285 = vector.multi_reduction <add>, %284, %cst_96 [0] : vector<8x1xf32> to vector<1xf32>
    %286 = vector.shape_cast %285 : vector<1xf32> to vector<1x1xf32>
    %cst_97 = arith.constant 0.0220970865 : f32
    %287 = vector.broadcast %cst_97 : f32 to vector<1x1xf32>
    %288 = arith.mulf %286, %287 : vector<1x1xf32>
    %c1_98 = arith.constant 1 : index
    %c1_99 = arith.constant 1 : index
    %c0_100 = arith.constant 0 : index
    %c0_101 = arith.constant 0 : index
    %289 = vector.load %arg3[%c1_98, %c1_99, %c0_100, %c0_101] : memref<2x2x8x128xf32, #tpu.memory_space<vmem>>, vector<1x1x8x128xf32>
    %290 = vector.shape_cast %289 : vector<1x1x8x128xf32> to vector<8x128xf32>
    %291 = arith.mulf %176, %290 : vector<8x128xf32>
    %cst_102 = arith.constant dense<0.000000e+00> : vector<8xf32>
    %292 = vector.multi_reduction <add>, %291, %cst_102 [1] : vector<8x128xf32> to vector<8xf32>
    %293 = vector.shape_cast %292 : vector<8xf32> to vector<8x1xf32>
    %cst_103 = arith.constant dense<0.000000e+00> : vector<1xf32>
    %294 = vector.multi_reduction <add>, %293, %cst_103 [0] : vector<8x1xf32> to vector<1xf32>
    %295 = vector.shape_cast %294 : vector<1xf32> to vector<1x1xf32>
    %cst_104 = arith.constant 0.0220970865 : f32
    %296 = vector.broadcast %cst_104 : f32 to vector<1x1xf32>
    %297 = arith.mulf %295, %296 : vector<1x1xf32>
    %298 = arith.maximumf %140, %288 : vector<1x1xf32>
    %299 = arith.subf %140, %298 : vector<1x1xf32>
    %300 = math.exp %299 : vector<1x1xf32>
    %301 = arith.subf %288, %298 : vector<1x1xf32>
    %302 = math.exp %301 : vector<1x1xf32>
    %303 = arith.addf %300, %302 : vector<1x1xf32>
    %304 = arith.divf %300, %303 : vector<1x1xf32>
    %305 = arith.divf %302, %303 : vector<1x1xf32>
    %306 = arith.maximumf %149, %297 : vector<1x1xf32>
    %307 = arith.subf %149, %306 : vector<1x1xf32>
    %308 = math.exp %307 : vector<1x1xf32>
    %309 = arith.subf %297, %306 : vector<1x1xf32>
    %310 = math.exp %309 : vector<1x1xf32>
    %311 = arith.addf %308, %310 : vector<1x1xf32>
    %312 = arith.divf %308, %311 : vector<1x1xf32>
    %313 = arith.divf %310, %311 : vector<1x1xf32>
    %c0_105 = arith.constant 0 : index
    %c0_106 = arith.constant 0 : index
    %c0_107 = arith.constant 0 : index
    %c0_108 = arith.constant 0 : index
    %314 = vector.load %arg3[%c0_105, %c0_106, %c0_107, %c0_108] : memref<2x2x8x128xf32, #tpu.memory_space<vmem>>, vector<1x1x8x128xf32>
    %315 = vector.shape_cast %314 : vector<1x1x8x128xf32> to vector<8x128xf32>
    %316 = vector.broadcast %304 : vector<1x1xf32> to vector<8x128xf32>
    %317 = arith.mulf %316, %315 : vector<8x128xf32>
    %c1_109 = arith.constant 1 : index
    %c0_110 = arith.constant 0 : index
    %c0_111 = arith.constant 0 : index
    %c0_112 = arith.constant 0 : index
    %318 = vector.load %arg3[%c1_109, %c0_110, %c0_111, %c0_112] : memref<2x2x8x128xf32, #tpu.memory_space<vmem>>, vector<1x1x8x128xf32>
    %319 = vector.shape_cast %318 : vector<1x1x8x128xf32> to vector<8x128xf32>
    %320 = vector.broadcast %312 : vector<1x1xf32> to vector<8x128xf32>
    %321 = arith.mulf %320, %319 : vector<8x128xf32>
    %322 = arith.addf %317, %321 : vector<8x128xf32>
    %c1_113 = arith.constant 1 : index
    %c0_114 = arith.constant 0 : index
    %c0_115 = arith.constant 0 : index
    %c0_116 = arith.constant 0 : index
    %323 = vector.load %arg3[%c1_113, %c0_114, %c0_115, %c0_116] : memref<2x2x8x128xf32, #tpu.memory_space<vmem>>, vector<1x1x8x128xf32>
    %324 = vector.shape_cast %323 : vector<1x1x8x128xf32> to vector<8x128xf32>
    %325 = arith.addf %324, %322 : vector<8x128xf32>
    %cst_117 = arith.constant dense<0.000000e+00> : vector<8xf32>
    %326 = vector.multi_reduction <add>, %325, %cst_117 [1] : vector<8x128xf32> to vector<8xf32>
    %327 = vector.shape_cast %326 : vector<8xf32> to vector<8x1xf32>
    %cst_118 = arith.constant dense<0.000000e+00> : vector<1xf32>
    %328 = vector.multi_reduction <add>, %327, %cst_118 [0] : vector<8x1xf32> to vector<1xf32>
    %329 = vector.shape_cast %328 : vector<1xf32> to vector<1x1xf32>
    %cst_119 = arith.constant 9.765625E-4 : f32
    %330 = vector.broadcast %cst_119 : f32 to vector<1x1xf32>
    %331 = arith.mulf %329, %330 : vector<1x1xf32>
    %332 = vector.broadcast %331 : vector<1x1xf32> to vector<8x128xf32>
    %333 = arith.subf %325, %332 : vector<8x128xf32>
    %334 = arith.mulf %333, %333 : vector<8x128xf32>
    %cst_120 = arith.constant dense<0.000000e+00> : vector<8xf32>
    %335 = vector.multi_reduction <add>, %334, %cst_120 [1] : vector<8x128xf32> to vector<8xf32>
    %336 = vector.shape_cast %335 : vector<8xf32> to vector<8x1xf32>
    %cst_121 = arith.constant dense<0.000000e+00> : vector<1xf32>
    %337 = vector.multi_reduction <add>, %336, %cst_121 [0] : vector<8x1xf32> to vector<1xf32>
    %338 = vector.shape_cast %337 : vector<1xf32> to vector<1x1xf32>
    %cst_122 = arith.constant 9.765625E-4 : f32
    %339 = vector.broadcast %cst_122 : f32 to vector<1x1xf32>
    %340 = arith.mulf %338, %339 : vector<1x1xf32>
    %cst_123 = arith.constant 9.99999974E-6 : f32
    %341 = vector.broadcast %cst_123 : f32 to vector<1x1xf32>
    %342 = arith.addf %340, %341 : vector<1x1xf32>
    %343 = math.rsqrt %342 : vector<1x1xf32>
    %344 = vector.broadcast %343 : vector<1x1xf32> to vector<8x128xf32>
    %345 = arith.mulf %333, %344 : vector<8x128xf32>
    %346 = arith.mulf %50, %68 : vector<8x128xf32>
    %347 = arith.addf %346, %345 : vector<8x128xf32>
    %348 = arith.mulf %90, %108 : vector<8x128xf32>
    %c0_124 = arith.constant 0 : index
    %c0_125 = arith.constant 0 : index
    %c0_126 = arith.constant 0 : index
    %349 = vector.load %arg4[%c0_124, %c0_125, %c0_126] : memref<2x8x128xf32, #tpu.memory_space<vmem>>, vector<1x8x128xf32>
    %350 = vector.shape_cast %349 : vector<1x8x128xf32> to vector<8x128xf32>
    %351 = arith.mulf %130, %350 : vector<8x128xf32>
    %352 = arith.addf %348, %351 : vector<8x128xf32>
    %c0_127 = arith.constant 0 : index
    %c0_128 = arith.constant 0 : index
    %c0_129 = arith.constant 0 : index
    %353 = vector.load %arg5[%c0_127, %c0_128, %c0_129] : memref<2x8x128xf32, #tpu.memory_space<vmem>>, vector<1x8x128xf32>
    %354 = vector.shape_cast %353 : vector<1x8x128xf32> to vector<8x128xf32>
    %355 = vector.shape_cast %347 : vector<8x128xf32> to vector<1x8x128xf32>
    tpu.vector_store %arg5[%c0_127, %c0_128, %c0_129], %355 {strides = array<i32>} : memref<2x8x128xf32, #tpu.memory_space<vmem>>, vector<1x8x128xf32>,
    %c0_130 = arith.constant 0 : index
    %c0_131 = arith.constant 0 : index
    %c0_132 = arith.constant 0 : index
    %356 = vector.load %arg6[%c0_130, %c0_131, %c0_132] : memref<2x8x128xf32, #tpu.memory_space<vmem>>, vector<1x8x128xf32>
    %357 = vector.shape_cast %356 : vector<1x8x128xf32> to vector<8x128xf32>
    %358 = vector.shape_cast %352 : vector<8x128xf32> to vector<1x8x128xf32>
    tpu.vector_store %arg6[%c0_130, %c0_131, %c0_132], %358 {strides = array<i32>} : memref<2x8x128xf32, #tpu.memory_space<vmem>>, vector<1x8x128xf32>,
    %c0_133 = arith.constant 0 : index
    %c0_134 = arith.constant 0 : index
    %c0_135 = arith.constant 0 : index
    %359 = vector.load %arg7[%c0_133, %c0_134, %c0_135] : memref<2x8x128xf32, #tpu.memory_space<vmem>>, vector<1x8x128xf32>
    %360 = vector.shape_cast %359 : vector<1x8x128xf32> to vector<8x128xf32>
    %361 = vector.shape_cast %131 : vector<8x128xf32> to vector<1x8x128xf32>
    tpu.vector_store %arg7[%c0_133, %c0_134, %c0_135], %361 {strides = array<i32>} : memref<2x8x128xf32, #tpu.memory_space<vmem>>, vector<1x8x128xf32>,
    %c0_136 = arith.constant 0 : index
    %c1_137 = arith.constant 1 : index
    %c0_138 = arith.constant 0 : index
    %c0_139 = arith.constant 0 : index
    %362 = vector.load %arg3[%c0_136, %c1_137, %c0_138, %c0_139] : memref<2x2x8x128xf32, #tpu.memory_space<vmem>>, vector<1x1x8x128xf32>
    %363 = vector.shape_cast %362 : vector<1x1x8x128xf32> to vector<8x128xf32>
    %364 = vector.broadcast %305 : vector<1x1xf32> to vector<8x128xf32>
    %365 = arith.mulf %364, %363 : vector<8x128xf32>
    %c1_140 = arith.constant 1 : index
    %c1_141 = arith.constant 1 : index
    %c0_142 = arith.constant 0 : index
    %c0_143 = arith.constant 0 : index
    %366 = vector.load %arg3[%c1_140, %c1_141, %c0_142, %c0_143] : memref<2x2x8x128xf32, #tpu.memory_space<vmem>>, vector<1x1x8x128xf32>
    %367 = vector.shape_cast %366 : vector<1x1x8x128xf32> to vector<8x128xf32>
    %368 = vector.broadcast %313 : vector<1x1xf32> to vector<8x128xf32>
    %369 = arith.mulf %368, %367 : vector<8x128xf32>
    %370 = arith.addf %365, %369 : vector<8x128xf32>
    %c1_144 = arith.constant 1 : index
    %c1_145 = arith.constant 1 : index
    %c0_146 = arith.constant 0 : index
    %c0_147 = arith.constant 0 : index
    %371 = vector.load %arg3[%c1_144, %c1_145, %c0_146, %c0_147] : memref<2x2x8x128xf32, #tpu.memory_space<vmem>>, vector<1x1x8x128xf32>
    %372 = vector.shape_cast %371 : vector<1x1x8x128xf32> to vector<8x128xf32>
    %373 = arith.addf %372, %370 : vector<8x128xf32>
    %cst_148 = arith.constant dense<0.000000e+00> : vector<8xf32>
    %374 = vector.multi_reduction <add>, %373, %cst_148 [1] : vector<8x128xf32> to vector<8xf32>
    %375 = vector.shape_cast %374 : vector<8xf32> to vector<8x1xf32>
    %cst_149 = arith.constant dense<0.000000e+00> : vector<1xf32>
    %376 = vector.multi_reduction <add>, %375, %cst_149 [0] : vector<8x1xf32> to vector<1xf32>
    %377 = vector.shape_cast %376 : vector<1xf32> to vector<1x1xf32>
    %cst_150 = arith.constant 9.765625E-4 : f32
    %378 = vector.broadcast %cst_150 : f32 to vector<1x1xf32>
    %379 = arith.mulf %377, %378 : vector<1x1xf32>
    %380 = vector.broadcast %379 : vector<1x1xf32> to vector<8x128xf32>
    %381 = arith.subf %373, %380 : vector<8x128xf32>
    %382 = arith.mulf %381, %381 : vector<8x128xf32>
    %cst_151 = arith.constant dense<0.000000e+00> : vector<8xf32>
    %383 = vector.multi_reduction <add>, %382, %cst_151 [1] : vector<8x128xf32> to vector<8xf32>
    %384 = vector.shape_cast %383 : vector<8xf32> to vector<8x1xf32>
    %cst_152 = arith.constant dense<0.000000e+00> : vector<1xf32>
    %385 = vector.multi_reduction <add>, %384, %cst_152 [0] : vector<8x1xf32> to vector<1xf32>
    %386 = vector.shape_cast %385 : vector<1xf32> to vector<1x1xf32>
    %cst_153 = arith.constant 9.765625E-4 : f32
    %387 = vector.broadcast %cst_153 : f32 to vector<1x1xf32>
    %388 = arith.mulf %386, %387 : vector<1x1xf32>
    %cst_154 = arith.constant 9.99999974E-6 : f32
    %389 = vector.broadcast %cst_154 : f32 to vector<1x1xf32>
    %390 = arith.addf %388, %389 : vector<1x1xf32>
    %391 = math.rsqrt %390 : vector<1x1xf32>
    %392 = vector.broadcast %391 : vector<1x1xf32> to vector<8x128xf32>
    %393 = arith.mulf %381, %392 : vector<8x128xf32>
    %394 = arith.mulf %198, %216 : vector<8x128xf32>
    %395 = arith.addf %394, %393 : vector<8x128xf32>
    %396 = arith.mulf %238, %256 : vector<8x128xf32>
    %c1_155 = arith.constant 1 : index
    %c0_156 = arith.constant 0 : index
    %c0_157 = arith.constant 0 : index
    %397 = vector.load %arg4[%c1_155, %c0_156, %c0_157] : memref<2x8x128xf32, #tpu.memory_space<vmem>>, vector<1x8x128xf32>
    %398 = vector.shape_cast %397 : vector<1x8x128xf32> to vector<8x128xf32>
    %399 = arith.mulf %278, %398 : vector<8x128xf32>
    %400 = arith.addf %396, %399 : vector<8x128xf32>
    %c1_158 = arith.constant 1 : index
    %c0_159 = arith.constant 0 : index
    %c0_160 = arith.constant 0 : index
    %401 = vector.load %arg5[%c1_158, %c0_159, %c0_160] : memref<2x8x128xf32, #tpu.memory_space<vmem>>, vector<1x8x128xf32>
    %402 = vector.shape_cast %401 : vector<1x8x128xf32> to vector<8x128xf32>
    %403 = vector.shape_cast %395 : vector<8x128xf32> to vector<1x8x128xf32>
    tpu.vector_store %arg5[%c1_158, %c0_159, %c0_160], %403 {strides = array<i32>} : memref<2x8x128xf32, #tpu.memory_space<vmem>>, vector<1x8x128xf32>,
    %c1_161 = arith.constant 1 : index
    %c0_162 = arith.constant 0 : index
    %c0_163 = arith.constant 0 : index
    %404 = vector.load %arg6[%c1_161, %c0_162, %c0_163] : memref<2x8x128xf32, #tpu.memory_space<vmem>>, vector<1x8x128xf32>
    %405 = vector.shape_cast %404 : vector<1x8x128xf32> to vector<8x128xf32>
    %406 = vector.shape_cast %400 : vector<8x128xf32> to vector<1x8x128xf32>
    tpu.vector_store %arg6[%c1_161, %c0_162, %c0_163], %406 {strides = array<i32>} : memref<2x8x128xf32, #tpu.memory_space<vmem>>, vector<1x8x128xf32>,
    %c1_164 = arith.constant 1 : index
    %c0_165 = arith.constant 0 : index
    %c0_166 = arith.constant 0 : index
    %407 = vector.load %arg7[%c1_164, %c0_165, %c0_166] : memref<2x8x128xf32, #tpu.memory_space<vmem>>, vector<1x8x128xf32>
    %408 = vector.shape_cast %407 : vector<1x8x128xf32> to vector<8x128xf32>
    %409 = vector.shape_cast %279 : vector<8x128xf32> to vector<1x8x128xf32>
    tpu.vector_store %arg7[%c1_164, %c0_165, %c0_166], %409 {strides = array<i32>} : memref<2x8x128xf32, #tpu.memory_space<vmem>>, vector<1x8x128xf32>,
    return
  }
}

module attributes {stable_mosaic.version = 11 : i64} {
  func.func @_cell_stage2_kernel(%arg0: i32, %arg1: memref<1x144x128xbf16, #tpu.memory_space<vmem>>, %arg2: memref<8x144xbf16, #tpu.memory_space<vmem>>, %arg3: memref<1x8x128xf32, #tpu.memory_space<vmem>>, %arg4: memref<1x8x128xf32, #tpu.memory_space<vmem>>, %arg5: memref<1x8x128xf32, #tpu.memory_space<vmem>>, %arg6: memref<8x16xf32, #tpu.memory_space<vmem>>, %arg7: memref<8x1xf32, #tpu.memory_space<vmem>>, %arg8: memref<1x8x128xf32, #tpu.memory_space<vmem>>) attributes {dimension_semantics = [#tpu.dimension_semantics<parallel>], iteration_bounds = array<i64: 2>, scalar_prefetch = 0 : i64, scratch_operands = 0 : i64, tpu.core_type = #tpu.core_type<tc>, window_params = [{transform_indices = @transform_0, window_bounds = array<i64: 1, 144, 128>}, {pipeline_mode = #tpu.pipeline_mode<synchronous>, transform_indices = @transform_1, window_bounds = array<i64: 8, 144>}, {transform_indices = @transform_2, window_bounds = array<i64: 1, 8, 128>}, {transform_indices = @transform_3, window_bounds = array<i64: 1, 8, 128>}, {transform_indices = @transform_4, window_bounds = array<i64: 1, 8, 128>}, {pipeline_mode = #tpu.pipeline_mode<synchronous>, transform_indices = @transform_5, window_bounds = array<i64: 8, 16>}, {pipeline_mode = #tpu.pipeline_mode<synchronous>, transform_indices = @transform_6, window_bounds = array<i64: 8, 1>}, {transform_indices = @transform_7, window_bounds = array<i64: 1, 8, 128>}]} {
    %c0 = arith.constant 0 : index
    %c0_0 = arith.constant 0 : index
    %0 = vector.load %arg2[%c0, %c0_0] : memref<8x144xbf16, #tpu.memory_space<vmem>>, vector<8x144xbf16>
    %c0_1 = arith.constant 0 : index
    %c0_2 = arith.constant 0 : index
    %c0_3 = arith.constant 0 : index
    %1 = vector.load %arg1[%c0_1, %c0_2, %c0_3] : memref<1x144x128xbf16, #tpu.memory_space<vmem>>, vector<1x144x128xbf16>
    %2 = vector.shape_cast %1 : vector<1x144x128xbf16> to vector<144x128xbf16>
    %cst = arith.constant dense<0.000000e+00> : vector<8x128xf32>
    %3 = tpu.matmul %0, %2, %cst {dimension_numbers = #tpu.dot_dimension_numbers<[1], [0], [0], [1], [0, 0, 1, 1], [], []>} : vector<8x144xbf16>, vector<144x128xbf16>, vector<8x128xf32> -> vector<8x128xf32>
    %c0_4 = arith.constant 0 : index
    %c0_5 = arith.constant 0 : index
    %c0_6 = arith.constant 0 : index
    %4 = vector.load %arg3[%c0_4, %c0_5, %c0_6] : memref<1x8x128xf32, #tpu.memory_space<vmem>>, vector<1x8x128xf32>
    %5 = vector.shape_cast %4 : vector<1x8x128xf32> to vector<8x128xf32>
    %6 = arith.addf %5, %3 : vector<8x128xf32>
    %cst_7 = arith.constant dense<0.000000e+00> : vector<8xf32>
    %7 = vector.multi_reduction <add>, %6, %cst_7 [1] : vector<8x128xf32> to vector<8xf32>
    %8 = vector.shape_cast %7 : vector<8xf32> to vector<8x1xf32>
    %cst_8 = arith.constant 1.280000e+02 : f32
    %9 = vector.broadcast %cst_8 : f32 to vector<8x1xf32>
    %10 = arith.divf %8, %9 : vector<8x1xf32>
    %11 = vector.broadcast %10 : vector<8x1xf32> to vector<8x128xf32>
    %12 = arith.subf %6, %11 : vector<8x128xf32>
    %13 = arith.mulf %12, %12 : vector<8x128xf32>
    %cst_9 = arith.constant dense<0.000000e+00> : vector<8xf32>
    %14 = vector.multi_reduction <add>, %13, %cst_9 [1] : vector<8x128xf32> to vector<8xf32>
    %15 = vector.shape_cast %14 : vector<8xf32> to vector<8x1xf32>
    %cst_10 = arith.constant 1.280000e+02 : f32
    %16 = vector.broadcast %cst_10 : f32 to vector<8x1xf32>
    %17 = arith.divf %15, %16 : vector<8x1xf32>
    %cst_11 = arith.constant 9.99999974E-6 : f32
    %18 = vector.broadcast %cst_11 : f32 to vector<8x1xf32>
    %19 = arith.addf %17, %18 : vector<8x1xf32>
    %20 = math.rsqrt %19 : vector<8x1xf32>
    %21 = vector.broadcast %20 : vector<8x1xf32> to vector<8x128xf32>
    %22 = arith.mulf %12, %21 : vector<8x128xf32>
    %23 = arith.negf %22 : vector<8x128xf32>
    %24 = math.exp %23 : vector<8x128xf32>
    %cst_12 = arith.constant 1.000000e+00 : f32
    %25 = vector.broadcast %cst_12 : f32 to vector<8x128xf32>
    %26 = arith.addf %25, %24 : vector<8x128xf32>
    %27 = arith.divf %25, %26 : vector<8x128xf32>
    %c0_13 = arith.constant 0 : index
    %c0_14 = arith.constant 0 : index
    %c0_15 = arith.constant 0 : index
    %28 = vector.load %arg4[%c0_13, %c0_14, %c0_15] : memref<1x8x128xf32, #tpu.memory_space<vmem>>, vector<1x8x128xf32>
    %29 = vector.shape_cast %28 : vector<1x8x128xf32> to vector<8x128xf32>
    %c0_16 = arith.constant 0 : index
    %c0_17 = arith.constant 0 : index
    %c0_18 = arith.constant 0 : index
    %30 = vector.load %arg5[%c0_16, %c0_17, %c0_18] : memref<1x8x128xf32, #tpu.memory_space<vmem>>, vector<1x8x128xf32>
    %31 = vector.shape_cast %30 : vector<1x8x128xf32> to vector<8x128xf32>
    %32 = tpu.concatenate %29, %31 in 0 : vector<8x128xf32>, vector<8x128xf32> -> vector<16x128xf32>
    %c0_19 = arith.constant 0 : index
    %c0_20 = arith.constant 0 : index
    %33 = vector.load %arg6[%c0_19, %c0_20] : memref<8x16xf32, #tpu.memory_space<vmem>>, vector<8x16xf32>
    %cst_21 = arith.constant dense<0.000000e+00> : vector<8x128xf32>
    %34 = tpu.matmul %33, %32, %cst_21 {dimension_numbers = #tpu.dot_dimension_numbers<[1], [0], [0], [1], [0, 0, 1, 1], [], []>} : vector<8x16xf32>, vector<16x128xf32>, vector<8x128xf32> -> vector<8x128xf32>
    %c0_22 = arith.constant 0 : index
    %c0_23 = arith.constant 0 : index
    %35 = vector.load %arg7[%c0_22, %c0_23] : memref<8x1xf32, #tpu.memory_space<vmem>>, vector<8x1xf32>
    %36 = vector.broadcast %35 : vector<8x1xf32> to vector<8x128xf32>
    %37 = arith.addf %34, %36 : vector<8x128xf32>
    %38 = math.tanh %37 : vector<8x128xf32>
    %39 = arith.mulf %27, %38 : vector<8x128xf32>
    %c0_24 = arith.constant 0 : index
    %c0_25 = arith.constant 0 : index
    %c0_26 = arith.constant 0 : index
    %40 = vector.load %arg8[%c0_24, %c0_25, %c0_26] : memref<1x8x128xf32, #tpu.memory_space<vmem>>, vector<1x8x128xf32>
    %41 = vector.shape_cast %40 : vector<1x8x128xf32> to vector<8x128xf32>
    %42 = vector.shape_cast %39 : vector<8x128xf32> to vector<1x8x128xf32>
    tpu.vector_store %arg8[%c0_24, %c0_25, %c0_26], %42 {strides = array<i32>} : memref<1x8x128xf32, #tpu.memory_space<vmem>>, vector<1x8x128xf32>,
    return
  }
  func.func @transform_0(%arg0: i32) -> (i32, i32, i32) {
    %c0_i32 = arith.constant 0 : i32
    %c0_i32_0 = arith.constant 0 : i32
    %c0_i32_1 = arith.constant 0 : i32
    return %arg0, %c0_i32, %c0_i32_0 : i32, i32, i32
  }
  func.func @transform_1(%arg0: i32) -> (i32, i32) {
    %c0_i32 = arith.constant 0 : i32
    %c0_i32_0 = arith.constant 0 : i32
    %c0_i32_1 = arith.constant 0 : i32
    return %c0_i32, %c0_i32_0 : i32, i32
  }
  func.func @transform_2(%arg0: i32) -> (i32, i32, i32) {
    %c0_i32 = arith.constant 0 : i32
    %c0_i32_0 = arith.constant 0 : i32
    %c0_i32_1 = arith.constant 0 : i32
    return %arg0, %c0_i32, %c0_i32_0 : i32, i32, i32
  }
  func.func @transform_3(%arg0: i32) -> (i32, i32, i32) {
    %c0_i32 = arith.constant 0 : i32
    %c0_i32_0 = arith.constant 0 : i32
    %c0_i32_1 = arith.constant 0 : i32
    return %arg0, %c0_i32, %c0_i32_0 : i32, i32, i32
  }
  func.func @transform_4(%arg0: i32) -> (i32, i32, i32) {
    %c0_i32 = arith.constant 0 : i32
    %c0_i32_0 = arith.constant 0 : i32
    %c0_i32_1 = arith.constant 0 : i32
    return %arg0, %c0_i32, %c0_i32_0 : i32, i32, i32
  }
  func.func @transform_5(%arg0: i32) -> (i32, i32) {
    %c0_i32 = arith.constant 0 : i32
    %c0_i32_0 = arith.constant 0 : i32
    %c0_i32_1 = arith.constant 0 : i32
    return %c0_i32, %c0_i32_0 : i32, i32
  }
  func.func @transform_6(%arg0: i32) -> (i32, i32) {
    %c0_i32 = arith.constant 0 : i32
    %c0_i32_0 = arith.constant 0 : i32
    %c0_i32_1 = arith.constant 0 : i32
    return %c0_i32, %c0_i32_0 : i32, i32
  }
  func.func @transform_7(%arg0: i32) -> (i32, i32, i32) {
    %c0_i32 = arith.constant 0 : i32
    %c0_i32_0 = arith.constant 0 : i32
    %c0_i32_1 = arith.constant 0 : i32
    return %arg0, %c0_i32, %c0_i32_0 : i32, i32, i32
  }
}

module attributes {stable_mosaic.version = 11 : i64} {
  func.func @_cell_stage1_kernel(%arg0: memref<2x432x128xbf16, #tpu.memory_space<vmem>>, %arg1: memref<56x432xbf16, #tpu.memory_space<vmem>>, %arg2: memref<56x1xf32, #tpu.memory_space<vmem>>, %arg3: memref<2x2x8x128xf32, #tpu.memory_space<vmem>>, %arg4: memref<2x8x128xf32, #tpu.memory_space<vmem>>, %arg5: memref<2x8x128xf32, #tpu.memory_space<vmem>>, %arg6: memref<2x8x128xf32, #tpu.memory_space<vmem>>, %arg7: memref<2x8x128xf32, #tpu.memory_space<vmem>>) attributes {dimension_semantics = [], scalar_prefetch = 0 : i64, scratch_operands = 0 : i64, tpu.core_type = #tpu.core_type<tc>} {
    %c0 = arith.constant 0 : index
    %c0_0 = arith.constant 0 : index
    %0 = vector.load %arg1[%c0, %c0_0] : memref<56x432xbf16, #tpu.memory_space<vmem>>, vector<56x432xbf16>
    %c0_1 = arith.constant 0 : index
    %c0_2 = arith.constant 0 : index
    %1 = vector.load %arg2[%c0_1, %c0_2] : memref<56x1xf32, #tpu.memory_space<vmem>>, vector<56x1xf32>
    %c0_3 = arith.constant 0 : index
    %c0_4 = arith.constant 0 : index
    %c0_5 = arith.constant 0 : index
    %2 = vector.load %arg0[%c0_3, %c0_4, %c0_5] : memref<2x432x128xbf16, #tpu.memory_space<vmem>>, vector<1x432x128xbf16>
    %3 = vector.shape_cast %2 : vector<1x432x128xbf16> to vector<432x128xbf16>
    %cst = arith.constant dense<0.000000e+00> : vector<56x128xf32>
    %4 = tpu.matmul %0, %3, %cst {dimension_numbers = #tpu.dot_dimension_numbers<[1], [0], [0], [1], [0, 0, 1, 1], [], []>} : vector<56x432xbf16>, vector<432x128xbf16>, vector<56x128xf32> -> vector<56x128xf32>
    %5 = vector.broadcast %1 : vector<56x1xf32> to vector<56x128xf32>
    %6 = arith.addf %4, %5 : vector<56x128xf32>
    %7 = vector.extract_strided_slice %6 {offsets = [0, 0], sizes = [8, 128], strides = [1, 1]} : vector<56x128xf32> to vector<8x128xf32>
    %cst_6 = arith.constant dense<0.000000e+00> : vector<8xf32>
    %8 = vector.multi_reduction <add>, %7, %cst_6 [1] : vector<8x128xf32> to vector<8xf32>
    %9 = vector.shape_cast %8 : vector<8xf32> to vector<8x1xf32>
    %cst_7 = arith.constant 1.280000e+02 : f32
    %10 = vector.broadcast %cst_7 : f32 to vector<8x1xf32>
    %11 = arith.divf %9, %10 : vector<8x1xf32>
    %12 = vector.broadcast %11 : vector<8x1xf32> to vector<8x128xf32>
    %13 = arith.subf %7, %12 : vector<8x128xf32>
    %14 = arith.mulf %13, %13 : vector<8x128xf32>
    %cst_8 = arith.constant dense<0.000000e+00> : vector<8xf32>
    %15 = vector.multi_reduction <add>, %14, %cst_8 [1] : vector<8x128xf32> to vector<8xf32>
    %16 = vector.shape_cast %15 : vector<8xf32> to vector<8x1xf32>
    %cst_9 = arith.constant 1.280000e+02 : f32
    %17 = vector.broadcast %cst_9 : f32 to vector<8x1xf32>
    %18 = arith.divf %16, %17 : vector<8x1xf32>
    %cst_10 = arith.constant 9.99999974E-6 : f32
    %19 = vector.broadcast %cst_10 : f32 to vector<8x1xf32>
    %20 = arith.addf %18, %19 : vector<8x1xf32>
    %21 = math.rsqrt %20 : vector<8x1xf32>
    %22 = vector.broadcast %21 : vector<8x1xf32> to vector<8x128xf32>
    %23 = arith.mulf %13, %22 : vector<8x128xf32>
    %24 = arith.negf %23 : vector<8x128xf32>
    %25 = math.exp %24 : vector<8x128xf32>
    %cst_11 = arith.constant 1.000000e+00 : f32
    %26 = vector.broadcast %cst_11 : f32 to vector<8x128xf32>
    %27 = arith.addf %26, %25 : vector<8x128xf32>
    %28 = arith.divf %26, %27 : vector<8x128xf32>
    %29 = vector.extract_strided_slice %6 {offsets = [8, 0], sizes = [8, 128], strides = [1, 1]} : vector<56x128xf32> to vector<8x128xf32>
    %cst_12 = arith.constant dense<0.000000e+00> : vector<8xf32>
    %30 = vector.multi_reduction <add>, %29, %cst_12 [1] : vector<8x128xf32> to vector<8xf32>
    %31 = vector.shape_cast %30 : vector<8xf32> to vector<8x1xf32>
    %cst_13 = arith.constant 1.280000e+02 : f32
    %32 = vector.broadcast %cst_13 : f32 to vector<8x1xf32>
    %33 = arith.divf %31, %32 : vector<8x1xf32>
    %34 = vector.broadcast %33 : vector<8x1xf32> to vector<8x128xf32>
    %35 = arith.subf %29, %34 : vector<8x128xf32>
    %36 = arith.mulf %35, %35 : vector<8x128xf32>
    %cst_14 = arith.constant dense<0.000000e+00> : vector<8xf32>
    %37 = vector.multi_reduction <add>, %36, %cst_14 [1] : vector<8x128xf32> to vector<8xf32>
    %38 = vector.shape_cast %37 : vector<8xf32> to vector<8x1xf32>
    %cst_15 = arith.constant 1.280000e+02 : f32
    %39 = vector.broadcast %cst_15 : f32 to vector<8x1xf32>
    %40 = arith.divf %38, %39 : vector<8x1xf32>
    %cst_16 = arith.constant 9.99999974E-6 : f32
    %41 = vector.broadcast %cst_16 : f32 to vector<8x1xf32>
    %42 = arith.addf %40, %41 : vector<8x1xf32>
    %43 = math.rsqrt %42 : vector<8x1xf32>
    %44 = vector.broadcast %43 : vector<8x1xf32> to vector<8x128xf32>
    %45 = arith.mulf %35, %44 : vector<8x128xf32>
    %46 = arith.negf %45 : vector<8x128xf32>
    %47 = math.exp %46 : vector<8x128xf32>
    %cst_17 = arith.constant 1.000000e+00 : f32
    %48 = vector.broadcast %cst_17 : f32 to vector<8x128xf32>
    %49 = arith.addf %48, %47 : vector<8x128xf32>
    %50 = arith.divf %48, %49 : vector<8x128xf32>
    %51 = vector.extract_strided_slice %6 {offsets = [16, 0], sizes = [8, 128], strides = [1, 1]} : vector<56x128xf32> to vector<8x128xf32>
    %cst_18 = arith.constant dense<0.000000e+00> : vector<8xf32>
    %52 = vector.multi_reduction <add>, %51, %cst_18 [1] : vector<8x128xf32> to vector<8xf32>
    %53 = vector.shape_cast %52 : vector<8xf32> to vector<8x1xf32>
    %cst_19 = arith.constant 1.280000e+02 : f32
    %54 = vector.broadcast %cst_19 : f32 to vector<8x1xf32>
    %55 = arith.divf %53, %54 : vector<8x1xf32>
    %56 = vector.broadcast %55 : vector<8x1xf32> to vector<8x128xf32>
    %57 = arith.subf %51, %56 : vector<8x128xf32>
    %58 = arith.mulf %57, %57 : vector<8x128xf32>
    %cst_20 = arith.constant dense<0.000000e+00> : vector<8xf32>
    %59 = vector.multi_reduction <add>, %58, %cst_20 [1] : vector<8x128xf32> to vector<8xf32>
    %60 = vector.shape_cast %59 : vector<8xf32> to vector<8x1xf32>
    %cst_21 = arith.constant 1.280000e+02 : f32
    %61 = vector.broadcast %cst_21 : f32 to vector<8x1xf32>
    %62 = arith.divf %60, %61 : vector<8x1xf32>
    %cst_22 = arith.constant 9.99999974E-6 : f32
    %63 = vector.broadcast %cst_22 : f32 to vector<8x1xf32>
    %64 = arith.addf %62, %63 : vector<8x1xf32>
    %65 = math.rsqrt %64 : vector<8x1xf32>
    %66 = vector.broadcast %65 : vector<8x1xf32> to vector<8x128xf32>
    %67 = arith.mulf %57, %66 : vector<8x128xf32>
    %68 = math.tanh %67 : vector<8x128xf32>
    %69 = vector.extract_strided_slice %6 {offsets = [24, 0], sizes = [8, 128], strides = [1, 1]} : vector<56x128xf32> to vector<8x128xf32>
    %cst_23 = arith.constant dense<0.000000e+00> : vector<8xf32>
    %70 = vector.multi_reduction <add>, %69, %cst_23 [1] : vector<8x128xf32> to vector<8xf32>
    %71 = vector.shape_cast %70 : vector<8xf32> to vector<8x1xf32>
    %cst_24 = arith.constant 1.280000e+02 : f32
    %72 = vector.broadcast %cst_24 : f32 to vector<8x1xf32>
    %73 = arith.divf %71, %72 : vector<8x1xf32>
    %74 = vector.broadcast %73 : vector<8x1xf32> to vector<8x128xf32>
    %75 = arith.subf %69, %74 : vector<8x128xf32>
    %76 = arith.mulf %75, %75 : vector<8x128xf32>
    %cst_25 = arith.constant dense<0.000000e+00> : vector<8xf32>
    %77 = vector.multi_reduction <add>, %76, %cst_25 [1] : vector<8x128xf32> to vector<8xf32>
    %78 = vector.shape_cast %77 : vector<8xf32> to vector<8x1xf32>
    %cst_26 = arith.constant 1.280000e+02 : f32
    %79 = vector.broadcast %cst_26 : f32 to vector<8x1xf32>
    %80 = arith.divf %78, %79 : vector<8x1xf32>
    %cst_27 = arith.constant 9.99999974E-6 : f32
    %81 = vector.broadcast %cst_27 : f32 to vector<8x1xf32>
    %82 = arith.addf %80, %81 : vector<8x1xf32>
    %83 = math.rsqrt %82 : vector<8x1xf32>
    %84 = vector.broadcast %83 : vector<8x1xf32> to vector<8x128xf32>
    %85 = arith.mulf %75, %84 : vector<8x128xf32>
    %86 = arith.negf %85 : vector<8x128xf32>
    %87 = math.exp %86 : vector<8x128xf32>
    %cst_28 = arith.constant 1.000000e+00 : f32
    %88 = vector.broadcast %cst_28 : f32 to vector<8x128xf32>
    %89 = arith.addf %88, %87 : vector<8x128xf32>
    %90 = arith.divf %88, %89 : vector<8x128xf32>
    %91 = vector.extract_strided_slice %6 {offsets = [32, 0], sizes = [8, 128], strides = [1, 1]} : vector<56x128xf32> to vector<8x128xf32>
    %cst_29 = arith.constant dense<0.000000e+00> : vector<8xf32>
    %92 = vector.multi_reduction <add>, %91, %cst_29 [1] : vector<8x128xf32> to vector<8xf32>
    %93 = vector.shape_cast %92 : vector<8xf32> to vector<8x1xf32>
    %cst_30 = arith.constant 1.280000e+02 : f32
    %94 = vector.broadcast %cst_30 : f32 to vector<8x1xf32>
    %95 = arith.divf %93, %94 : vector<8x1xf32>
    %96 = vector.broadcast %95 : vector<8x1xf32> to vector<8x128xf32>
    %97 = arith.subf %91, %96 : vector<8x128xf32>
    %98 = arith.mulf %97, %97 : vector<8x128xf32>
    %cst_31 = arith.constant dense<0.000000e+00> : vector<8xf32>
    %99 = vector.multi_reduction <add>, %98, %cst_31 [1] : vector<8x128xf32> to vector<8xf32>
    %100 = vector.shape_cast %99 : vector<8xf32> to vector<8x1xf32>
    %cst_32 = arith.constant 1.280000e+02 : f32
    %101 = vector.broadcast %cst_32 : f32 to vector<8x1xf32>
    %102 = arith.divf %100, %101 : vector<8x1xf32>
    %cst_33 = arith.constant 9.99999974E-6 : f32
    %103 = vector.broadcast %cst_33 : f32 to vector<8x1xf32>
    %104 = arith.addf %102, %103 : vector<8x1xf32>
    %105 = math.rsqrt %104 : vector<8x1xf32>
    %106 = vector.broadcast %105 : vector<8x1xf32> to vector<8x128xf32>
    %107 = arith.mulf %97, %106 : vector<8x128xf32>
    %108 = math.tanh %107 : vector<8x128xf32>
    %109 = vector.extract_strided_slice %6 {offsets = [40, 0], sizes = [8, 128], strides = [1, 1]} : vector<56x128xf32> to vector<8x128xf32>
    %cst_34 = arith.constant dense<0.000000e+00> : vector<8xf32>
    %110 = vector.multi_reduction <add>, %109, %cst_34 [1] : vector<8x128xf32> to vector<8xf32>
    %111 = vector.shape_cast %110 : vector<8xf32> to vector<8x1xf32>
    %cst_35 = arith.constant 1.280000e+02 : f32
    %112 = vector.broadcast %cst_35 : f32 to vector<8x1xf32>
    %113 = arith.divf %111, %112 : vector<8x1xf32>
    %114 = vector.broadcast %113 : vector<8x1xf32> to vector<8x128xf32>
    %115 = arith.subf %109, %114 : vector<8x128xf32>
    %116 = arith.mulf %115, %115 : vector<8x128xf32>
    %cst_36 = arith.constant dense<0.000000e+00> : vector<8xf32>
    %117 = vector.multi_reduction <add>, %116, %cst_36 [1] : vector<8x128xf32> to vector<8xf32>
    %118 = vector.shape_cast %117 : vector<8xf32> to vector<8x1xf32>
    %cst_37 = arith.constant 1.280000e+02 : f32
    %119 = vector.broadcast %cst_37 : f32 to vector<8x1xf32>
    %120 = arith.divf %118, %119 : vector<8x1xf32>
    %cst_38 = arith.constant 9.99999974E-6 : f32
    %121 = vector.broadcast %cst_38 : f32 to vector<8x1xf32>
    %122 = arith.addf %120, %121 : vector<8x1xf32>
    %123 = math.rsqrt %122 : vector<8x1xf32>
    %124 = vector.broadcast %123 : vector<8x1xf32> to vector<8x128xf32>
    %125 = arith.mulf %115, %124 : vector<8x128xf32>
    %126 = arith.negf %125 : vector<8x128xf32>
    %127 = math.exp %126 : vector<8x128xf32>
    %cst_39 = arith.constant 1.000000e+00 : f32
    %128 = vector.broadcast %cst_39 : f32 to vector<8x128xf32>
    %129 = arith.addf %128, %127 : vector<8x128xf32>
    %130 = arith.divf %128, %129 : vector<8x128xf32>
    %131 = vector.extract_strided_slice %6 {offsets = [48, 0], sizes = [8, 128], strides = [1, 1]} : vector<56x128xf32> to vector<8x128xf32>
    %c0_40 = arith.constant 0 : index
    %c0_41 = arith.constant 0 : index
    %c0_42 = arith.constant 0 : index
    %c0_43 = arith.constant 0 : index
    %132 = vector.load %arg3[%c0_40, %c0_41, %c0_42, %c0_43] : memref<2x2x8x128xf32, #tpu.memory_space<vmem>>, vector<1x1x8x128xf32>
    %133 = vector.shape_cast %132 : vector<1x1x8x128xf32> to vector<8x128xf32>
    %134 = arith.mulf %28, %133 : vector<8x128xf32>
    %cst_44 = arith.constant dense<0.000000e+00> : vector<8xf32>
    %135 = vector.multi_reduction <add>, %134, %cst_44 [1] : vector<8x128xf32> to vector<8xf32>
    %136 = vector.shape_cast %135 : vector<8xf32> to vector<8x1xf32>
    %cst_45 = arith.constant dense<0.000000e+00> : vector<1xf32>
    %137 = vector.multi_reduction <add>, %136, %cst_45 [0] : vector<8x1xf32> to vector<1xf32>
    %138 = vector.shape_cast %137 : vector<1xf32> to vector<1x1xf32>
    %cst_46 = arith.constant 0.0220970865 : f32
    %139 = vector.broadcast %cst_46 : f32 to vector<1x1xf32>
    %140 = arith.mulf %138, %139 : vector<1x1xf32>
    %c1 = arith.constant 1 : index
    %c0_47 = arith.constant 0 : index
    %c0_48 = arith.constant 0 : index
    %c0_49 = arith.constant 0 : index
    %141 = vector.load %arg3[%c1, %c0_47, %c0_48, %c0_49] : memref<2x2x8x128xf32, #tpu.memory_space<vmem>>, vector<1x1x8x128xf32>
    %142 = vector.shape_cast %141 : vector<1x1x8x128xf32> to vector<8x128xf32>
    %143 = arith.mulf %28, %142 : vector<8x128xf32>
    %cst_50 = arith.constant dense<0.000000e+00> : vector<8xf32>
    %144 = vector.multi_reduction <add>, %143, %cst_50 [1] : vector<8x128xf32> to vector<8xf32>
    %145 = vector.shape_cast %144 : vector<8xf32> to vector<8x1xf32>
    %cst_51 = arith.constant dense<0.000000e+00> : vector<1xf32>
    %146 = vector.multi_reduction <add>, %145, %cst_51 [0] : vector<8x1xf32> to vector<1xf32>
    %147 = vector.shape_cast %146 : vector<1xf32> to vector<1x1xf32>
    %cst_52 = arith.constant 0.0220970865 : f32
    %148 = vector.broadcast %cst_52 : f32 to vector<1x1xf32>
    %149 = arith.mulf %147, %148 : vector<1x1xf32>
    %c1_53 = arith.constant 1 : index
    %c0_54 = arith.constant 0 : index
    %c0_55 = arith.constant 0 : index
    %150 = vector.load %arg0[%c1_53, %c0_54, %c0_55] : memref<2x432x128xbf16, #tpu.memory_space<vmem>>, vector<1x432x128xbf16>
    %151 = vector.shape_cast %150 : vector<1x432x128xbf16> to vector<432x128xbf16>
    %cst_56 = arith.constant dense<0.000000e+00> : vector<56x128xf32>
    %152 = tpu.matmul %0, %151, %cst_56 {dimension_numbers = #tpu.dot_dimension_numbers<[1], [0], [0], [1], [0, 0, 1, 1], [], []>} : vector<56x432xbf16>, vector<432x128xbf16>, vector<56x128xf32> -> vector<56x128xf32>
    %153 = vector.broadcast %1 : vector<56x1xf32> to vector<56x128xf32>
    %154 = arith.addf %152, %153 : vector<56x128xf32>
    %155 = vector.extract_strided_slice %154 {offsets = [0, 0], sizes = [8, 128], strides = [1, 1]} : vector<56x128xf32> to vector<8x128xf32>
    %cst_57 = arith.constant dense<0.000000e+00> : vector<8xf32>
    %156 = vector.multi_reduction <add>, %155, %cst_57 [1] : vector<8x128xf32> to vector<8xf32>
    %157 = vector.shape_cast %156 : vector<8xf32> to vector<8x1xf32>
    %cst_58 = arith.constant 1.280000e+02 : f32
    %158 = vector.broadcast %cst_58 : f32 to vector<8x1xf32>
    %159 = arith.divf %157, %158 : vector<8x1xf32>
    %160 = vector.broadcast %159 : vector<8x1xf32> to vector<8x128xf32>
    %161 = arith.subf %155, %160 : vector<8x128xf32>
    %162 = arith.mulf %161, %161 : vector<8x128xf32>
    %cst_59 = arith.constant dense<0.000000e+00> : vector<8xf32>
    %163 = vector.multi_reduction <add>, %162, %cst_59 [1] : vector<8x128xf32> to vector<8xf32>
    %164 = vector.shape_cast %163 : vector<8xf32> to vector<8x1xf32>
    %cst_60 = arith.constant 1.280000e+02 : f32
    %165 = vector.broadcast %cst_60 : f32 to vector<8x1xf32>
    %166 = arith.divf %164, %165 : vector<8x1xf32>
    %cst_61 = arith.constant 9.99999974E-6 : f32
    %167 = vector.broadcast %cst_61 : f32 to vector<8x1xf32>
    %168 = arith.addf %166, %167 : vector<8x1xf32>
    %169 = math.rsqrt %168 : vector<8x1xf32>
    %170 = vector.broadcast %169 : vector<8x1xf32> to vector<8x128xf32>
    %171 = arith.mulf %161, %170 : vector<8x128xf32>
    %172 = arith.negf %171 : vector<8x128xf32>
    %173 = math.exp %172 : vector<8x128xf32>
    %cst_62 = arith.constant 1.000000e+00 : f32
    %174 = vector.broadcast %cst_62 : f32 to vector<8x128xf32>
    %175 = arith.addf %174, %173 : vector<8x128xf32>
    %176 = arith.divf %174, %175 : vector<8x128xf32>
    %177 = vector.extract_strided_slice %154 {offsets = [8, 0], sizes = [8, 128], strides = [1, 1]} : vector<56x128xf32> to vector<8x128xf32>
    %cst_63 = arith.constant dense<0.000000e+00> : vector<8xf32>
    %178 = vector.multi_reduction <add>, %177, %cst_63 [1] : vector<8x128xf32> to vector<8xf32>
    %179 = vector.shape_cast %178 : vector<8xf32> to vector<8x1xf32>
    %cst_64 = arith.constant 1.280000e+02 : f32
    %180 = vector.broadcast %cst_64 : f32 to vector<8x1xf32>
    %181 = arith.divf %179, %180 : vector<8x1xf32>
    %182 = vector.broadcast %181 : vector<8x1xf32> to vector<8x128xf32>
    %183 = arith.subf %177, %182 : vector<8x128xf32>
    %184 = arith.mulf %183, %183 : vector<8x128xf32>
    %cst_65 = arith.constant dense<0.000000e+00> : vector<8xf32>
    %185 = vector.multi_reduction <add>, %184, %cst_65 [1] : vector<8x128xf32> to vector<8xf32>
    %186 = vector.shape_cast %185 : vector<8xf32> to vector<8x1xf32>
    %cst_66 = arith.constant 1.280000e+02 : f32
    %187 = vector.broadcast %cst_66 : f32 to vector<8x1xf32>
    %188 = arith.divf %186, %187 : vector<8x1xf32>
    %cst_67 = arith.constant 9.99999974E-6 : f32
    %189 = vector.broadcast %cst_67 : f32 to vector<8x1xf32>
    %190 = arith.addf %188, %189 : vector<8x1xf32>
    %191 = math.rsqrt %190 : vector<8x1xf32>
    %192 = vector.broadcast %191 : vector<8x1xf32> to vector<8x128xf32>
    %193 = arith.mulf %183, %192 : vector<8x128xf32>
    %194 = arith.negf %193 : vector<8x128xf32>
    %195 = math.exp %194 : vector<8x128xf32>
    %cst_68 = arith.constant 1.000000e+00 : f32
    %196 = vector.broadcast %cst_68 : f32 to vector<8x128xf32>
    %197 = arith.addf %196, %195 : vector<8x128xf32>
    %198 = arith.divf %196, %197 : vector<8x128xf32>
    %199 = vector.extract_strided_slice %154 {offsets = [16, 0], sizes = [8, 128], strides = [1, 1]} : vector<56x128xf32> to vector<8x128xf32>
    %cst_69 = arith.constant dense<0.000000e+00> : vector<8xf32>
    %200 = vector.multi_reduction <add>, %199, %cst_69 [1] : vector<8x128xf32> to vector<8xf32>
    %201 = vector.shape_cast %200 : vector<8xf32> to vector<8x1xf32>
    %cst_70 = arith.constant 1.280000e+02 : f32
    %202 = vector.broadcast %cst_70 : f32 to vector<8x1xf32>
    %203 = arith.divf %201, %202 : vector<8x1xf32>
    %204 = vector.broadcast %203 : vector<8x1xf32> to vector<8x128xf32>
    %205 = arith.subf %199, %204 : vector<8x128xf32>
    %206 = arith.mulf %205, %205 : vector<8x128xf32>
    %cst_71 = arith.constant dense<0.000000e+00> : vector<8xf32>
    %207 = vector.multi_reduction <add>, %206, %cst_71 [1] : vector<8x128xf32> to vector<8xf32>
    %208 = vector.shape_cast %207 : vector<8xf32> to vector<8x1xf32>
    %cst_72 = arith.constant 1.280000e+02 : f32
    %209 = vector.broadcast %cst_72 : f32 to vector<8x1xf32>
    %210 = arith.divf %208, %209 : vector<8x1xf32>
    %cst_73 = arith.constant 9.99999974E-6 : f32
    %211 = vector.broadcast %cst_73 : f32 to vector<8x1xf32>
    %212 = arith.addf %210, %211 : vector<8x1xf32>
    %213 = math.rsqrt %212 : vector<8x1xf32>
    %214 = vector.broadcast %213 : vector<8x1xf32> to vector<8x128xf32>
    %215 = arith.mulf %205, %214 : vector<8x128xf32>
    %216 = math.tanh %215 : vector<8x128xf32>
    %217 = vector.extract_strided_slice %154 {offsets = [24, 0], sizes = [8, 128], strides = [1, 1]} : vector<56x128xf32> to vector<8x128xf32>
    %cst_74 = arith.constant dense<0.000000e+00> : vector<8xf32>
    %218 = vector.multi_reduction <add>, %217, %cst_74 [1] : vector<8x128xf32> to vector<8xf32>
    %219 = vector.shape_cast %218 : vector<8xf32> to vector<8x1xf32>
    %cst_75 = arith.constant 1.280000e+02 : f32
    %220 = vector.broadcast %cst_75 : f32 to vector<8x1xf32>
    %221 = arith.divf %219, %220 : vector<8x1xf32>
    %222 = vector.broadcast %221 : vector<8x1xf32> to vector<8x128xf32>
    %223 = arith.subf %217, %222 : vector<8x128xf32>
    %224 = arith.mulf %223, %223 : vector<8x128xf32>
    %cst_76 = arith.constant dense<0.000000e+00> : vector<8xf32>
    %225 = vector.multi_reduction <add>, %224, %cst_76 [1] : vector<8x128xf32> to vector<8xf32>
    %226 = vector.shape_cast %225 : vector<8xf32> to vector<8x1xf32>
    %cst_77 = arith.constant 1.280000e+02 : f32
    %227 = vector.broadcast %cst_77 : f32 to vector<8x1xf32>
    %228 = arith.divf %226, %227 : vector<8x1xf32>
    %cst_78 = arith.constant 9.99999974E-6 : f32
    %229 = vector.broadcast %cst_78 : f32 to vector<8x1xf32>
    %230 = arith.addf %228, %229 : vector<8x1xf32>
    %231 = math.rsqrt %230 : vector<8x1xf32>
    %232 = vector.broadcast %231 : vector<8x1xf32> to vector<8x128xf32>
    %233 = arith.mulf %223, %232 : vector<8x128xf32>
    %234 = arith.negf %233 : vector<8x128xf32>
    %235 = math.exp %234 : vector<8x128xf32>
    %cst_79 = arith.constant 1.000000e+00 : f32
    %236 = vector.broadcast %cst_79 : f32 to vector<8x128xf32>
    %237 = arith.addf %236, %235 : vector<8x128xf32>
    %238 = arith.divf %236, %237 : vector<8x128xf32>
    %239 = vector.extract_strided_slice %154 {offsets = [32, 0], sizes = [8, 128], strides = [1, 1]} : vector<56x128xf32> to vector<8x128xf32>
    %cst_80 = arith.constant dense<0.000000e+00> : vector<8xf32>
    %240 = vector.multi_reduction <add>, %239, %cst_80 [1] : vector<8x128xf32> to vector<8xf32>
    %241 = vector.shape_cast %240 : vector<8xf32> to vector<8x1xf32>
    %cst_81 = arith.constant 1.280000e+02 : f32
    %242 = vector.broadcast %cst_81 : f32 to vector<8x1xf32>
    %243 = arith.divf %241, %242 : vector<8x1xf32>
    %244 = vector.broadcast %243 : vector<8x1xf32> to vector<8x128xf32>
    %245 = arith.subf %239, %244 : vector<8x128xf32>
    %246 = arith.mulf %245, %245 : vector<8x128xf32>
    %cst_82 = arith.constant dense<0.000000e+00> : vector<8xf32>
    %247 = vector.multi_reduction <add>, %246, %cst_82 [1] : vector<8x128xf32> to vector<8xf32>
    %248 = vector.shape_cast %247 : vector<8xf32> to vector<8x1xf32>
    %cst_83 = arith.constant 1.280000e+02 : f32
    %249 = vector.broadcast %cst_83 : f32 to vector<8x1xf32>
    %250 = arith.divf %248, %249 : vector<8x1xf32>
    %cst_84 = arith.constant 9.99999974E-6 : f32
    %251 = vector.broadcast %cst_84 : f32 to vector<8x1xf32>
    %252 = arith.addf %250, %251 : vector<8x1xf32>
    %253 = math.rsqrt %252 : vector<8x1xf32>
    %254 = vector.broadcast %253 : vector<8x1xf32> to vector<8x128xf32>
    %255 = arith.mulf %245, %254 : vector<8x128xf32>
    %256 = math.tanh %255 : vector<8x128xf32>
    %257 = vector.extract_strided_slice %154 {offsets = [40, 0], sizes = [8, 128], strides = [1, 1]} : vector<56x128xf32> to vector<8x128xf32>
    %cst_85 = arith.constant dense<0.000000e+00> : vector<8xf32>
    %258 = vector.multi_reduction <add>, %257, %cst_85 [1] : vector<8x128xf32> to vector<8xf32>
    %259 = vector.shape_cast %258 : vector<8xf32> to vector<8x1xf32>
    %cst_86 = arith.constant 1.280000e+02 : f32
    %260 = vector.broadcast %cst_86 : f32 to vector<8x1xf32>
    %261 = arith.divf %259, %260 : vector<8x1xf32>
    %262 = vector.broadcast %261 : vector<8x1xf32> to vector<8x128xf32>
    %263 = arith.subf %257, %262 : vector<8x128xf32>
    %264 = arith.mulf %263, %263 : vector<8x128xf32>
    %cst_87 = arith.constant dense<0.000000e+00> : vector<8xf32>
    %265 = vector.multi_reduction <add>, %264, %cst_87 [1] : vector<8x128xf32> to vector<8xf32>
    %266 = vector.shape_cast %265 : vector<8xf32> to vector<8x1xf32>
    %cst_88 = arith.constant 1.280000e+02 : f32
    %267 = vector.broadcast %cst_88 : f32 to vector<8x1xf32>
    %268 = arith.divf %266, %267 : vector<8x1xf32>
    %cst_89 = arith.constant 9.99999974E-6 : f32
    %269 = vector.broadcast %cst_89 : f32 to vector<8x1xf32>
    %270 = arith.addf %268, %269 : vector<8x1xf32>
    %271 = math.rsqrt %270 : vector<8x1xf32>
    %272 = vector.broadcast %271 : vector<8x1xf32> to vector<8x128xf32>
    %273 = arith.mulf %263, %272 : vector<8x128xf32>
    %274 = arith.negf %273 : vector<8x128xf32>
    %275 = math.exp %274 : vector<8x128xf32>
    %cst_90 = arith.constant 1.000000e+00 : f32
    %276 = vector.broadcast %cst_90 : f32 to vector<8x128xf32>
    %277 = arith.addf %276, %275 : vector<8x128xf32>
    %278 = arith.divf %276, %277 : vector<8x128xf32>
    %279 = vector.extract_strided_slice %154 {offsets = [48, 0], sizes = [8, 128], strides = [1, 1]} : vector<56x128xf32> to vector<8x128xf32>
    %c0_91 = arith.constant 0 : index
    %c1_92 = arith.constant 1 : index
    %c0_93 = arith.constant 0 : index
    %c0_94 = arith.constant 0 : index
    %280 = vector.load %arg3[%c0_91, %c1_92, %c0_93, %c0_94] : memref<2x2x8x128xf32, #tpu.memory_space<vmem>>, vector<1x1x8x128xf32>
    %281 = vector.shape_cast %280 : vector<1x1x8x128xf32> to vector<8x128xf32>
    %282 = arith.mulf %176, %281 : vector<8x128xf32>
    %cst_95 = arith.constant dense<0.000000e+00> : vector<8xf32>
    %283 = vector.multi_reduction <add>, %282, %cst_95 [1] : vector<8x128xf32> to vector<8xf32>
    %284 = vector.shape_cast %283 : vector<8xf32> to vector<8x1xf32>
    %cst_96 = arith.constant dense<0.000000e+00> : vector<1xf32>
    %285 = vector.multi_reduction <add>, %284, %cst_96 [0] : vector<8x1xf32> to vector<1xf32>
    %286 = vector.shape_cast %285 : vector<1xf32> to vector<1x1xf32>
    %cst_97 = arith.constant 0.0220970865 : f32
    %287 = vector.broadcast %cst_97 : f32 to vector<1x1xf32>
    %288 = arith.mulf %286, %287 : vector<1x1xf32>
    %c1_98 = arith.constant 1 : index
    %c1_99 = arith.constant 1 : index
    %c0_100 = arith.constant 0 : index
    %c0_101 = arith.constant 0 : index
    %289 = vector.load %arg3[%c1_98, %c1_99, %c0_100, %c0_101] : memref<2x2x8x128xf32, #tpu.memory_space<vmem>>, vector<1x1x8x128xf32>
    %290 = vector.shape_cast %289 : vector<1x1x8x128xf32> to vector<8x128xf32>
    %291 = arith.mulf %176, %290 : vector<8x128xf32>
    %cst_102 = arith.constant dense<0.000000e+00> : vector<8xf32>
    %292 = vector.multi_reduction <add>, %291, %cst_102 [1] : vector<8x128xf32> to vector<8xf32>
    %293 = vector.shape_cast %292 : vector<8xf32> to vector<8x1xf32>
    %cst_103 = arith.constant dense<0.000000e+00> : vector<1xf32>
    %294 = vector.multi_reduction <add>, %293, %cst_103 [0] : vector<8x1xf32> to vector<1xf32>
    %295 = vector.shape_cast %294 : vector<1xf32> to vector<1x1xf32>
    %cst_104 = arith.constant 0.0220970865 : f32
    %296 = vector.broadcast %cst_104 : f32 to vector<1x1xf32>
    %297 = arith.mulf %295, %296 : vector<1x1xf32>
    %298 = arith.maximumf %140, %288 : vector<1x1xf32>
    %299 = arith.subf %140, %298 : vector<1x1xf32>
    %300 = math.exp %299 : vector<1x1xf32>
    %301 = arith.subf %288, %298 : vector<1x1xf32>
    %302 = math.exp %301 : vector<1x1xf32>
    %303 = arith.addf %300, %302 : vector<1x1xf32>
    %304 = arith.divf %300, %303 : vector<1x1xf32>
    %305 = arith.divf %302, %303 : vector<1x1xf32>
    %306 = arith.maximumf %149, %297 : vector<1x1xf32>
    %307 = arith.subf %149, %306 : vector<1x1xf32>
    %308 = math.exp %307 : vector<1x1xf32>
    %309 = arith.subf %297, %306 : vector<1x1xf32>
    %310 = math.exp %309 : vector<1x1xf32>
    %311 = arith.addf %308, %310 : vector<1x1xf32>
    %312 = arith.divf %308, %311 : vector<1x1xf32>
    %313 = arith.divf %310, %311 : vector<1x1xf32>
    %c0_105 = arith.constant 0 : index
    %c0_106 = arith.constant 0 : index
    %c0_107 = arith.constant 0 : index
    %c0_108 = arith.constant 0 : index
    %314 = vector.load %arg3[%c0_105, %c0_106, %c0_107, %c0_108] : memref<2x2x8x128xf32, #tpu.memory_space<vmem>>, vector<1x1x8x128xf32>
    %315 = vector.shape_cast %314 : vector<1x1x8x128xf32> to vector<8x128xf32>
    %316 = vector.broadcast %304 : vector<1x1xf32> to vector<8x128xf32>
    %317 = arith.mulf %316, %315 : vector<8x128xf32>
    %c1_109 = arith.constant 1 : index
    %c0_110 = arith.constant 0 : index
    %c0_111 = arith.constant 0 : index
    %c0_112 = arith.constant 0 : index
    %318 = vector.load %arg3[%c1_109, %c0_110, %c0_111, %c0_112] : memref<2x2x8x128xf32, #tpu.memory_space<vmem>>, vector<1x1x8x128xf32>
    %319 = vector.shape_cast %318 : vector<1x1x8x128xf32> to vector<8x128xf32>
    %320 = vector.broadcast %312 : vector<1x1xf32> to vector<8x128xf32>
    %321 = arith.mulf %320, %319 : vector<8x128xf32>
    %322 = arith.addf %317, %321 : vector<8x128xf32>
    %c1_113 = arith.constant 1 : index
    %c0_114 = arith.constant 0 : index
    %c0_115 = arith.constant 0 : index
    %c0_116 = arith.constant 0 : index
    %323 = vector.load %arg3[%c1_113, %c0_114, %c0_115, %c0_116] : memref<2x2x8x128xf32, #tpu.memory_space<vmem>>, vector<1x1x8x128xf32>
    %324 = vector.shape_cast %323 : vector<1x1x8x128xf32> to vector<8x128xf32>
    %325 = arith.addf %324, %322 : vector<8x128xf32>
    %cst_117 = arith.constant dense<0.000000e+00> : vector<8xf32>
    %326 = vector.multi_reduction <add>, %325, %cst_117 [1] : vector<8x128xf32> to vector<8xf32>
    %327 = vector.shape_cast %326 : vector<8xf32> to vector<8x1xf32>
    %cst_118 = arith.constant dense<0.000000e+00> : vector<1xf32>
    %328 = vector.multi_reduction <add>, %327, %cst_118 [0] : vector<8x1xf32> to vector<1xf32>
    %329 = vector.shape_cast %328 : vector<1xf32> to vector<1x1xf32>
    %cst_119 = arith.constant 9.765625E-4 : f32
    %330 = vector.broadcast %cst_119 : f32 to vector<1x1xf32>
    %331 = arith.mulf %329, %330 : vector<1x1xf32>
    %332 = vector.broadcast %331 : vector<1x1xf32> to vector<8x128xf32>
    %333 = arith.subf %325, %332 : vector<8x128xf32>
    %334 = arith.mulf %333, %333 : vector<8x128xf32>
    %cst_120 = arith.constant dense<0.000000e+00> : vector<8xf32>
    %335 = vector.multi_reduction <add>, %334, %cst_120 [1] : vector<8x128xf32> to vector<8xf32>
    %336 = vector.shape_cast %335 : vector<8xf32> to vector<8x1xf32>
    %cst_121 = arith.constant dense<0.000000e+00> : vector<1xf32>
    %337 = vector.multi_reduction <add>, %336, %cst_121 [0] : vector<8x1xf32> to vector<1xf32>
    %338 = vector.shape_cast %337 : vector<1xf32> to vector<1x1xf32>
    %cst_122 = arith.constant 9.765625E-4 : f32
    %339 = vector.broadcast %cst_122 : f32 to vector<1x1xf32>
    %340 = arith.mulf %338, %339 : vector<1x1xf32>
    %cst_123 = arith.constant 9.99999974E-6 : f32
    %341 = vector.broadcast %cst_123 : f32 to vector<1x1xf32>
    %342 = arith.addf %340, %341 : vector<1x1xf32>
    %343 = math.rsqrt %342 : vector<1x1xf32>
    %344 = vector.broadcast %343 : vector<1x1xf32> to vector<8x128xf32>
    %345 = arith.mulf %333, %344 : vector<8x128xf32>
    %346 = arith.mulf %50, %68 : vector<8x128xf32>
    %347 = arith.addf %346, %345 : vector<8x128xf32>
    %348 = arith.mulf %90, %108 : vector<8x128xf32>
    %c0_124 = arith.constant 0 : index
    %c0_125 = arith.constant 0 : index
    %c0_126 = arith.constant 0 : index
    %349 = vector.load %arg4[%c0_124, %c0_125, %c0_126] : memref<2x8x128xf32, #tpu.memory_space<vmem>>, vector<1x8x128xf32>
    %350 = vector.shape_cast %349 : vector<1x8x128xf32> to vector<8x128xf32>
    %351 = arith.mulf %130, %350 : vector<8x128xf32>
    %352 = arith.addf %348, %351 : vector<8x128xf32>
    %c0_127 = arith.constant 0 : index
    %c0_128 = arith.constant 0 : index
    %c0_129 = arith.constant 0 : index
    %353 = vector.load %arg5[%c0_127, %c0_128, %c0_129] : memref<2x8x128xf32, #tpu.memory_space<vmem>>, vector<1x8x128xf32>
    %354 = vector.shape_cast %353 : vector<1x8x128xf32> to vector<8x128xf32>
    %355 = vector.shape_cast %347 : vector<8x128xf32> to vector<1x8x128xf32>
    tpu.vector_store %arg5[%c0_127, %c0_128, %c0_129], %355 {strides = array<i32>} : memref<2x8x128xf32, #tpu.memory_space<vmem>>, vector<1x8x128xf32>,
    %c0_130 = arith.constant 0 : index
    %c0_131 = arith.constant 0 : index
    %c0_132 = arith.constant 0 : index
    %356 = vector.load %arg6[%c0_130, %c0_131, %c0_132] : memref<2x8x128xf32, #tpu.memory_space<vmem>>, vector<1x8x128xf32>
    %357 = vector.shape_cast %356 : vector<1x8x128xf32> to vector<8x128xf32>
    %358 = vector.shape_cast %352 : vector<8x128xf32> to vector<1x8x128xf32>
    tpu.vector_store %arg6[%c0_130, %c0_131, %c0_132], %358 {strides = array<i32>} : memref<2x8x128xf32, #tpu.memory_space<vmem>>, vector<1x8x128xf32>,
    %c0_133 = arith.constant 0 : index
    %c0_134 = arith.constant 0 : index
    %c0_135 = arith.constant 0 : index
    %359 = vector.load %arg7[%c0_133, %c0_134, %c0_135] : memref<2x8x128xf32, #tpu.memory_space<vmem>>, vector<1x8x128xf32>
    %360 = vector.shape_cast %359 : vector<1x8x128xf32> to vector<8x128xf32>
    %361 = vector.shape_cast %131 : vector<8x128xf32> to vector<1x8x128xf32>
    tpu.vector_store %arg7[%c0_133, %c0_134, %c0_135], %361 {strides = array<i32>} : memref<2x8x128xf32, #tpu.memory_space<vmem>>, vector<1x8x128xf32>,
    %c0_136 = arith.constant 0 : index
    %c1_137 = arith.constant 1 : index
    %c0_138 = arith.constant 0 : index
    %c0_139 = arith.constant 0 : index
    %362 = vector.load %arg3[%c0_136, %c1_137, %c0_138, %c0_139] : memref<2x2x8x128xf32, #tpu.memory_space<vmem>>, vector<1x1x8x128xf32>
    %363 = vector.shape_cast %362 : vector<1x1x8x128xf32> to vector<8x128xf32>
    %364 = vector.broadcast %305 : vector<1x1xf32> to vector<8x128xf32>
    %365 = arith.mulf %364, %363 : vector<8x128xf32>
    %c1_140 = arith.constant 1 : index
    %c1_141 = arith.constant 1 : index
    %c0_142 = arith.constant 0 : index
    %c0_143 = arith.constant 0 : index
    %366 = vector.load %arg3[%c1_140, %c1_141, %c0_142, %c0_143] : memref<2x2x8x128xf32, #tpu.memory_space<vmem>>, vector<1x1x8x128xf32>
    %367 = vector.shape_cast %366 : vector<1x1x8x128xf32> to vector<8x128xf32>
    %368 = vector.broadcast %313 : vector<1x1xf32> to vector<8x128xf32>
    %369 = arith.mulf %368, %367 : vector<8x128xf32>
    %370 = arith.addf %365, %369 : vector<8x128xf32>
    %c1_144 = arith.constant 1 : index
    %c1_145 = arith.constant 1 : index
    %c0_146 = arith.constant 0 : index
    %c0_147 = arith.constant 0 : index
    %371 = vector.load %arg3[%c1_144, %c1_145, %c0_146, %c0_147] : memref<2x2x8x128xf32, #tpu.memory_space<vmem>>, vector<1x1x8x128xf32>
    %372 = vector.shape_cast %371 : vector<1x1x8x128xf32> to vector<8x128xf32>
    %373 = arith.addf %372, %370 : vector<8x128xf32>
    %cst_148 = arith.constant dense<0.000000e+00> : vector<8xf32>
    %374 = vector.multi_reduction <add>, %373, %cst_148 [1] : vector<8x128xf32> to vector<8xf32>
    %375 = vector.shape_cast %374 : vector<8xf32> to vector<8x1xf32>
    %cst_149 = arith.constant dense<0.000000e+00> : vector<1xf32>
    %376 = vector.multi_reduction <add>, %375, %cst_149 [0] : vector<8x1xf32> to vector<1xf32>
    %377 = vector.shape_cast %376 : vector<1xf32> to vector<1x1xf32>
    %cst_150 = arith.constant 9.765625E-4 : f32
    %378 = vector.broadcast %cst_150 : f32 to vector<1x1xf32>
    %379 = arith.mulf %377, %378 : vector<1x1xf32>
    %380 = vector.broadcast %379 : vector<1x1xf32> to vector<8x128xf32>
    %381 = arith.subf %373, %380 : vector<8x128xf32>
    %382 = arith.mulf %381, %381 : vector<8x128xf32>
    %cst_151 = arith.constant dense<0.000000e+00> : vector<8xf32>
    %383 = vector.multi_reduction <add>, %382, %cst_151 [1] : vector<8x128xf32> to vector<8xf32>
    %384 = vector.shape_cast %383 : vector<8xf32> to vector<8x1xf32>
    %cst_152 = arith.constant dense<0.000000e+00> : vector<1xf32>
    %385 = vector.multi_reduction <add>, %384, %cst_152 [0] : vector<8x1xf32> to vector<1xf32>
    %386 = vector.shape_cast %385 : vector<1xf32> to vector<1x1xf32>
    %cst_153 = arith.constant 9.765625E-4 : f32
    %387 = vector.broadcast %cst_153 : f32 to vector<1x1xf32>
    %388 = arith.mulf %386, %387 : vector<1x1xf32>
    %cst_154 = arith.constant 9.99999974E-6 : f32
    %389 = vector.broadcast %cst_154 : f32 to vector<1x1xf32>
    %390 = arith.addf %388, %389 : vector<1x1xf32>
    %391 = math.rsqrt %390 : vector<1x1xf32>
    %392 = vector.broadcast %391 : vector<1x1xf32> to vector<8x128xf32>
    %393 = arith.mulf %381, %392 : vector<8x128xf32>
    %394 = arith.mulf %198, %216 : vector<8x128xf32>
    %395 = arith.addf %394, %393 : vector<8x128xf32>
    %396 = arith.mulf %238, %256 : vector<8x128xf32>
    %c1_155 = arith.constant 1 : index
    %c0_156 = arith.constant 0 : index
    %c0_157 = arith.constant 0 : index
    %397 = vector.load %arg4[%c1_155, %c0_156, %c0_157] : memref<2x8x128xf32, #tpu.memory_space<vmem>>, vector<1x8x128xf32>
    %398 = vector.shape_cast %397 : vector<1x8x128xf32> to vector<8x128xf32>
    %399 = arith.mulf %278, %398 : vector<8x128xf32>
    %400 = arith.addf %396, %399 : vector<8x128xf32>
    %c1_158 = arith.constant 1 : index
    %c0_159 = arith.constant 0 : index
    %c0_160 = arith.constant 0 : index
    %401 = vector.load %arg5[%c1_158, %c0_159, %c0_160] : memref<2x8x128xf32, #tpu.memory_space<vmem>>, vector<1x8x128xf32>
    %402 = vector.shape_cast %401 : vector<1x8x128xf32> to vector<8x128xf32>
    %403 = vector.shape_cast %395 : vector<8x128xf32> to vector<1x8x128xf32>
    tpu.vector_store %arg5[%c1_158, %c0_159, %c0_160], %403 {strides = array<i32>} : memref<2x8x128xf32, #tpu.memory_space<vmem>>, vector<1x8x128xf32>,
    %c1_161 = arith.constant 1 : index
    %c0_162 = arith.constant 0 : index
    %c0_163 = arith.constant 0 : index
    %404 = vector.load %arg6[%c1_161, %c0_162, %c0_163] : memref<2x8x128xf32, #tpu.memory_space<vmem>>, vector<1x8x128xf32>
    %405 = vector.shape_cast %404 : vector<1x8x128xf32> to vector<8x128xf32>
    %406 = vector.shape_cast %400 : vector<8x128xf32> to vector<1x8x128xf32>
    tpu.vector_store %arg6[%c1_161, %c0_162, %c0_163], %406 {strides = array<i32>} : memref<2x8x128xf32, #tpu.memory_space<vmem>>, vector<1x8x128xf32>,
    %c1_164 = arith.constant 1 : index
    %c0_165 = arith.constant 0 : index
    %c0_166 = arith.constant 0 : index
    %407 = vector.load %arg7[%c1_164, %c0_165, %c0_166] : memref<2x8x128xf32, #tpu.memory_space<vmem>>, vector<1x8x128xf32>
    %408 = vector.shape_cast %407 : vector<1x8x128xf32> to vector<8x128xf32>
    %409 = vector.shape_cast %279 : vector<8x128xf32> to vector<1x8x128xf32>
    tpu.vector_store %arg7[%c1_164, %c0_165, %c0_166], %409 {strides = array<i32>} : memref<2x8x128xf32, #tpu.memory_space<vmem>>, vector<1x8x128xf32>,
    return
  }
}

</mosaic_0001>

<bundles_post_ra>
// kernel: e3d_lstm_forward.12
= control target key start
LH: loop header
LB: loop body
LE: loop exit
PB: predicated region body
PF: predicated region fallthrough
CT: control target
= control target key end

     0   :  { %vm328_vm0 = vcmask 1043456   ;;  %v1727_v14 = vmov 0   ;;  %vm315_vm1 = vcmask 850944   ;;  %s2528_s0 = inlined_call_operand.vmem [shape: bf16[2,360,128], index: 0, kind: input, shape index: {}]   ;;  %s2529_s2 = inlined_call_operand.vmem [shape: f32[56,1], index: 2, kind: input, shape index: {}]   ;;  %s2530_s1 = inlined_call_operand.vmem [shape: bf16[56,360], index: 1, kind: input, shape index: {}]   ;;  %s2531_s3 = inlined_call_operand.vmem [shape: f32[2,2,8,128], index: 3, kind: input, shape index: {}]   ;;  %s2532_s4 = inlined_call_operand.vmem [shape: f32[2,8,128], index: 4, kind: input, shape index: {}]   ;;  %s2533_s6 = inlined_call_operand.vmem [shape: f32[2,8,128], index: 6, kind: output, shape index: {1}]   ;;  %s2534_s7 = inlined_call_operand.vmem [shape: f32[2,8,128], index: 7, kind: output, shape index: {2}]   ;;  %s2535_s5 = inlined_call_operand.vmem [shape: f32[2,8,128], index: 5, kind: output, shape index: {0}]  }
   0x1   :  { %v1588_v0 = vld [vmem:[%s2528_s0 + $0x38] sm:$0xff]  ;;  %v89_v1 = vld [vmem:[%s2528_s0 + $0xb0] sm:$0xf]  ;;  %v1602_v6 = vld [vmem:[%s2528_s0 + $0xa8] sm:$0xff]  ;;  %1642 = vset.pattern.permute.xlu0 %v1727_v14  ;;  %1644 = vset.pattern.permute.xlu1 %v1727_v14 }
   0x2   :  { %v269_v2 = vunpack.c.l.b16 %v89_v1  ;;  %1625 = vmatpush.bf16.msra.mxu1 %v1588_v0  ;;  %332 = vmatpush.bf16.msra.mxu0 %v1588_v0  ;;  %v1587_v4 = vld [vmem:[%s2528_s0 + $0x30] sm:$0xff]  ;;  %v1586_v7 = vld [vmem:[%s2528_s0 + $0x28] sm:$0xff]  ;;  %v1601_v8 = vld [vmem:[%s2528_s0 + $0xa0] sm:$0xff] }
   0x3   :  { %v1585_v9 = vld [vmem:[%s2528_s0 + $0x20] sm:$0xff]  ;;  %v1600_v10 = vld [vmem:[%s2528_s0 + $0x98] sm:$0xff]  ;;  %v1599_v12 = vld [vmem:[%s2528_s0 + $0x90] sm:$0xff]  ;;  %1643 = vset.pattern.permute.xlu2 %v1727_v14 }
   0x4   :  { %v292_v3 = vpack.c.b16 %v269_v2, %v269_v2  ;;  %v1584_v11 = vld [vmem:[%s2528_s0 + $0x18] sm:$0xff]  ;;  %v1583_v13 = vld [vmem:[%s2528_s0 + $0x10] sm:$0xff]  ;;  %v1598_v15 = vld [vmem:[%s2528_s0 + $0x88] sm:$0xff] }
   0x5   :  { %v38_v16 = vld [vmem:[%s2529_s2] sm:$0xff]  ;;  %v1582_v17 = vld [vmem:[%s2528_s0 + $0x8] sm:$0xff]  ;;  %v1574_v22 = vld [vmem:[%s2530_s1 + $0x10] sm:$0xf0] }
   0x6   :  { %v330_v5 = vsel %vm328_vm0, %v292_v3, 0  ;;  %1626 = vmatpush.bf16.msra.mxu1 %v1587_v4  ;;  %333 = vmatpush.bf16.msra.mxu0 %v1587_v4  ;;  %v1467_v18 = vld [vmem:[%s2528_s0 + $0x164] sm:$0xf]  ;;  %v1300_v21 = vld [vmem:[%s2530_s1 + $0x8] sm:$0xf]  ;;  %v1596_v28 = vld [vmem:[%s2528_s0 + $0x78] sm:$0xff] }
   0x7   :  { %389 = vmatpush.bf16.msra.mxu2 %v330_v5  ;;  %1633 = vmatpush.bf16.msra.mxu3 %v330_v5  ;;  %v1597_v19 = vld [vmem:[%s2528_s0 + $0x80] sm:$0xff]  ;;  %v1324_v23 = vld [vmem:[%s2530_s1 + $0x38] sm:$0xf]  ;;  %v779_v25 = vunpack.c.l.b16 %v1467_v18  ;;  %v1316_v26 = vld [vmem:[%s2530_s1 + $0x30] sm:$0xf]  ;;  %v1851_v32 = vor.u32 %v1574_v22, %v1300_v21 }
   0x8   :  { %92 = vperm.xlu0 %1642, %v38_v16   ;;  %v1581_v20 = vld [vmem:[%s2528_s0] sm:$0xff]  ;;  %v1579_v27 = vld [vmem:[%s2530_s1 + $0x38] sm:$0xf0]  ;;  %v1610_v29 = vld [vmem:[%s2528_s0 + $0xec] sm:$0xff] }
   0x9   :  { %v1580_v24 = vld [vmem:[%s2530_s1 + $0x40] sm:$0xf0]  ;;  %v1292_v30 = vld [vmem:[%s2530_s1] sm:$0xf]  ;;  %v1573_v31 = vld [vmem:[%s2530_s1 + $0x8] sm:$0xf0]  ;;  %v1855_v34 = vor.u32 %v1579_v27, %v1316_v26  ;;  %v802_v36 = vpack.c.b16 %v779_v25, %v779_v25 }
   0xa   :  { %1627 = vmatpush.bf16.msra.mxu1 %v1586_v7  ;;  %334 = vmatpush.bf16.msra.mxu0 %v1586_v7  ;;  %v1853_v33 = vor.u32 %v1580_v24, %v1324_v23  ;;  %v1618_v35 = vld [vmem:[%s2528_s0 + $0x12c] sm:$0xff]  ;;  %v1860_v37 = vor.u32 %v1573_v31, %v1292_v30  ;;  %v1609_v39 = vld [vmem:[%s2528_s0 + $0xe4] sm:$0xff]  ;;  %v1608_v43 = vld [vmem:[%s2528_s0 + $0xdc] sm:$0xff] }
   0xb   :  { %390 = vmatpush.bf16.msra.mxu2 %v1602_v6  ;;  %1634 = vmatpush.bf16.msra.mxu3 %v1602_v6  ;;  %v1595_v38 = vld [vmem:[%s2528_s0 + $0x70] sm:$0xff]  ;;  %v1617_v40 = vld [vmem:[%s2528_s0 + $0x124] sm:$0xff]  ;;  %v826_v41 = vsel %vm328_vm0, %v802_v36, 0  ;;  %v1624_v44 = vld [vmem:[%s2528_s0 + $0x15c] sm:$0xff] }
   0xc   :  { %v1594_v42 = vld [vmem:[%s2528_s0 + $0x68] sm:$0xff]  ;;  %v1616_v45 = vld [vmem:[%s2528_s0 + $0x11c] sm:$0xff]  ;;  %v37_v46 = vld [vmem:[%s2530_s1 + $0x50] sm:$0xf] }
   0xd   :  { %v1896_v47 = vld [vmem:[%s2530_s1 + $0x48] sm:$0xff]  ;;  %v1593_v48 = vld [vmem:[%s2528_s0 + $0x60] sm:$0xff]  ;;  %v1607_v49 = vld [vmem:[%s2528_s0 + $0xd4] sm:$0xff]  ;;  %v159_v50 = vunpack.c.l.b16 %v37_v46 }
   0xe   :  { %1628 = vmatpush.bf16.msra.mxu1 %v1585_v9  ;;  %335 = vmatpush.bf16.msra.mxu0 %v1585_v9  ;;  %v1623_v51 = vld [vmem:[%s2528_s0 + $0x154] sm:$0xff]  ;;  %v1312_v53 = vld [vmem:[%s2530_s1 + $0x20] sm:$0xf]  ;;  %v1577_v54 = vld [vmem:[%s2530_s1 + $0x28] sm:$0xf0]  ;;  %v157_v55 = vunpack.c.l.b16 %v1896_v47 }
   0xf   :  { %391 = vmatpush.bf16.msra.mxu2 %v1601_v8  ;;  %1635 = vmatpush.bf16.msra.mxu3 %v1601_v8  ;;  %v1615_v52 = vld [vmem:[%s2528_s0 + $0x114] sm:$0xff]  ;;  %v1606_v57 = vld [vmem:[%s2528_s0 + $0xcc] sm:$0xff]  ;;  %v1576_v59 = vld [vmem:[%s2530_s1 + $0x20] sm:$0xf0]  ;;  %v1313_v60 = vor.u32 %v1577_v54, %v1312_v53  ;;  %v171_v61 = vpack.c.b16 %v159_v50, %v159_v50 }
  0x10   :  { %v1592_v56 = vld [vmem:[%s2528_s0 + $0x58] sm:$0xff]  ;;  %v169_v62 = vpack.c.b16 %v157_v55, %v157_v55  ;;  %v1614_v63 = vld [vmem:[%s2528_s0 + $0x10c] sm:$0xff]  ;;  %v1605_v3 = vld [vmem:[%s2528_s0 + $0xc4] sm:$0xff] }
  0x11   :  { %v1304_v58 = vld [vmem:[%s2530_s1 + $0x18] sm:$0xf]  ;;  %v1622_v1 = vld [vmem:[%s2528_s0 + $0x14c] sm:$0xff]  ;;  %v1613_v4 = vld [vmem:[%s2528_s0 + $0x104] sm:$0xff] }
  0x12   :  { %1629 = vmatpush.bf16.msra.mxu1 %v1584_v11  ;;  %336 = vmatpush.bf16.msra.mxu0 %v1584_v11  ;;  %v1305_v0 = vor.u32 %v1576_v59, %v1304_v58  ;;  %v1591_v2 = vld [vmem:[%s2528_s0 + $0x50] sm:$0xff]  ;;  %v1621_v5 = vld [vmem:[%s2528_s0 + $0x144] sm:$0xff]  ;;  %v1604_v7 = vld [vmem:[%s2528_s0 + $0xbc] sm:$0xff] }
  0x13   :  { %392 = vmatpush.bf16.msra.mxu2 %v1600_v10  ;;  %1636 = vmatpush.bf16.msra.mxu3 %v1600_v10  ;;  %v1590_v6 = vld [vmem:[%s2528_s0 + $0x48] sm:$0xff]  ;;  %v1612_v8 = vld [vmem:[%s2528_s0 + $0xfc] sm:$0xff]  ;;  %v1603_v11 = vld [vmem:[%s2528_s0 + $0xb4] sm:$0xff] }
  0x14   :  { %v1620_v9 = vld [vmem:[%s2528_s0 + $0x13c] sm:$0xff]  ;;  %v1294_v14 = vld [vmem:[%s2530_s1 + $0xc] sm:$0xf0]  ;;  %v1306_v22 = vld [vmem:[%s2530_s1 + $0x24] sm:$0xf0] }
  0x15   :  { %v1589_v10 = vld [vmem:[%s2528_s0 + $0x40] sm:$0xff]  ;;  %v1575_v21 = vld [vmem:[%s2530_s1 + $0x1c] sm:$0xf] }
  0x16   :  { %1630 = vmatpush.bf16.msra.mxu1 %v1583_v13  ;;  %337 = vmatpush.bf16.msra.mxu0 %v1583_v13  ;;  %v1572_v13 = vld [vmem:[%s2530_s1 + $0x4] sm:$0xf]  ;;  %v1309_v24 = vor.u32 %v1575_v21, %v1306_v22  ;;  %v1318_v21 = vld [vmem:[%s2530_s1 + $0x3c] sm:$0xf0] }
  0x17   :  { %393 = vmatpush.bf16.msra.mxu2 %v1599_v12  ;;  %1637 = vmatpush.bf16.msra.mxu3 %v1599_v12  ;;  %v1611_v12 = vld [vmem:[%s2528_s0 + $0xf4] sm:$0xff]  ;;  %v1297_v16 = vor.u32 %v1572_v13, %v1294_v14 }
  0x1a   :  { %1631 = vmatpush.bf16.msra.mxu1 %v1582_v17  ;;  %338 = vmatpush.bf16.msra.mxu0 %v1582_v17 }
  0x1b   :  { %394 = vmatpush.bf16.msra.mxu2 %v1598_v15  ;;  %1638 = vmatpush.bf16.msra.mxu3 %v1598_v15  ;;  %v1619_v15 = vld [vmem:[%s2528_s0 + $0x134] sm:$0xff] }
  0x1e   :  { %1632 = vmatpush.bf16.msra.mxu1 %v1581_v20  ;;  %339 = vmatpush.bf16.msra.mxu0 %v1581_v20 }
  0x1f   :  { %395 = vmatpush.bf16.msra.mxu2 %v1597_v19  ;;  %1639 = vmatpush.bf16.msra.mxu3 %v1597_v19 }
  0x21   :  { %350 = vmatmul.bf16.vlgmr.msra.gmra.mxu1 %v1855_v34  ;;  %340 = vmatmul.bf16.vlgmr.msra.gmra.mxu0 %v1860_v37 }
  0x22   :  { %360 = vmatpush.bf16.msrb.mxu1 %v1596_v28  ;;  %1414 = vmatmul.msk.bf16.vlgmr.msra.gmra.mxu2 %vm315_vm1, %v1851_v32 }
  0x23   :  { %828 = vmatpush.bf16.msrb.mxu3 %v1610_v29  ;;  %856 = vmatpush.bf16.msrb.mxu2 %v1618_v35 }
  0x24   :  { %1416 = vmatmul.msk.bf16.vlgmr.msra.gmra.mxu3 %vm315_vm1, %v1853_v33  ;;  %885 = vmatpush.bf16.msrb.mxu0 %v826_v41 }
  0x26   :  { %361 = vmatpush.bf16.msrb.mxu1 %v1595_v38 }
  0x27   :  { %829 = vmatpush.bf16.msrb.mxu3 %v1609_v39  ;;  %857 = vmatpush.bf16.msrb.mxu2 %v1617_v40 }
  0x28   :  { %886 = vmatpush.bf16.msrb.mxu0 %v1624_v44 }
  0x2a   :  { %362 = vmatpush.bf16.msrb.mxu1 %v1594_v42 }
  0x2b   :  { %830 = vmatpush.bf16.msrb.mxu3 %v1608_v43  ;;  %858 = vmatpush.bf16.msrb.mxu2 %v1616_v45 }
  0x2c   :  { %887 = vmatpush.bf16.msrb.mxu0 %v1623_v51 }
  0x2e   :  { %363 = vmatpush.bf16.msrb.mxu1 %v1593_v48  ;;  %v40_v48 = vld [vmem:[%s2529_s2 + $0x10] sm:$0xff] }
  0x2f   :  { %831 = vmatpush.bf16.msrb.mxu3 %v1607_v49  ;;  %859 = vmatpush.bf16.msrb.mxu2 %v1615_v52  ;;  %v1728_v49 = vmov 128.0  }
  0x30   :  { %888 = vmatpush.bf16.msrb.mxu0 %v1622_v1  ;;  %1645 = vrcp.f32 %v1728_v49 }
  0x31   :  { %355 = vmatmul.bf16.gmra.mxu1 %v169_v62  ;;  %345 = vmatmul.bf16.gmra.mxu0 %v1305_v0 }
  0x32   :  { %364 = vmatpush.bf16.msrb.mxu1 %v1592_v56  ;;  %1415 = vmatmul.msk.bf16.gmra.mxu2 %vm315_vm1, %v1313_v60 }
  0x33   :  { %832 = vmatpush.bf16.msrb.mxu3 %v1606_v57  ;;  %860 = vmatpush.bf16.msrb.mxu2 %v1614_v63 }
  0x34   :  { %1417 = vmatmul.msk.bf16.gmra.mxu3 %vm315_vm1, %v171_v61  ;;  %889 = vmatpush.bf16.msrb.mxu0 %v1621_v5 }
  0x36   :  { %365 = vmatpush.bf16.msrb.mxu1 %v1591_v2  ;;  %v1646_v50 = vpop.eup %1645 }
  0x37   :  { %833 = vmatpush.bf16.msrb.mxu3 %v1605_v3  ;;  %861 = vmatpush.bf16.msrb.mxu2 %v1613_v4  ;;  %v419_v51 = vmul.f32 128.0, %v1646_v50  ;;  %vm423_vm2 = vweird.f32 %v1646_v50 }
  0x38   :  { %890 = vmatpush.bf16.msrb.mxu0 %v1620_v9 }
  0x39   :  { %v420_v52 = vsub.f32 1.0, %v419_v51 }
  0x3a   :  { %366 = vmatpush.bf16.msrb.mxu1 %v1590_v6 }
  0x3b   :  { %834 = vmatpush.bf16.msrb.mxu3 %v1604_v7  ;;  %862 = vmatpush.bf16.msrb.mxu2 %v1612_v8  ;;  %v421_v53 = vmul.f32 %v1646_v50, %v420_v52 }
  0x3c   :  { %891 = vmatpush.bf16.msrb.mxu0 %v1619_v15 }
  0x3d   :  { %v422_v54 = vadd.f32 %v1646_v50, %v421_v53  ;;  %v2035_v53 = vld [vmem:[%s2531_s3 + $0x10] sm:$0xff] }
  0x3e   :  { %367 = vmatpush.bf16.msrb.mxu1 %v1589_v10 }
  0x3f   :  { %835 = vmatpush.bf16.msrb.mxu3 %v1603_v11  ;;  %863 = vmatpush.bf16.msrb.mxu2 %v1611_v12  ;;  %v2020_v55 = vsel %vm423_vm2, %v1646_v50, %v422_v54  ;;  %v2040_v54 = vld [vmem:[%s2531_s3] sm:$0xff] }
  0x41   :  { %368 = vmatmul.bf16.vlgmr.msrb.gmra.mxu1 %v1297_v16  ;;  %1556 = vmatmul.msk.bf16.vlgmr.msrb.gmra.mxu0 %vm315_vm1, %v1851_v32 }
  0x42   :  { %864 = vmatmul.bf16.vlgmr.msrb.gmra.mxu2 %v1297_v16 }
  0x44   :  { %836 = vmatmul.bf16.vlgmr.msrb.gmra.mxu3 %v1860_v37 }
  0x51   :  { %1557 = vmatmul.msk.bf16.gmra.mxu0 %vm315_vm1, %v1313_v60  ;;  %373 = vmatmul.bf16.gmra.mxu1 %v1309_v24 }
  0x52   :  { %869 = vmatmul.bf16.gmra.mxu2 %v1309_v24 }
  0x54   :  { %841 = vmatmul.bf16.gmra.mxu3 %v1305_v0 }
  0x61   :  { %1558 = vmatmul.msk.bf16.gmra.mxu0 %vm315_vm1, %v1853_v33 }
  0x64   :  { %846 = vmatmul.bf16.gmra.mxu3 %v1855_v34 }
  0x71   :  { %1559 = vmatmul.msk.bf16.gmra.mxu0 %vm315_vm1, %v171_v61 }
  0x74   :  { %851 = vmatmul.bf16.gmra.mxu3 %v169_v62 }
  0x7a   :  { %v93_v33 = vpop.permute.xlu0 %92 }
  0x9e   :  { %v1987_v17 = vpop.f32.mrf.mxu1  ;;  %v341_v18 = vpop.f32.mrf.mxu0 }
  0x9f   :  { %v342_v36 = vadd.f32 %v341_v18, %v93_v33 }
  0xa5   :  { %v397_v19 = vpop.f32.mrf.mxu2 }
  0xa6   :  { %v1997_v23 = vpop.f32.mrf.mxu1  ;;  %v1999_v25 = vpop.f32.mrf.mxu0 }
  0xa7   :  { %v1989_v20 = vpop.f32.mrf.mxu3 }
  0xad   :  { %v2001_v26 = vpop.f32.mrf.mxu2 }
  0xae   :  { %v2005_v28 = vpop.f32.mrf.mxu1  ;;  %v2007_v29 = vpop.f32.mrf.mxu0 }
  0xaf   :  { %v2003_v27 = vpop.f32.mrf.mxu3 }
  0xb5   :  { %v2009_v30 = vpop.f32.mrf.mxu2 }
  0xb6   :  { %v358_v32 = vpop.f32.mrf.mxu1  ;;  %v2015_v37 = vpop.f32.mrf.mxu0 }
  0xb7   :  { %v2011_v31 = vpop.f32.mrf.mxu3 }
  0xbd   :  { %v2013_v34 = vpop.f32.mrf.mxu2 }
  0xbe   :  { %v369_v38 = vpop.f32.mrf.mxu1  ;;  %v893_v45 = vpop.f32.mrf.mxu0 }
  0xbf   :  { %v414_v35 = vpop.f32.mrf.mxu3  ;;  %v370_v39 = vadd.f32 %v369_v38, %v342_v36 }
  0xc1   :  { %v398_v40 = vadd.f32 %v397_v19, %v370_v39  ;;  %v1578_v19 = vld [vmem:[%s2530_s1 + $0x34] sm:$0xf] }
  0xc2   :  { %v1321_v22 = vor.u32 %v1578_v19, %v1318_v21 }
  0xc3   :  { %416 = vadd.xlane.f32.xlu0 %v398_v40 }
  0xc4   :  { %378 = vmatmul.bf16.gmra.mxu1 %v1321_v22  ;;  %874 = vmatmul.bf16.gmra.mxu2 %v1321_v22 }
  0xc5   :  { %v865_v43 = vpop.f32.mrf.mxu2 }
  0xc7   :  { %v837_v41 = vpop.f32.mrf.mxu3 }
  0xc8   :  { %v838_v42 = vadd.f32 %v837_v41, %v93_v33 }
  0xca   :  { %v866_v44 = vadd.f32 %v865_v43, %v838_v42 }
  0xcc   :  { %v894_v46 = vadd.f32 %v893_v45, %v866_v44 }
  0xce   :  { %912 = vadd.xlane.f32.xlu1 %v894_v46 }
  0xd7   :  { %102 = vperm.xlu0 %1642, %v40_v48  }
 0x136   :  { %v417_v56 = vpop.xlane.xlu0 %416 }
 0x137   :  { %v425_v57 = vmul.f32 %v2020_v55, %v417_v56 }
 0x139   :  { %v426_v58 = vsub.f32 %v398_v40, %v425_v57 }
 0x13b   :  { %v427_v59 = vmul.f32 %v426_v58, %v426_v58 }
 0x13d   :  { %428 = vadd.xlane.f32.xlu1 %v427_v59 }
 0x141   :  { %v913_v60 = vpop.xlane.xlu1 %912 }
 0x142   :  { %v914_v61 = vmul.f32 %v913_v60, %v2020_v55 }
 0x144   :  { %v915_v62 = vsub.f32 %v894_v46, %v914_v61 }
 0x146   :  { %v916_v63 = vmul.f32 %v915_v62, %v915_v62 }
 0x148   :  { %917 = vadd.xlane.f32.xlu2 %v916_v63 }
 0x1b0   :  { %v429_v0 = vpop.xlane.xlu1 %428 }
 0x1b1   :  { %v430_v1 = vmul.f32 %v429_v0, %v2020_v55 }
 0x1b3   :  { %v431_v2 = vadd.f32 1e-05, %v430_v1 }
 0x1b5   :  { %1647 = vrsqrt.f32 %v431_v2  ;;  %vm438_vm4 = vweird.f32 %v431_v2 }
 0x1bb   :  { %v918_v3 = vpop.xlane.xlu2 %917  ;;  %v1648_v6 = vpop.eup %1647 }
 0x1bc   :  { %v919_v4 = vmul.f32 %v918_v3, %v2020_v55  ;;  %v433_v7 = vmul.f32 %v1648_v6, %v431_v2  ;;  %vm439_vm3 = vweird.f32 %v1648_v6  ;;  %v2047_v3 = vld [vmem:[%s2531_s3 + $0x18] sm:$0xff] }
 0x1bd   :  { %vm440_vm5 = vmor %vm438_vm4, %vm439_vm3 }
 0x1be   :  { %v920_v5 = vadd.f32 1e-05, %v919_v4  ;;  %v434_v8 = vmul.f32 %v1648_v6, %v433_v7  ;;  %v2052_v4 = vld [vmem:[%s2531_s3 + $0x8] sm:$0xff] }
 0x1c0   :  { %1649 = vrsqrt.f32 %v920_v5  ;;  %v435_v9 = vmul.f32 0.5, %v434_v8  ;;  %vm927_vm7 = vweird.f32 %v920_v5 }
 0x1c2   :  { %v436_v11 = vsub.f32 1.5, %v435_v9  ;;  %v39_v9 = vld [vmem:[%s2529_s2 + $0x8] sm:$0xff] }
 0x1c4   :  { %v437_v13 = vmul.f32 %v1648_v6, %v436_v11  ;;  %v43_v11 = vld [vmem:[%s2529_s2 + $0x28] sm:$0xff] }
 0x1c6   :  { %v1650_v10 = vpop.eup %1649  ;;  %v441_v15 = vsel %vm440_vm5, %v1648_v6, %v437_v13  ;;  %v839_v13 = vpop.f32.mrf.mxu3 }
 0x1c7   :  { %v922_v12 = vmul.f32 %v1650_v10, %v920_v5  ;;  %v442_v16 = vmul.f32 %v441_v15, %v426_v58  ;;  %vm928_vm6 = vweird.f32 %v1650_v10  ;;  %v867_v15 = vpop.f32.mrf.mxu2 }
 0x1c8   :  { %vm929_vm8 = vmor %vm927_vm7, %vm928_vm6 }
 0x1c9   :  { %v923_v14 = vmul.f32 %v1650_v10, %v922_v12  ;;  %v1418_v24 = vmul.f32 -1.442695, %v442_v16  ;;  %v42_v12 = vld [vmem:[%s2529_s2 + $0x20] sm:$0xff]  ;;  %v2068_v16 = vpop.f32.mrf.mxu0 }
 0x1cb   :  { %v924_v18 = vmul.f32 0.5, %v923_v14  ;;  %1651 = vpow2.f32 %v1418_v24  ;;  %v371_v14 = vpop.f32.mrf.mxu1 }
 0x1cd   :  { %v925_v32 = vsub.f32 1.5, %v924_v18 }
 0x1ce   :  { %v2070_v18 = vpop.f32.mrf.mxu3 }
 0x1cf   :  { %v926_v33 = vmul.f32 %v1650_v10, %v925_v32  ;;  %v2074_v21 = vpop.f32.mrf.mxu2 }
 0x1d1   :  { %v930_v35 = vsel %vm929_vm8, %v1650_v10, %v926_v33  ;;  %v1652_v39 = vpop.eup %1651  ;;  %v41_v10 = vld [vmem:[%s2529_s2 + $0x18] sm:$0xff] }
 0x1d2   :  { %v931_v36 = vmul.f32 %v930_v35, %v915_v62  ;;  %v446_v40 = vadd.f32 1.0, %v1652_v39 }
 0x1d3   :  { %v2072_v19 = vpop.f32.mrf.mxu1 }
 0x1d4   :  { %v1560_v38 = vmul.f32 -1.442695, %v931_v36  ;;  %v458_v46 = vand.u32 2147483648, %v446_v40  ;;  %v456_v49 = vand.u32 2147483647, %v446_v40  ;;  %vm452_vm10 = vweird.f32 %v446_v40 }
 0x1d6   :  { %1653 = vpow2.f32 %v1560_v38  ;;  %v459_v52 = vor.u32 1.1754944e-38, %v458_v46  ;;  %vm457_vm12 = vcmp.eq.f32.partialorder %v456_v49, 8.507059e+37  ;;  %v2076_v38 = vpop.f32.mrf.mxu0  ;;  %v2078_v39 = vpop.f32.mrf.mxu3 }
 0x1d7   :  { %1655 = vrcp.f32 %v446_v40 }
 0x1dc   :  { %v1654_v41 = vpop.eup %1653 }
 0x1dd   :  { %v935_v42 = vadd.f32 1.0, %v1654_v41  ;;  %v1656_v43 = vpop.eup %1655 }
 0x1de   :  { %v448_v44 = vmul.f32 %v1656_v43, %v446_v40  ;;  %vm453_vm9 = vweird.f32 %v1656_v43 }
 0x1df   :  { %1657 = vrcp.f32 %v935_v42  ;;  %vm454_vm11 = vmor %vm452_vm10, %vm453_vm9  ;;  %v947_v62 = vand.u32 2147483648, %v935_v42  ;;  %v945_v0 = vand.u32 2147483647, %v935_v42  ;;  %vm941_vm14 = vweird.f32 %v935_v42 }
 0x1e0   :  { %v449_v45 = vsub.f32 1.0, %v448_v44 }
 0x1e1   :  { %v948_v2 = vor.u32 1.1754944e-38, %v947_v62  ;;  %vm946_vm0 = vcmp.eq.f32.partialorder %v945_v0, 8.507059e+37 }
 0x1e2   :  { %v450_v48 = vmul.f32 %v1656_v43, %v449_v45 }
 0x1e4   :  { %v451_v51 = vadd.f32 %v1656_v43, %v450_v48 }
 0x1e5   :  { %v1658_v50 = vpop.eup %1657 }
 0x1e6   :  { %v937_v56 = vmul.f32 %v1658_v50, %v935_v42  ;;  %v455_v57 = vsel %vm454_vm11, %v1656_v43, %v451_v51  ;;  %vm942_vm13 = vweird.f32 %v1658_v50  ;;  %v2080_v42 = vpop.f32.mrf.mxu1  ;;  %v2082_v43 = vpop.f32.mrf.mxu2 }
 0x1e7   :  { %v460_v58 = vsel %vm457_vm12, %v459_v52, %v455_v57  ;;  %vm943_vm15 = vmor %vm941_vm14, %vm942_vm13  ;;  %v2084_v57 = vpop.f32.mrf.mxu0 }
 0x1e8   :  { %v938_v59 = vsub.f32 1.0, %v937_v56  ;;  %v634_v60 = vmul.f32 %v2035_v53, %v460_v58  ;;  %v622_v61 = vmul.f32 %v2040_v54, %v460_v58 }
 0x1ea   :  { %v939_v63 = vmul.f32 %v1658_v50, %v938_v59  ;;  %635 = vadd.xlane.f32.xlu1 %v634_v60  ;;  %623 = vadd.xlane.f32.xlu2 %v622_v61  ;;  %v2086_v61 = vpop.f32.mrf.mxu3 }
 0x1ec   :  { %v940_v1 = vadd.f32 %v1658_v50, %v939_v63 }
 0x1ee   :  { %v944_v5 = vsel %vm943_vm15, %v1658_v50, %v940_v1  ;;  %v2088_v0 = vpop.f32.mrf.mxu1 }
 0x1ef   :  { %v949_v6 = vsel %vm946_vm0, %v948_v2, %v944_v5 }
 0x1f0   :  { %v1124_v7 = vmul.f32 %v2047_v3, %v949_v6  ;;  %v1112_v8 = vmul.f32 %v2052_v4, %v949_v6 }
 0x1f2   :  { %1125 = vadd.xlane.f32.xlu1 %v1124_v7  ;;  %1113 = vadd.xlane.f32.xlu2 %v1112_v8 }
 0x20a   :  { %97 = vperm.xlu2 %1643, %v39_v9   ;;  %v2091_v9 = vpop.f32.mrf.mxu2 }
 0x20b   :  { %107 = vperm.xlu1 %1644, %v41_v10  }
 0x212   :  { %117 = vperm.xlu2 %1643, %v43_v11  }
 0x21a   :  { %112 = vperm.xlu2 %1643, %v42_v12  }
 0x25d   :  { %v636_v22 = vpop.xlane.xlu1 %635  ;;  %v624_v24 = vpop.xlane.xlu2 %623 }
 0x25e   :  { %v637_v32 = vrot.slane %v636_v22, 4  ;;  %v625_v33 = vrot.slane %v624_v24, 4 }
 0x260   :  { %v638_v35 = vadd.f32 %v637_v32, %v636_v22  ;;  %v626_v36 = vadd.f32 %v625_v33, %v624_v24 }
 0x262   :  { %v639_v40 = vrot.slane %v638_v35, 2  ;;  %v627_v41 = vrot.slane %v626_v36, 2 }
 0x264   :  { %v640_v44 = vadd.f32 %v639_v40, %v638_v35  ;;  %v628_v48 = vadd.f32 %v627_v41, %v626_v36  ;;  %v2096_v40 = vpop.f32.mrf.mxu0 }
 0x265   :  { %v1126_v45 = vpop.xlane.xlu1 %1125  ;;  %v1114_v46 = vpop.xlane.xlu2 %1113 }
 0x266   :  { %v1127_v49 = vrot.slane %v1126_v45, 4  ;;  %v1115_v50 = vrot.slane %v1114_v46, 4  ;;  %v641_v56 = vrot.slane %v640_v44, 1  ;;  %v629_v58 = vrot.slane %v628_v48, 1 }
 0x268   :  { %v1128_v51 = vadd.f32 %v1127_v49, %v1126_v45  ;;  %v1116_v52 = vadd.f32 %v1115_v50, %v1114_v46  ;;  %v642_v1 = vadd.f32 %v641_v56, %v640_v44  ;;  %v630_v5 = vadd.f32 %v629_v58, %v628_v48  ;;  %v849_v46 = vpop.f32.mrf.mxu3 }
 0x26a   :  { %v1129_v59 = vrot.slane %v1128_v51, 2  ;;  %v1117_v60 = vrot.slane %v1116_v52, 2  ;;  %v643_v22 = vmul.f32 0.022097087, %v642_v1  ;;  %v631_v32 = vmul.f32 0.022097087, %v630_v5 }
 0x26c   :  { %v1130_v62 = vadd.f32 %v1129_v59, %v1128_v51  ;;  %v1118_v63 = vadd.f32 %v1117_v60, %v1116_v52 }
 0x26d   :  { %v98_v2 = vpop.permute.xlu2 %97 }
 0x26e   :  { %v1131_v6 = vrot.slane %v1130_v62, 1  ;;  %v1119_v7 = vrot.slane %v1118_v63, 1  ;;  %v344_v8 = vadd.f32 %v1999_v25, %v98_v2  ;;  %v840_v24 = vadd.f32 %v839_v13, %v98_v2  ;;  %v381_v13 = vpop.f32.mrf.mxu1  ;;  %v905_v2 = vpop.f32.mrf.mxu0 }
 0x270   :  { %v1132_v10 = vadd.f32 %v1131_v6, %v1130_v62  ;;  %v1120_v11 = vadd.f32 %v1119_v7, %v1118_v63  ;;  %v372_v12 = vadd.f32 %v371_v14, %v344_v8  ;;  %v868_v45 = vadd.f32 %v867_v15, %v840_v24  ;;  %v877_v62 = vpop.f32.mrf.mxu2  ;;  %v2109_v6 = vpop.permute.xlu0 %102 }
 0x272   :  { %v1133_v33 = vmul.f32 0.022097087, %v1132_v10  ;;  %v1121_v35 = vmul.f32 0.022097087, %v1120_v11  ;;  %v2094_v36 = vadd.f32 %v2001_v26, %v372_v12  ;;  %v2101_v63 = vadd.f32 %v2068_v16, %v868_v45 }
 0x273   :  { %v347_v11 = vadd.f32 %v2007_v29, %v2109_v6 }
 0x274   :  { %v1158_v41 = vmax.f32 %v643_v22, %v1133_v33  ;;  %v1134_v44 = vmax.f32 %v631_v32, %v1121_v35  ;;  %462 = vadd.xlane.f32.xlu1 %v2094_v36 }
 0x275   :  { %v118_v25 = vpop.permute.xlu2 %117 }
 0x276   :  { %v1159_v48 = vsub.f32 %v643_v22, %v1158_v41  ;;  %v1162_v49 = vsub.f32 %v1133_v33, %v1158_v41  ;;  %v1135_v14 = vsub.f32 %v631_v32, %v1134_v44  ;;  %v1138_v50 = vsub.f32 %v1121_v35, %v1134_v44 }
 0x277   :  { %v354_v51 = vadd.f32 %v1997_v23, %v118_v25  ;;  %v850_v58 = vadd.f32 %v849_v46, %v118_v25 }
 0x278   :  { %v1160_v52 = vmul.f32 1.442695, %v1159_v48  ;;  %v1163_v56 = vmul.f32 1.442695, %v1162_v49  ;;  %v1136_v26 = vmul.f32 1.442695, %v1135_v14 }
 0x279   :  { %v1139_v59 = vmul.f32 1.442695, %v1138_v50  ;;  %v382_v60 = vadd.f32 %v381_v13, %v354_v51  ;;  %v878_v1 = vadd.f32 %v877_v62, %v850_v58 }
 0x27a   :  { %1659 = vpow2.f32 %v1160_v52 }
 0x27b   :  { %1661 = vpow2.f32 %v1163_v56  ;;  %v2104_v15 = vadd.f32 %v2003_v27, %v382_v60  ;;  %v2111_v16 = vadd.f32 %v905_v2, %v878_v1 }
 0x27c   :  { %1663 = vpow2.f32 %v1136_v26  ;;  %951 = vadd.xlane.f32.xlu1 %v2101_v63 }
 0x27d   :  { %1665 = vpow2.f32 %v1139_v59  ;;  %582 = vadd.xlane.f32.xlu0 %v2104_v15  ;;  %v108_v23 = vpop.permute.xlu1 %107  ;;  %v113_v35 = vpop.permute.xlu2 %112 }
 0x27e   :  { %v349_v5 = vadd.f32 %v2015_v37, %v108_v23  ;;  %v845_v22 = vadd.f32 %v2078_v39, %v108_v23  ;;  %v848_v41 = vadd.f32 %v2086_v61, %v113_v35 }
 0x280   :  { %v1660_v7 = vpop.eup %1659  ;;  %v377_v8 = vadd.f32 %v2080_v42, %v349_v5  ;;  %v375_v42 = vadd.f32 %v2072_v19, %v347_v11  ;;  %v873_v33 = vadd.f32 %v2082_v43, %v845_v22  ;;  %v876_v43 = vadd.f32 %v2091_v9, %v848_v41 }
 0x281   :  { %v1662_v27 = vpop.eup %1661  ;;  %v843_v22 = vadd.f32 %v2070_v18, %v2109_v6 }
 0x282   :  { %v1664_v10 = vpop.eup %1663  ;;  %v1165_v12 = vadd.f32 %v1662_v27, %v1660_v7  ;;  %v2118_v24 = vadd.f32 %v2013_v34, %v377_v8  ;;  %v2126_v39 = vadd.f32 %v2084_v57, %v873_v33  ;;  %v2129_v34 = vadd.f32 %v2009_v30, %v375_v42 }
 0x283   :  { %v1666_v32 = vpop.eup %1665  ;;  %v2135_v13 = vadd.f32 %v2096_v40, %v876_v43 }
 0x284   :  { %1667 = vrcp.f32 %v1165_v12  ;;  %v1141_v37 = vadd.f32 %v1666_v32, %v1664_v10  ;;  %522 = vadd.xlane.f32.xlu2 %v2118_v24  ;;  %1071 = vadd.xlane.f32.xlu1 %v2111_v16  ;;  %v1177_v46 = vand.u32 2147483648, %v1165_v12  ;;  %v1175_v61 = vand.u32 2147483647, %v1165_v12 }
 0x285   :  { %vm1171_vm2 = vweird.f32 %v1165_v12 }
 0x286   :  { %1669 = vrcp.f32 %v1141_v37  ;;  %v1153_v57 = vand.u32 2147483648, %v1141_v37  ;;  %v1151_v30 = vand.u32 2147483647, %v1141_v37  ;;  %v1178_v51 = vor.u32 1.1754944e-38, %v1177_v46 }
 0x287   :  { %vm1147_vm5 = vweird.f32 %v1141_v37  ;;  %vm1176_vm6 = vcmp.eq.f32.partialorder %v1175_v61, 8.507059e+37 }
 0x288   :  { %v1154_v9 = vor.u32 1.1754944e-38, %v1153_v57  ;;  %vm1152_vm8 = vcmp.eq.f32.partialorder %v1151_v30, 8.507059e+37 }
 0x28a   :  { %v1668_v29 = vpop.eup %1667 }
 0x28b   :  { %v1167_v44 = vmul.f32 %v1668_v29, %v1165_v12  ;;  %vm1172_vm1 = vweird.f32 %v1668_v29 }
 0x28c   :  { %v1670_v25 = vpop.eup %1669  ;;  %1011 = vadd.xlane.f32.xlu2 %v2126_v39  ;;  %501 = vadd.xlane.f32.xlu1 %v2129_v34  ;;  %vm1173_vm4 = vmor %vm1171_vm2, %vm1172_vm1 }
 0x28d   :  { %v1143_v19 = vmul.f32 %v1670_v25, %v1141_v37  ;;  %v1168_v45 = vsub.f32 1.0, %v1167_v44  ;;  %vm1148_vm3 = vweird.f32 %v1670_v25  ;;  %v352_v37 = vadd.f32 %v1987_v17, %v113_v35 }
 0x28e   :  { %vm1149_vm7 = vmor %vm1147_vm5, %vm1148_vm3 }
 0x28f   :  { %v1144_v48 = vsub.f32 1.0, %v1143_v19  ;;  %v1169_v49 = vmul.f32 %v1668_v29, %v1168_v45 }
 0x291   :  { %v1145_v14 = vmul.f32 %v1670_v25, %v1144_v48  ;;  %v1170_v50 = vadd.f32 %v1668_v29, %v1169_v49 }
 0x293   :  { %v1146_v52 = vadd.f32 %v1670_v25, %v1145_v14  ;;  %v1174_v56 = vsel %vm1173_vm4, %v1668_v29, %v1170_v50 }
 0x294   :  { %1050 = vadd.xlane.f32.xlu1 %v2135_v13  ;;  %v1179_v26 = vsel %vm1176_vm6, %v1178_v51, %v1174_v56 }
 0x295   :  { %v1150_v58 = vsel %vm1149_vm7, %v1670_v25, %v1146_v52  ;;  %v1181_v59 = vmul.f32 %v1662_v27, %v1179_v26  ;;  %v1180_v60 = vmul.f32 %v1660_v7, %v1179_v26 }
 0x296   :  { %v1155_v62 = vsel %vm1152_vm8, %v1154_v9, %v1150_v58 }
 0x297   :  { %v1157_v1 = vmul.f32 %v1666_v32, %v1155_v62  ;;  %v1230_v40 = vmul.f32 %v2047_v3, %v1181_v59  ;;  %v1156_v23 = vmul.f32 %v1664_v10, %v1155_v62  ;;  %v1183_v2 = vmul.f32 %v2035_v53, %v1180_v60 }
 0x299   :  { %v1228_v5 = vmul.f32 %v2052_v4, %v1157_v1  ;;  %v1182_v8 = vmul.f32 %v1156_v23, %v2040_v54  ;;  %v871_v4 = vadd.f32 %v2074_v21, %v843_v22  ;;  %v380_v54 = vadd.f32 %v2088_v0, %v352_v37 }
 0x29b   :  { %v1231_v11 = vadd.f32 %v1230_v40, %v1228_v5  ;;  %v1184_v12 = vadd.f32 %v1183_v2, %v1182_v8  ;;  %v2156_v10 = vadd.f32 %v2076_v38, %v871_v4  ;;  %v2159_v18 = vadd.f32 %v1989_v20, %v380_v54 }
 0x29d   :  { %v2146_v7 = vadd.f32 %v2047_v3, %v1231_v11  ;;  %v2149_v27 = vadd.f32 %v2035_v53, %v1184_v12 }
 0x29f   :  { %1233 = vadd.xlane.f32.xlu2 %v2146_v7  ;;  %1186 = vadd.xlane.f32.xlu0 %v2149_v27 }
 0x2a7   :  { %561 = vadd.xlane.f32.xlu0 %v2159_v18  ;;  %990 = vadd.xlane.f32.xlu2 %v2156_v10 }
 0x2e7   :  { %v463_v17 = vpop.xlane.xlu1 %462 }
 0x2e8   :  { %v464_v53 = vmul.f32 %v463_v17, %v2020_v55 }
 0x2ea   :  { %v2165_v3 = vsub.f32 %v2094_v36, %v464_v53 }
 0x2ec   :  { %v466_v21 = vmul.f32 %v2165_v3, %v2165_v3 }
 0x2ee   :  { %467 = vadd.xlane.f32.xlu0 %v466_v21 }
 0x2ef   :  { %v952_v0 = vpop.xlane.xlu1 %951 }
 0x2f0   :  { %v953_v38 = vmul.f32 %v952_v0, %v2020_v55  ;;  %v583_v6 = vpop.xlane.xlu0 %582  ;;  %v44_v0 = vld [vmem:[%s2529_s2 + $0x30] sm:$0xff] }
 0x2f1   :  { %v584_v20 = vmul.f32 %v583_v6, %v2020_v55 }
 0x2f2   :  { %v2172_v32 = vsub.f32 %v2101_v63, %v953_v38 }
 0x2f3   :  { %v2175_v42 = vsub.f32 %v2104_v15, %v584_v20 }
 0x2f4   :  { %v955_v36 = vmul.f32 %v2172_v32, %v2172_v32 }
 0x2f5   :  { %v586_v33 = vmul.f32 %v2175_v42, %v2175_v42 }
 0x2f6   :  { %956 = vadd.xlane.f32.xlu0 %v955_v36 }
 0x2f7   :  { %587 = vadd.xlane.f32.xlu1 %v586_v33  ;;  %v1072_v35 = vpop.xlane.xlu1 %1071  ;;  %v523_v29 = vpop.xlane.xlu2 %522 }
 0x2f8   :  { %v1073_v41 = vmul.f32 %v1072_v35, %v2020_v55  ;;  %v524_v44 = vmul.f32 %v523_v29, %v2020_v55 }
 0x2fa   :  { %v2184_v63 = vsub.f32 %v2111_v16, %v1073_v41  ;;  %v2187_v15 = vsub.f32 %v2118_v24, %v524_v44 }
 0x2fc   :  { %v526_v25 = vmul.f32 %v2187_v15, %v2187_v15  ;;  %v1075_v19 = vmul.f32 %v2184_v63, %v2184_v63 }
 0x2fe   :  { %527 = vadd.xlane.f32.xlu2 %v526_v25 }
 0x2ff   :  { %1076 = vadd.xlane.f32.xlu1 %v1075_v19  ;;  %v1012_v45 = vpop.xlane.xlu2 %1011  ;;  %v502_v43 = vpop.xlane.xlu1 %501 }
 0x300   :  { %v1013_v46 = vmul.f32 %v1012_v45, %v2020_v55  ;;  %v503_v48 = vmul.f32 %v502_v43, %v2020_v55 }
 0x302   :  { %v2196_v16 = vsub.f32 %v2126_v39, %v1013_v46  ;;  %v2199_v24 = vsub.f32 %v2129_v34, %v503_v48  ;;  %v158_v39 = vunpack.c.h.b16 %v1896_v47 }
 0x304   :  { %v1015_v49 = vmul.f32 %v2196_v16, %v2196_v16  ;;  %v505_v61 = vmul.f32 %v2199_v24, %v2199_v24  ;;  %v170_v50 = vpack.c.b16 %v158_v39, %v158_v39 }
 0x306   :  { %1016 = vadd.xlane.f32.xlu2 %v1015_v49  ;;  %879 = vmatmul.bf16.gmra.mxu2 %v170_v50 }
 0x307   :  { %506 = vadd.xlane.f32.xlu1 %v505_v61  ;;  %v1051_v57 = vpop.xlane.xlu1 %1050  ;;  %383 = vmatmul.bf16.gmra.mxu1 %v170_v50 }
 0x308   :  { %v1052_v14 = vmul.f32 %v1051_v57, %v2020_v55 }
 0x30a   :  { %v2207_v30 = vsub.f32 %v2135_v13, %v1052_v14 }
 0x30c   :  { %v1054_v34 = vmul.f32 %v2207_v30, %v2207_v30 }
 0x30f   :  { %1055 = vadd.xlane.f32.xlu1 %v1054_v34 }
 0x312   :  { %v1234_v51 = vpop.xlane.xlu2 %1233  ;;  %v1187_v52 = vpop.xlane.xlu0 %1186 }
 0x313   :  { %v1235_v56 = vrot.slane %v1234_v51, 4  ;;  %v1188_v9 = vrot.slane %v1187_v52, 4 }
 0x315   :  { %v1236_v26 = vadd.f32 %v1235_v56, %v1234_v51  ;;  %v1189_v58 = vadd.f32 %v1188_v9, %v1187_v52 }
 0x317   :  { %v1237_v59 = vrot.slane %v1236_v26, 2  ;;  %v1190_v60 = vrot.slane %v1189_v58, 2 }
 0x319   :  { %v1238_v62 = vadd.f32 %v1237_v59, %v1236_v26  ;;  %v1191_v13 = vadd.f32 %v1190_v60, %v1189_v58 }
 0x31a   :  { %v562_v1 = vpop.xlane.xlu0 %561  ;;  %v991_v37 = vpop.xlane.xlu2 %990 }
 0x31b   :  { %v1239_v40 = vrot.slane %v1238_v62, 1  ;;  %v1192_v47 = vrot.slane %v1191_v13, 1  ;;  %v563_v23 = vmul.f32 %v562_v1, %v2020_v55  ;;  %v992_v54 = vmul.f32 %v991_v37, %v2020_v55 }
 0x31d   :  { %v1240_v2 = vadd.f32 %v1239_v40, %v1238_v62  ;;  %v1193_v5 = vadd.f32 %v1192_v47, %v1191_v13  ;;  %v2214_v8 = vsub.f32 %v2159_v18, %v563_v23  ;;  %v2228_v18 = vsub.f32 %v2156_v10, %v992_v54 }
 0x31f   :  { %v565_v11 = vmul.f32 %v2214_v8, %v2214_v8  ;;  %v1241_v12 = vmul.f32 0.0009765625, %v1240_v2  ;;  %v1194_v22 = vmul.f32 0.0009765625, %v1193_v5 }
 0x321   :  { %566 = vadd.xlane.f32.xlu0 %v565_v11  ;;  %v2219_v4 = vsub.f32 %v2146_v7, %v1241_v12  ;;  %v2225_v53 = vsub.f32 %v2149_v27, %v1194_v22  ;;  %v994_v7 = vmul.f32 %v2228_v18, %v2228_v18 }
 0x323   :  { %v1243_v17 = vmul.f32 %v2219_v4, %v2219_v4  ;;  %v1196_v21 = vmul.f32 %v2225_v53, %v2225_v53 }
 0x325   :  { %1244 = vadd.xlane.f32.xlu2 %v1243_v17 }
 0x329   :  { %1197 = vadd.xlane.f32.xlu0 %v1196_v21 }
 0x32d   :  { %995 = vadd.xlane.f32.xlu2 %v994_v7 }
 0x33d   :  { %122 = vperm.xlu0 %1642, %v44_v0  }
 0x361   :  { %v468_v38 = vpop.xlane.xlu0 %467 }
 0x362   :  { %v469_v27 = vmul.f32 %v468_v38, %v2020_v55 }
 0x364   :  { %v470_v6 = vadd.f32 1e-05, %v469_v27 }
 0x366   :  { %1671 = vrsqrt.f32 %v470_v6  ;;  %vm477_vm10 = vweird.f32 %v470_v6 }
 0x369   :  { %v957_v10 = vpop.xlane.xlu0 %956 }
 0x36a   :  { %v588_v20 = vpop.xlane.xlu1 %587  ;;  %v958_v36 = vmul.f32 %v957_v10, %v2020_v55 }
 0x36b   :  { %v589_v33 = vmul.f32 %v588_v20, %v2020_v55 }
 0x36c   :  { %v1672_v35 = vpop.eup %1671  ;;  %v2240_v29 = vadd.f32 1e-05, %v958_v36 }
 0x36d   :  { %v472_v41 = vmul.f32 %v1672_v35, %v470_v6  ;;  %v590_v44 = vadd.f32 1e-05, %v589_v33  ;;  %vm478_vm9 = vweird.f32 %v1672_v35 }
 0x36e   :  { %1673 = vrsqrt.f32 %v2240_v29  ;;  %vm479_vm11 = vmor %vm477_vm10, %vm478_vm9  ;;  %vm966_vm1 = vweird.f32 %v2240_v29 }
 0x36f   :  { %v473_v25 = vmul.f32 %v1672_v35, %v472_v41  ;;  %1675 = vrsqrt.f32 %v590_v44  ;;  %vm597_vm13 = vweird.f32 %v590_v44 }
 0x371   :  { %v474_v19 = vmul.f32 0.5, %v473_v25  ;;  %v528_v45 = vpop.xlane.xlu2 %527 }
 0x372   :  { %v529_v43 = vmul.f32 %v528_v45, %v2020_v55  ;;  %v1077_v46 = vpop.xlane.xlu1 %1076 }
 0x373   :  { %v1078_v48 = vmul.f32 %v1077_v46, %v2020_v55  ;;  %v475_v61 = vsub.f32 1.5, %v474_v19 }
 0x374   :  { %v2245_v49 = vpop.eup %1673  ;;  %v530_v57 = vadd.f32 1e-05, %v529_v43 }
 0x375   :  { %v1676_v14 = vpop.eup %1675  ;;  %v961_v39 = vmul.f32 %v2245_v49, %v2240_v29  ;;  %v1079_v34 = vadd.f32 1e-05, %v1078_v48  ;;  %v476_v52 = vmul.f32 %v1672_v35, %v475_v61  ;;  %vm967_vm15 = vweird.f32 %v2245_v49 }
 0x376   :  { %v592_v50 = vmul.f32 %v1676_v14, %v590_v44  ;;  %1677 = vrsqrt.f32 %v530_v57  ;;  %vm598_vm12 = vweird.f32 %v1676_v14  ;;  %vm2259_vm3 = vmor %vm966_vm1, %vm967_vm15  ;;  %vm537_vm4 = vweird.f32 %v530_v57 }
 0x377   :  { %v962_v51 = vmul.f32 %v2245_v49, %v961_v39  ;;  %1679 = vrsqrt.f32 %v1079_v34  ;;  %v480_v13 = vsel %vm479_vm11, %v1672_v35, %v476_v52  ;;  %vm599_vm14 = vmor %vm597_vm13, %vm598_vm12  ;;  %vm1086_vm6 = vweird.f32 %v1079_v34 }
 0x378   :  { %v593_v56 = vmul.f32 %v1676_v14, %v592_v50  ;;  %v481_v11 = vmul.f32 %v480_v13, %v2165_v3 }
 0x379   :  { %v1017_v9 = vpop.xlane.xlu2 %1016  ;;  %v963_v59 = vmul.f32 0.5, %v962_v51 }
 0x37a   :  { %v594_v26 = vmul.f32 0.5, %v593_v56  ;;  %v1018_v58 = vmul.f32 %v1017_v9, %v2020_v55  ;;  %v507_v60 = vpop.xlane.xlu1 %506  ;;  %v1419_v38 = vmul.f32 -1.442695, %v481_v11 }
 0x37b   :  { %v964_v12 = vsub.f32 1.5, %v963_v59  ;;  %v508_v17 = vmul.f32 %v507_v60, %v2020_v55 }
 0x37c   :  { %v1678_v62 = vpop.eup %1677  ;;  %v595_v1 = vsub.f32 1.5, %v594_v26  ;;  %v1019_v40 = vadd.f32 1e-05, %v1018_v58 }
 0x37d   :  { %v1680_v47 = vpop.eup %1679  ;;  %v532_v23 = vmul.f32 %v1678_v62, %v530_v57  ;;  %v965_v27 = vmul.f32 %v2245_v49, %v964_v12  ;;  %vm538_vm0 = vweird.f32 %v1678_v62  ;;  %v2257_v20 = vadd.f32 1e-05, %v508_v17 }
 0x37e   :  { %v596_v2 = vmul.f32 %v1676_v14, %v595_v1  ;;  %v1081_v5 = vmul.f32 %v1680_v47, %v1079_v34  ;;  %1681 = vrsqrt.f32 %v1019_v40  ;;  %vm1087_vm2 = vweird.f32 %v1680_v47  ;;  %vm539_vm5 = vmor %vm537_vm4, %vm538_vm0 }
 0x37f   :  { %v533_v22 = vmul.f32 %v1678_v62, %v532_v23  ;;  %1683 = vpow2.f32 %v1419_v38  ;;  %v969_v29 = vsel %vm2259_vm3, %v2245_v49, %v965_v27  ;;  %vm1088_vm7 = vmor %vm1086_vm6, %vm1087_vm2  ;;  %vm1026_vm9 = vweird.f32 %v1019_v40 }
 0x380   :  { %v600_v37 = vsel %vm599_vm14, %v1676_v14, %v596_v2  ;;  %v1082_v54 = vmul.f32 %v1680_v47, %v1081_v5  ;;  %1685 = vrsqrt.f32 %v2257_v20  ;;  %v970_v57 = vmul.f32 %v969_v29, %v2172_v32  ;;  %v2292_v5 = vpop.f32.mrf.mxu3 }
 0x381   :  { %v601_v21 = vmul.f32 %v600_v37, %v2175_v42  ;;  %v534_v7 = vmul.f32 0.5, %v533_v22 }
 0x382   :  { %v1083_v0 = vmul.f32 0.5, %v1082_v54  ;;  %v1056_v41 = vpop.xlane.xlu1 %1055  ;;  %v1561_v56 = vmul.f32 -1.442695, %v970_v57 }
 0x383   :  { %v535_v6 = vsub.f32 1.5, %v534_v7  ;;  %v1421_v36 = vmul.f32 -1.442695, %v601_v21  ;;  %v1057_v46 = vmul.f32 %v1056_v41, %v2020_v55 }
 0x384   :  { %v1682_v10 = vpop.eup %1681  ;;  %v1084_v3 = vsub.f32 1.5, %v1083_v0  ;;  %v2295_v17 = vpop.f32.mrf.mxu1 }
 0x385   :  { %v536_v42 = vmul.f32 %v1678_v62, %v535_v6  ;;  %v1021_v35 = vmul.f32 %v1682_v10, %v1019_v40  ;;  %1687 = vpow2.f32 %v1421_v36  ;;  %vm1027_vm8 = vweird.f32 %v1682_v10  ;;  %v1684_v50 = vpop.eup %1683 }
 0x386   :  { %v1085_v44 = vmul.f32 %v1680_v47, %v1084_v3  ;;  %v2271_v49 = vadd.f32 1e-05, %v1057_v46  ;;  %vm1028_vm10 = vmor %vm1026_vm9, %vm1027_vm8  ;;  %v2277_v32 = vadd.f32 1.0, %v1684_v50  ;;  %v2310_v3 = vpop.f32.mrf.mxu0 }
 0x387   :  { %v540_v25 = vsel %vm539_vm5, %v1678_v62, %v536_v42  ;;  %v1022_v19 = vmul.f32 %v1682_v10, %v1021_v35 }
 0x388   :  { %v541_v45 = vmul.f32 %v540_v25, %v2187_v15  ;;  %v1089_v43 = vsel %vm1088_vm7, %v1680_v47, %v1085_v44  ;;  %v2273_v15 = vpop.eup %1685  ;;  %vm1065_vm12 = vweird.f32 %v2271_v49  ;;  %vm516_vm7 = vweird.f32 %v2257_v20 }
 0x389   :  { %v1090_v48 = vmul.f32 %v1089_v43, %v2184_v63  ;;  %v1023_v61 = vmul.f32 0.5, %v1022_v19  ;;  %v511_v26 = vmul.f32 %v2273_v15, %v2257_v20  ;;  %v2297_v21 = vpop.f32.mrf.mxu2  ;;  %v854_v43 = vpop.f32.mrf.mxu3  ;;  %vm517_vm4 = vweird.f32 %v2273_v15 }
 0x38a   :  { %v1420_v14 = vmul.f32 -1.442695, %v541_v45 }
 0x38b   :  { %v1563_v39 = vmul.f32 -1.442695, %v1090_v48  ;;  %v1024_v34 = vsub.f32 1.5, %v1023_v61  ;;  %v1688_v52 = vpop.eup %1687 }
 0x38c   :  { %v2281_v58 = vadd.f32 1.0, %v1688_v52  ;;  %v386_v52 = vpop.f32.mrf.mxu1 }
 0x38d   :  { %v1025_v51 = vmul.f32 %v1682_v10, %v1024_v34  ;;  %1689 = vpow2.f32 %v1563_v39 }
 0x38e   :  { %1691 = vpow2.f32 %v1420_v14  ;;  %v617_v19 = vand.u32 2147483648, %v2281_v58  ;;  %vm611_vm5 = vweird.f32 %v2281_v58 }
 0x38f   :  { %v1029_v63 = vsel %vm1028_vm10, %v1682_v10, %v1025_v51  ;;  %1693 = vrsqrt.f32 %v2271_v49  ;;  %v615_v51 = vand.u32 2147483647, %v2281_v58 }
 0x390   :  { %v1030_v9 = vmul.f32 %v1029_v63, %v2196_v16  ;;  %1695 = vpow2.f32 %v1561_v56  ;;  %v512_v16 = vmul.f32 %v2273_v15, %v511_v26 }
 0x391   :  { %v882_v56 = vpop.f32.mrf.mxu2 }
 0x392   :  { %v1562_v59 = vmul.f32 -1.442695, %v1030_v9  ;;  %v513_v12 = vmul.f32 0.5, %v512_v16 }
 0x393   :  { %v1690_v60 = vpop.eup %1689 }
 0x394   :  { %1697 = vpow2.f32 %v1562_v59  ;;  %v1692_v62 = vpop.eup %1691  ;;  %v2284_v13 = vadd.f32 1.0, %v1690_v60  ;;  %v567_v1 = vpop.xlane.xlu0 %566  ;;  %v514_v33 = vsub.f32 1.5, %v513_v12 }
 0x395   :  { %1699 = vrcp.f32 %v2277_v32  ;;  %v1694_v40 = vpop.eup %1693  ;;  %v2289_v47 = vadd.f32 1.0, %v1692_v62  ;;  %v568_v22 = vmul.f32 %v567_v1, %v2020_v55  ;;  %v910_v1 = vpop.f32.mrf.mxu0 }
 0x396   :  { %1701 = vrcp.f32 %v2281_v58  ;;  %v1060_v23 = vmul.f32 %v1694_v40, %v2271_v49  ;;  %v1696_v11 = vpop.eup %1695  ;;  %vm1066_vm11 = vweird.f32 %v1694_v40  ;;  %v1106_v46 = vand.u32 2147483648, %v2284_v13 }
 0x397   :  { %1703 = vrcp.f32 %v2284_v13  ;;  %v2303_v38 = vadd.f32 1e-05, %v568_v22  ;;  %v2307_v6 = vadd.f32 1.0, %v1696_v11  ;;  %v2331_v48 = vmul.f32 %v2273_v15, %v514_v33  ;;  %vm1067_vm13 = vmor %vm1065_vm12, %vm1066_vm11 }
 0x398   :  { %v1245_v2 = vpop.xlane.xlu2 %1244  ;;  %v1061_v54 = vmul.f32 %v1694_v40, %v1060_v23  ;;  %1705 = vrcp.f32 %v2289_v47  ;;  %v1104_v50 = vand.u32 2147483647, %v2284_v13  ;;  %vm1100_vm14 = vweird.f32 %v2284_v13 }
 0x399   :  { %v1246_v42 = vrot.slane %v1245_v2, 4  ;;  %vm576_vm10 = vweird.f32 %v2303_v38 }
 0x39a   :  { %v1698_v37 = vpop.eup %1697  ;;  %v1062_v10 = vmul.f32 0.5, %v1061_v54  ;;  %vm2353_vm0 = vcmp.eq.f32.partialorder %v1104_v50, 8.507059e+37 }
 0x39b   :  { %v2299_v7 = vpop.eup %1699  ;;  %v2301_v0 = vadd.f32 1.0, %v1698_v37  ;;  %v1247_v57 = vadd.f32 %v1246_v42, %v1245_v2  ;;  %v1107_v2 = vor.u32 1.1754944e-38, %v1106_v46 }
 0x39c   :  { %v2305_v27 = vpop.eup %1701  ;;  %v2317_v35 = vmul.f32 %v2299_v7, %v2277_v32  ;;  %v1063_v29 = vsub.f32 1.5, %v1062_v10  ;;  %v1198_v25 = vpop.xlane.xlu0 %1197 }
 0x39d   :  { %v2312_v36 = vpop.eup %1703  ;;  %1707 = vrcp.f32 %v2301_v0  ;;  %v2323_v44 = vmul.f32 %v2305_v27, %v2281_v58  ;;  %v1199_v49 = vrot.slane %v1198_v25, 4  ;;  %v1248_v59 = vrot.slane %v1247_v57, 2 }
 0x39e   :  { %v1096_v41 = vmul.f32 %v2312_v36, %v2284_v13  ;;  %1709 = vrsqrt.f32 %v2303_v38  ;;  %v1064_v61 = vmul.f32 %v1694_v40, %v1063_v29  ;;  %v2333_v39 = vpop.eup %1705  ;;  %vm1101_vm15 = vweird.f32 %v2312_v36 }
 0x39f   :  { %1711 = vrcp.f32 %v2307_v6  ;;  %v608_v9 = vsub.f32 1.0, %v2323_v44  ;;  %v1249_v11 = vadd.f32 %v1248_v59, %v1247_v57  ;;  %v1200_v12 = vadd.f32 %v1199_v49, %v1198_v25  ;;  %vm2361_vm1 = vmor %vm1100_vm14, %vm1101_vm15 }
 0x3a0   :  { %v1097_v45 = vsub.f32 1.0, %v1096_v41  ;;  %v996_v14 = vpop.xlane.xlu2 %995  ;;  %v1068_v26 = vsel %vm1067_vm13, %v1694_v40, %v1064_v61  ;;  %v547_v40 = vmul.f32 %v2333_v39, %v2289_v47  ;;  %v1046_v10 = vand.u32 2147483648, %v2301_v0 }
 0x3a1   :  { %v1069_v16 = vmul.f32 %v1068_v26, %v2207_v30  ;;  %v997_v22 = vmul.f32 %v996_v14, %v2020_v55  ;;  %v1044_v55 = vand.u32 2147483647, %v2301_v0  ;;  %v1250_v41 = vrot.slane %v1249_v11, 1 }
 0x3a2   :  { %v1098_v34 = vmul.f32 %v2312_v36, %v1097_v45  ;;  %v1201_v25 = vrot.slane %v1200_v12, 2  ;;  %vm1040_vm3 = vweird.f32 %v2301_v0  ;;  %v548_v46 = vsub.f32 1.0, %v547_v40 }
 0x3a3   :  { %v1708_v63 = vpop.eup %1707  ;;  %1713 = vtanh.f32 %v1069_v16  ;;  %v1251_v45 = vadd.f32 %v1250_v41, %v1249_v11  ;;  %v2373_v43 = vadd.f32 1e-05, %v997_v22  ;;  %v1047_v57 = vor.u32 1.1754944e-38, %v1046_v10 }
 0x3a4   :  { %v1036_v60 = vmul.f32 %v1708_v63, %v2301_v0  ;;  %v1099_v62 = vadd.f32 %v2312_v36, %v1098_v34  ;;  %v2345_v23 = vpop.eup %1709  ;;  %vm1041_vm2 = vweird.f32 %v1708_v63  ;;  %v1202_v14 = vadd.f32 %v1201_v25, %v1200_v12  ;;  %v1568_v0 = vld [vmem:[%s2532_s4 + $0x8] sm:$0xff] }
 0x3a5   :  { %v2348_v37 = vpop.eup %1711  ;;  %v571_v42 = vmul.f32 %v2345_v23, %v2303_v38  ;;  %vm1042_vm6 = vmor %vm1040_vm3, %vm1041_vm2  ;;  %v1252_v50 = vmul.f32 0.0009765625, %v1251_v45  ;;  %1715 = vrsqrt.f32 %v2373_v43  ;;  %v609_v49 = vmul.f32 %v2305_v27, %v608_v9 }
 0x3a6   :  { %v1037_v54 = vsub.f32 1.0, %v1036_v60  ;;  %v1103_v29 = vsel %vm2361_vm1, %v2312_v36, %v1099_v62  ;;  %vm1045_vm8 = vcmp.eq.f32.partialorder %v1044_v55, 8.507059e+37  ;;  %v1203_v56 = vrot.slane %v1202_v14, 1 }
 0x3a7   :  { %v572_v13 = vmul.f32 %v2345_v23, %v571_v42  ;;  %v1108_v36 = vsel %vm2353_vm0, %v1107_v2, %v1103_v29  ;;  %vm577_vm9 = vweird.f32 %v2345_v23  ;;  %v2386_v62 = vadd.f32 1e-05, %v1252_v50  ;;  %vm2429_vm0 = vmor %vm516_vm7, %vm517_vm4 }
 0x3a8   :  { %v1038_v44 = vmul.f32 %v1708_v63, %v1037_v54  ;;  %v976_v16 = vmul.f32 %v2348_v37, %v2307_v6  ;;  %v1270_v1 = vmul.f32 %v1568_v0, %v1108_v36  ;;  %v1204_v11 = vadd.f32 %v1203_v56, %v1202_v14  ;;  %vm578_vm11 = vmor %vm576_vm10, %vm577_vm9 }
 0x3a9   :  { %v573_v34 = vmul.f32 0.5, %v572_v13  ;;  %v1714_v26 = vpop.eup %1713  ;;  %v549_v9 = vmul.f32 %v2333_v39, %v548_v46  ;;  %1717 = vrsqrt.f32 %v2386_v62  ;;  %vm612_vm12 = vweird.f32 %v2305_v27 }
 0x3aa   :  { %v1039_v61 = vadd.f32 %v1708_v63, %v1038_v44  ;;  %v1205_v40 = vmul.f32 0.0009765625, %v1204_v11  ;;  %vm551_vm13 = vweird.f32 %v2289_v47  ;;  %v610_v30 = vadd.f32 %v2305_v27, %v609_v49  ;;  %vm2417_vm15 = vmor %vm611_vm5, %vm612_vm12 }
 0x3ab   :  { %v574_v60 = vsub.f32 1.5, %v573_v34  ;;  %v2396_v33 = vpop.eup %1715  ;;  %v557_v55 = vand.u32 2147483648, %v2289_v47  ;;  %v550_v41 = vadd.f32 %v2333_v39, %v549_v9  ;;  %vm552_vm14 = vweird.f32 %v2333_v39 }
 0x3ac   :  { %v1043_v52 = vsel %vm1042_vm6, %v1708_v63, %v1039_v61  ;;  %v2407_v42 = vadd.f32 1e-05, %v1205_v40  ;;  %v555_v25 = vand.u32 2147483647, %v2289_v47  ;;  %v519_v20 = vsel %vm2429_vm0, %v2273_v15, %v2331_v48  ;;  %vm2449_vm1 = vmor %vm551_vm13, %vm552_vm14  ;;  %v1221_v47 = vld [vmem:[%s2532_s4] sm:$0xff] }
 0x3ad   :  { %v1048_v59 = vsel %vm1045_vm8, %v1047_v57, %v1043_v52  ;;  %v575_v12 = vmul.f32 %v2345_v23, %v574_v60  ;;  %v618_v57 = vor.u32 1.1754944e-38, %v617_v19  ;;  %v488_v14 = vsub.f32 1.0, %v2317_v35 }
 0x3ae   :  { %v1267_v2 = vmul.f32 %v1714_v26, %v1048_v59  ;;  %v554_v19 = vsel %vm2449_vm1, %v2333_v39, %v550_v41  ;;  %v558_v36 = vor.u32 1.1754944e-38, %v557_v55  ;;  %vm616_vm2 = vcmp.eq.f32.partialorder %v615_v51, 8.507059e+37 }
 0x3af   :  { %v123_v63 = vpop.permute.xlu0 %122  ;;  %v579_v38 = vsel %vm578_vm11, %v2345_v23, %v575_v12  ;;  %v2423_v45 = vpop.eup %1717  ;;  %vm1006_vm3 = vweird.f32 %v2396_v33  ;;  %v520_v58 = vmul.f32 %v519_v20, %v2199_v24  ;;  %vm556_vm4 = vcmp.eq.f32.partialorder %v555_v25, 8.507059e+37 }
 0x3b0   :  { %v1271_v22 = vadd.f32 %v1270_v1, %v1267_v2  ;;  %v357_v54 = vadd.f32 %v2005_v28, %v123_v63  ;;  %v853_v10 = vadd.f32 %v2292_v5, %v123_v63  ;;  %v580_v28 = vmul.f32 %v579_v38, %v2214_v8 }
 0x3b1   :  { %v1000_v5 = vmul.f32 %v2396_v33, %v2373_v43  ;;  %v977_v8 = vsub.f32 1.0, %v976_v16  ;;  %v559_v0 = vsel %vm556_vm4, %v558_v36, %v554_v19  ;;  %vm1005_vm5 = vweird.f32 %v2373_v43 }
 0x3b2   :  { %1570 = vst [vmem:[%s2533_s6 + $0x8] sm:$0xff] %v1271_v22  ;;  %v385_v44 = vadd.f32 %v2295_v17, %v357_v54  ;;  %v881_v23 = vadd.f32 %v2297_v21, %v853_v10  ;;  %1719 = vtanh.f32 %v580_v28  ;;  %v614_v21 = vsel %vm2417_vm15, %v2305_v27, %v610_v30  ;;  %vm1007_vm6 = vmor %vm1005_vm5, %vm1006_vm3 }
 0x3b3   :  { %v1001_v13 = vmul.f32 %v2396_v33, %v1000_v5  ;;  %1721 = vrsqrt.f32 %v2407_v42  ;;  %v619_v15 = vsel %vm616_vm2, %v618_v57, %v614_v21  ;;  %v978_v39 = vmul.f32 %v2348_v37, %v977_v8 }
 0x3b4   :  { %v413_v46 = vadd.f32 %v2011_v31, %v385_v44  ;;  %v909_v61 = vadd.f32 %v2310_v3, %v881_v23  ;;  %v1255_v31 = vmul.f32 %v2423_v45, %v2386_v62  ;;  %v489_v52 = vmul.f32 %v2299_v7, %v488_v14 }
 0x3b5   :  { %v1002_v3 = vmul.f32 0.5, %v1001_v13  ;;  %v1222_v56 = vmul.f32 %v1221_v47, %v619_v15  ;;  %vm491_vm7 = vweird.f32 %v2277_v32  ;;  %vm492_vm8 = vweird.f32 %v2299_v7 }
 0x3b6   :  { %1226 = vst [vmem:[%s2534_s7] sm:$0xff] %v413_v46  ;;  %v1256_v48 = vmul.f32 %v2423_v45, %v1255_v31  ;;  %v986_v1 = vand.u32 2147483648, %v2307_v6  ;;  %1723 = vtanh.f32 %v520_v58  ;;  %v979_v11 = vadd.f32 %v2348_v37, %v978_v39  ;;  %vm2493_vm11 = vmor %vm491_vm7, %vm492_vm8 }
 0x3b7   :  { %v1003_v35 = vsub.f32 1.5, %v1002_v3  ;;  %1571 = vst [vmem:[%s2534_s7 + $0x8] sm:$0xff] %v909_v61  ;;  %vm981_vm9 = vweird.f32 %v2348_v37  ;;  %v490_v9 = vadd.f32 %v2299_v7, %v489_v52  ;;  %vm1261_vm10 = vweird.f32 %v2423_v45 }
 0x3b8   :  { %v1720_v51 = vpop.eup %1719  ;;  %v1257_v34 = vmul.f32 0.5, %v1256_v48  ;;  %v497_v63 = vand.u32 2147483648, %v2277_v32  ;;  %vm980_vm12 = vweird.f32 %v2307_v6  ;;  %v984_v40 = vand.u32 2147483647, %v2307_v6 }
 0x3b9   :  { %v1004_v50 = vmul.f32 %v2396_v33, %v1003_v35  ;;  %v1722_v49 = vpop.eup %1721  ;;  %v1220_v26 = vmul.f32 %v1720_v51, %v559_v0  ;;  %v495_v54 = vand.u32 2147483647, %v2277_v32  ;;  %vm1260_vm13 = vweird.f32 %v2386_v62  ;;  %vm2502_vm14 = vmor %vm980_vm12, %vm981_vm9 }
 0x3ba   :  { %v1258_v59 = vsub.f32 1.5, %v1257_v34  ;;  %v1208_v24 = vmul.f32 %v1722_v49, %v2407_v42  ;;  %vm2506_vm15 = vmor %vm1260_vm13, %vm1261_vm10  ;;  %vm1214_vm0 = vweird.f32 %v1722_v49  ;;  %v983_v38 = vsel %vm2502_vm14, %v2348_v37, %v979_v11 }
 0x3bb   :  { %v1008_v60 = vsel %vm1007_vm6, %v2396_v33, %v1004_v50  ;;  %v1223_v16 = vadd.f32 %v1222_v56, %v1220_v26  ;;  %v494_v32 = vsel %vm2493_vm11, %v2299_v7, %v490_v9  ;;  %v987_v62 = vor.u32 1.1754944e-38, %v986_v1 }
 0x3bc   :  { %v1009_v43 = vmul.f32 %v1008_v60, %v2228_v18  ;;  %v1209_v2 = vmul.f32 %v1722_v49, %v1208_v24  ;;  %v1259_v12 = vmul.f32 %v2423_v45, %v1258_v59  ;;  %v1724_v55 = vpop.eup %1723  ;;  %v498_v28 = vor.u32 1.1754944e-38, %v497_v63 }
 0x3bd   :  { %1225 = vst [vmem:[%s2533_s6] sm:$0xff] %v1223_v16  ;;  %vm1213_vm1 = vweird.f32 %v2407_v42  ;;  %vm985_vm2 = vcmp.eq.f32.partialorder %v984_v40, 8.507059e+37  ;;  %vm496_vm3 = vcmp.eq.f32.partialorder %v495_v54, 8.507059e+37 }
 0x3be   :  { %1725 = vtanh.f32 %v1009_v43  ;;  %v1210_v22 = vmul.f32 0.5, %v1209_v2  ;;  %v1263_v6 = vsel %vm2506_vm15, %v2423_v45, %v1259_v12  ;;  %vm1215_vm4 = vmor %vm1213_vm1, %vm1214_vm0  ;;  %v988_v44 = vsel %vm985_vm2, %v987_v62, %v983_v38 }
 0x3bf   :  { %v499_v37 = vsel %vm496_vm3, %v498_v28, %v494_v32  ;;  %v1264_v23 = vmul.f32 %v1263_v6, %v2219_v4 }
 0x3c0   :  { %v1211_v30 = vsub.f32 1.5, %v1210_v22  ;;  %v1218_v8 = vmul.f32 %v1724_v55, %v499_v37 }
 0x3c2   :  { %v1212_v5 = vmul.f32 %v1722_v49, %v1211_v30 }
 0x3c4   :  { %v1726_v41 = vpop.eup %1725  ;;  %v1216_v29 = vsel %vm1215_vm4, %v1722_v49, %v1212_v5 }
 0x3c5   :  { %v1265_v7 = vmul.f32 %v1726_v41, %v988_v44  ;;  %v1217_v25 = vmul.f32 %v1216_v29, %v2225_v53 }
 0x3c7   :  { %v1266_v13 = vadd.f32 %v1265_v7, %v1264_v23  ;;  %v1219_v45 = vadd.f32 %v1218_v8, %v1217_v25 }
 0x3c9   :  { %1569 = vst [vmem:[%s2535_s5 + $0x8] sm:$0xff] %v1266_v13 }
 0x3ca   :  { %1224 = vst [vmem:[%s2535_s5] sm:$0xff] %v1219_v45 }

// kernel: e3d_lstm_forward.13
= control target key start
LH: loop header
LB: loop body
LE: loop exit
PB: predicated region body
PF: predicated region fallthrough
CT: control target
= control target key end

     0   :  { %s743_s24 = smov 0   ;;  %s790_s0 = inlined_call_operand.vmem [shape: bf16[2,144,128], index: 0, kind: input, shape index: {}]   ;;  %s791_s1 = inlined_call_operand.vmem [shape: bf16[8,144], index: 1, kind: input, shape index: {}]   ;;  %s792_s2 = inlined_call_operand.vmem [shape: f32[2,8,128], index: 2, kind: input, shape index: {}]   ;;  %s793_s3 = inlined_call_operand.vmem [shape: f32[2,8,128], index: 3, kind: input, shape index: {}]   ;;  %s794_s4 = inlined_call_operand.vmem [shape: f32[2,8,128], index: 4, kind: input, shape index: {}]   ;;  %s795_s5 = inlined_call_operand.vmem [shape: f32[8,16], index: 5, kind: input, shape index: {}]   ;;  %s796_s6 = inlined_call_operand.vmem [shape: f32[8,1], index: 6, kind: input, shape index: {}]   ;;  %s797_s7 = inlined_call_operand.vmem [shape: f32[2,8,128], index: 7, kind: output, shape index: {}]  }
   0x1 LB: > { %s610_s25 = sadd.s32 4294967295, %s699_s24   ;;  %p614_p0 = scmp.ge.s32.totalorder %s699_s24, 1  ;;  %s699_s24 = sphi %s743_s24, %s17_s24  }
   0x2   : > { %p264_p1 = scmp.lt.s32.totalorder %s699_s24, 3 }
   0x4   : > { %p265_p2 = pnand %p614_p0, %p264_p1 }
   0x5   : > { %p307_p3 = scmp.lt.s32.totalorder (!%p265_p2), %s610_s25, 1 }
   0x6   : > { %268 = sbr.rel (%p265_p2) target bundleno = 470 (0x1d6), region = 48 }
   0xb   : > { %s799_s25 = smov (!%p307_p3, %s610_s25), 1  ;;  %v329_v0 = vld [vmem:[%s791_s1] sm:$0xff]  ;;  %vm408_vm0 = vcmask 130048   ;;  %v701_v21 = vmov 128.0   ;;  %v702_v25 = vmov 0  }
   0xc   : > { %s670_s28 = smul.u32 72, %s799_s25  ;;  %v350_v1 = vunpack.c.h.b16 %v329_v0  ;;  %v349_v11 = vunpack.c.l.b16 %v329_v0  ;;  %s762_s9 = sshll.u32 %s799_s25, 3  ;;  %683 = vrcp.f32 %v701_v21  ;;  %v488_v24 = vld [vmem:[%s795_s5] sm:$0xff]  ;;  %681 = vset.pattern.permute.xlu1 %v702_v25  ;;  %682 = vset.pattern.permute.xlu0 %v702_v25 }
   0xd   : > { %s315_s12 = scalar_lea.vmem %s792_s2, %s762_s9  ;;  %s323_s15 = scalar_lea.vmem %s794_s4, %s762_s9  ;;  %v489_v26 = vld [vmem:[%s796_s6] sm:$0xff] }
   0xe   : > { %s311_s8 = scalar_lea.vmem %s790_s0, %s670_s28  ;;  %v352_v5 = vpack.c.b16 %v350_v1, %v350_v1  ;;  %v351_v13 = vpack.c.b16 %v349_v11, %v349_v11  ;;  %v438_v17 = vld [vmem:[%s315_s12] sm:$0xff]  ;;  %s319_s18 = scalar_lea.vmem %s793_s3, %s762_s9  ;;  %492 = vperm.xlu1 %681, %v489_v26  }
   0xf   : > { %v668_v2 = vld [vmem:[%s311_s8 + $0x38] sm:$0xff]  ;;  %v667_v3 = vld [vmem:[%s311_s8 + $0x30] sm:$0xff]  ;;  %v669_v4 = vld [vmem:[%s311_s8 + $0x40] sm:$0xff]  ;;  %s327_s26 = scalar_lea.vmem %s797_s7, %s762_s9 }
  0x10   : > { %412 = vmatpush.bf16.msra.mxu0 %v668_v2  ;;  %432 = vmatpush.bf16.msra.mxu1 %v669_v4  ;;  %v666_v6 = vld [vmem:[%s311_s8 + $0x28] sm:$0xff]  ;;  %v665_v7 = vld [vmem:[%s311_s8 + $0x20] sm:$0xff]  ;;  %v664_v8 = vld [vmem:[%s311_s8 + $0x18] sm:$0xff] }
  0x11   : > { %v663_v9 = vld [vmem:[%s311_s8 + $0x10] sm:$0xff]  ;;  %v662_v10 = vld [vmem:[%s311_s8 + $0x8] sm:$0xff]  ;;  %v661_v12 = vld [vmem:[%s311_s8] sm:$0xff] }
  0x12   : > { %v487_v22 = vld [vmem:[%s323_s15] sm:$0xff]  ;;  %v684_v27 = vpop.eup %683 }
  0x13   : > { %656 = vmatmul.msk.bf16.vlgmr.msra.gmra.mxu1 %vm408_vm0, %v352_v5  ;;  %v486_v23 = vld [vmem:[%s319_s18] sm:$0xff]  ;;  %512 = vmatpush.msra.mxu2 %v487_v22  ;;  %v443_v28 = vmul.f32 128.0, %v684_v27  ;;  %vm447_vm1 = vweird.f32 %v684_v27 }
  0x14   : > { %413 = vmatpush.bf16.msra.mxu0 %v667_v3 }
  0x15   : > { %513 = vmatpush.msra.mxu2 %v486_v23  ;;  %v444_v29 = vsub.f32 1.0, %v443_v28 }
  0x16   : > { %658 = vmatmul.msk.f32.vlgmr.msra.gmra.mxu2 %vm408_vm0, %v488_v24 }
  0x17   : > { %v445_v30 = vmul.f32 %v684_v27, %v444_v29 }
  0x18   : > { %414 = vmatpush.bf16.msra.mxu0 %v666_v6 }
  0x19   : > { %v446_v31 = vadd.f32 %v684_v27, %v445_v30 }
  0x1b   : > { %v448_v32 = vsel %vm447_vm1, %v684_v27, %v446_v31 }
  0x1c   : > { %415 = vmatpush.bf16.msra.mxu0 %v665_v7 }
  0x20   : > { %416 = vmatpush.bf16.msra.mxu0 %v664_v8 }
  0x24   : > { %417 = vmatpush.bf16.msra.mxu0 %v663_v9 }
  0x28   : > { %418 = vmatpush.bf16.msra.mxu0 %v662_v10 }
  0x2c   : > { %419 = vmatpush.bf16.msra.mxu0 %v661_v12 }
  0x2f   : > { %420 = vmatmul.bf16.vlgmr.msra.gmra.mxu0 %v351_v13 }
  0x80   : > { %v493_v51 = vpop.permute.xlu1 %492 }
  0x90   : > { %v434_v14 = vpop.f32.mrf.mxu1 }
  0x98   : > { %v436_v15 = vpop.f32.mrf.mxu1 }
  0x99   : > { %v515_v52 = vpop.f32.mrf.mxu2 }
  0x9a   : > { %v516_v53 = vadd.f32 %v515_v52, %v493_v51 }
  0xac   : > { %v421_v16 = vpop.f32.mrf.mxu0 }
  0xad   : > { %v435_v18 = vadd.f32 %v434_v14, %v421_v16 }
  0xaf   : > { %v439_v19 = vadd.f32 %v438_v17, %v435_v18 }
  0xb1   : > { %440 = vadd.xlane.f32.xlu0 %v439_v19 }
  0xb4   : > { %v423_v20 = vpop.f32.mrf.mxu0 }
 0x124   : > { %v441_v33 = vpop.xlane.xlu0 %440 }
 0x125   : > { %v449_v34 = vmul.f32 %v448_v32, %v441_v33 }
 0x127   : > { %v450_v35 = vsub.f32 %v439_v19, %v449_v34 }
 0x129   : > { %v451_v36 = vmul.f32 %v450_v35, %v450_v35 }
 0x12b   : > { %452 = vadd.xlane.f32.xlu0 %v451_v36 }
 0x19e   : > { %v453_v37 = vpop.xlane.xlu0 %452 }
 0x19f   : > { %v454_v38 = vmul.f32 %v453_v37, %v448_v32 }
 0x1a1   : > { %v455_v39 = vadd.f32 1e-05, %v454_v38 }
 0x1a3   : > { %685 = vrsqrt.f32 %v455_v39  ;;  %vm462_vm3 = vweird.f32 %v455_v39 }
 0x1a9   : > { %v686_v40 = vpop.eup %685 }
 0x1aa   : > { %v457_v41 = vmul.f32 %v686_v40, %v455_v39  ;;  %vm463_vm2 = vweird.f32 %v686_v40 }
 0x1ab   : > { %vm464_vm4 = vmor %vm462_vm3, %vm463_vm2 }
 0x1ac   : > { %v458_v42 = vmul.f32 %v686_v40, %v457_v41 }
 0x1ae   : > { %v459_v43 = vmul.f32 0.5, %v458_v42 }
 0x1b0   : > { %v460_v44 = vsub.f32 1.5, %v459_v43 }
 0x1b2   : > { %v461_v45 = vmul.f32 %v686_v40, %v460_v44 }
 0x1b4   : > { %v465_v46 = vsel %vm464_vm4, %v686_v40, %v461_v45 }
 0x1b5   : > { %v466_v47 = vmul.f32 %v465_v46, %v450_v35 }
 0x1b7   : > { %v657_v48 = vmul.f32 -1.442695, %v466_v47 }
 0x1b9   : > { %687 = vpow2.f32 %v657_v48 }
 0x1bf   : > { %v688_v49 = vpop.eup %687 }
 0x1c0   : > { %v470_v50 = vadd.f32 1.0, %v688_v49 }
 0x1c2   : > { %689 = vrcp.f32 %v470_v50  ;;  %v482_v57 = vand.u32 2147483648, %v470_v50  ;;  %v480_v59 = vand.u32 2147483647, %v470_v50  ;;  %vm476_vm6 = vweird.f32 %v470_v50 }
 0x1c3   : > { %691 = vtanh.f32 %v516_v53 }
 0x1c4   : > { %v483_v62 = vor.u32 1.1754944e-38, %v482_v57  ;;  %vm481_vm8 = vcmp.eq.f32.partialorder %v480_v59, 8.507059e+37 }
 0x1c8   : > { %v690_v54 = vpop.eup %689 }
 0x1c9   : > { %v472_v55 = vmul.f32 %v690_v54, %v470_v50  ;;  %vm477_vm5 = vweird.f32 %v690_v54  ;;  %v692_v61 = vpop.eup %691 }
 0x1ca   : > { %vm478_vm7 = vmor %vm476_vm6, %vm477_vm5 }
 0x1cb   : > { %v473_v56 = vsub.f32 1.0, %v472_v55 }
 0x1cd   : > { %v474_v58 = vmul.f32 %v690_v54, %v473_v56 }
 0x1cf   : > { %v475_v60 = vadd.f32 %v690_v54, %v474_v58 }
 0x1d1   : > { %v479_v63 = vsel %vm478_vm7, %v690_v54, %v475_v60 }
 0x1d2   : > { %v484_v0 = vsel %vm481_vm8, %v483_v62, %v479_v63 }
 0x1d3   : > { %v519_v1 = vmul.f32 %v692_v61, %v484_v0 }
 0x1d5   : > { %520 = vst [vmem:[%s327_s26] sm:$0xff] %v519_v1 }
 0x1d6 PF: > { %s17_s24 = sadd.s32 1, %s699_s24  }
 0x1d7   : > { %p14_p4 = scmp.ge.s32.totalorder %s17_s24, 4  }
 0x1d9   :  { %16 = sbr.rel (!%p14_p4) target bundleno = 1 (0x1), region = 87 }

// kernel: e3d_lstm_forward.14
= control target key start
LH: loop header
LB: loop body
LE: loop exit
PB: predicated region body
PF: predicated region fallthrough
CT: control target
= control target key end

     0   :  { %v1922_v8 = vmov 0   ;;  %vm366_vm0 = vcmask 392192   ;;  %s2808_s0 = inlined_call_operand.vmem [shape: bf16[2,432,128], index: 0, kind: input, shape index: {}]   ;;  %s2809_s1 = inlined_call_operand.vmem [shape: bf16[56,432], index: 1, kind: input, shape index: {}]   ;;  %s2810_s2 = inlined_call_operand.vmem [shape: f32[56,1], index: 2, kind: input, shape index: {}]   ;;  %s2811_s3 = inlined_call_operand.vmem [shape: f32[2,2,8,128], index: 3, kind: input, shape index: {}]   ;;  %s2812_s4 = inlined_call_operand.vmem [shape: f32[2,8,128], index: 4, kind: input, shape index: {}]   ;;  %s2813_s6 = inlined_call_operand.vmem [shape: f32[2,8,128], index: 6, kind: output, shape index: {1}]   ;;  %s2814_s7 = inlined_call_operand.vmem [shape: f32[2,8,128], index: 7, kind: output, shape index: {2}]   ;;  %s2815_s5 = inlined_call_operand.vmem [shape: f32[2,8,128], index: 5, kind: output, shape index: {0}]  }
   0x1   :  { %v1788_v0 = vld [vmem:[%s2808_s0 + $0x38] sm:$0xff]  ;;  %v1787_v3 = vld [vmem:[%s2808_s0 + $0x30] sm:$0xff]  ;;  %v1806_v7 = vld [vmem:[%s2808_s0 + $0xc8] sm:$0xff]  ;;  %1837 = vset.pattern.permute.xlu0 %v1922_v8  ;;  %1838 = vset.pattern.permute.xlu2 %v1922_v8 }
   0x2   :  { %v1796_v1 = vld [vmem:[%s2808_s0 + $0x78] sm:$0xff]  ;;  %379 = vmatpush.bf16.msra.mxu0 %v1788_v0  ;;  %v1795_v4 = vld [vmem:[%s2808_s0 + $0x70] sm:$0xff]  ;;  %v1786_v9 = vld [vmem:[%s2808_s0 + $0x28] sm:$0xff]  ;;  %1839 = vset.pattern.permute.xlu1 %v1922_v8 }
   0x3   :  { %v1804_v2 = vld [vmem:[%s2808_s0 + $0xb8] sm:$0xff]  ;;  %407 = vmatpush.bf16.msra.mxu1 %v1796_v1  ;;  %v1807_v5 = vld [vmem:[%s2808_s0 + $0xd0] sm:$0xff]  ;;  %v1794_v10 = vld [vmem:[%s2808_s0 + $0x68] sm:$0xff] }
   0x4   :  { %435 = vmatpush.bf16.msra.mxu2 %v1804_v2  ;;  %v1803_v6 = vld [vmem:[%s2808_s0 + $0xb0] sm:$0xff]  ;;  %468 = vmatpush.bf16.msra.mxu3 %v1807_v5  ;;  %v1802_v11 = vld [vmem:[%s2808_s0 + $0xa8] sm:$0xff]  ;;  %v1805_v12 = vld [vmem:[%s2808_s0 + $0xc0] sm:$0xff] }
   0x5   :  { %v1770_v13 = vld [vmem:[%s2809_s1 + $0xc] sm:$0xf]  ;;  %v1438_v14 = vld [vmem:[%s2809_s1 + $0x18] sm:$0xf0]  ;;  %v1815_v15 = vld [vmem:[%s2808_s0 + $0x110] sm:$0xff] }
   0x6   :  { %380 = vmatpush.bf16.msra.mxu0 %v1787_v3  ;;  %v1785_v16 = vld [vmem:[%s2808_s0 + $0x20] sm:$0xff]  ;;  %v2018_v19 = vor.u32 %v1770_v13, %v1438_v14  ;;  %v1814_v20 = vld [vmem:[%s2808_s0 + $0x108] sm:$0xff]  ;;  %v1784_v21 = vld [vmem:[%s2808_s0 + $0x18] sm:$0xff] }
   0x7   :  { %408 = vmatpush.bf16.msra.mxu1 %v1795_v4  ;;  %v1793_v17 = vld [vmem:[%s2808_s0 + $0x60] sm:$0xff]  ;;  %v1792_v22 = vld [vmem:[%s2808_s0 + $0x58] sm:$0xff]  ;;  %v1783_v26 = vld [vmem:[%s2808_s0 + $0x10] sm:$0xff] }
   0x8   :  { %436 = vmatpush.bf16.msra.mxu2 %v1803_v6  ;;  %469 = vmatpush.bf16.msra.mxu3 %v1806_v7  ;;  %v1801_v18 = vld [vmem:[%s2808_s0 + $0xa0] sm:$0xff]  ;;  %v1800_v23 = vld [vmem:[%s2808_s0 + $0x98] sm:$0xff]  ;;  %v1791_v27 = vld [vmem:[%s2808_s0 + $0x50] sm:$0xff] }
   0x9   :  { %v38_v24 = vld [vmem:[%s2810_s2] sm:$0xff]  ;;  %v1799_v28 = vld [vmem:[%s2808_s0 + $0x90] sm:$0xff]  ;;  %v1812_v29 = vld [vmem:[%s2808_s0 + $0xf8] sm:$0xff] }
   0xa   :  { %381 = vmatpush.bf16.msra.mxu0 %v1786_v9  ;;  %101 = vperm.xlu0 %1837, %v38_v24   ;;  %v1813_v25 = vld [vmem:[%s2808_s0 + $0x100] sm:$0xff]  ;;  %v1782_v30 = vld [vmem:[%s2808_s0 + $0x8] sm:$0xff]  ;;  %v1454_v35 = vld [vmem:[%s2809_s1 + $0x38] sm:$0xf0] }
   0xb   :  { %409 = vmatpush.bf16.msra.mxu1 %v1794_v10  ;;  %v1790_v31 = vld [vmem:[%s2808_s0 + $0x48] sm:$0xff]  ;;  %v1781_v33 = vld [vmem:[%s2808_s0] sm:$0xff]  ;;  %v1811_v38 = vld [vmem:[%s2808_s0 + $0xf0] sm:$0xff] }
   0xc   :  { %437 = vmatpush.bf16.msra.mxu2 %v1802_v11  ;;  %470 = vmatpush.bf16.msra.mxu3 %v1805_v12  ;;  %v1798_v32 = vld [vmem:[%s2808_s0 + $0x88] sm:$0xff]  ;;  %v1789_v36 = vld [vmem:[%s2808_s0 + $0x40] sm:$0xff]  ;;  %v1771_v39 = vld [vmem:[%s2809_s1 + $0xc] sm:$0xf0] }
   0xd   :  { %v1774_v34 = vld [vmem:[%s2809_s1 + $0x2c] sm:$0xf]  ;;  %v1428_v37 = vld [vmem:[%s2809_s1] sm:$0xf]  ;;  %v1769_v40 = vld [vmem:[%s2809_s1 + $0x4] sm:$0xf] }
   0xe   :  { %382 = vmatpush.bf16.msra.mxu0 %v1785_v16  ;;  %v1430_v41 = vld [vmem:[%s2809_s1 + $0x10] sm:$0xf0]  ;;  %v1797_v42 = vld [vmem:[%s2808_s0 + $0x80] sm:$0xff]  ;;  %v1436_v43 = vld [vmem:[%s2809_s1 + $0x8] sm:$0xf]  ;;  %v2097_v45 = vor.u32 %v1774_v34, %v1454_v35  ;;  %v2105_v48 = vor.u32 %v1771_v39, %v1428_v37 }
   0xf   :  { %410 = vmatpush.bf16.msra.mxu1 %v1793_v17  ;;  %1582 = vmatmul.msk.bf16.vlgmr.msra.gmra.mxu3 %vm366_vm0, %v2018_v19  ;;  %v1772_v44 = vld [vmem:[%s2809_s1 + $0x14] sm:$0xf0]  ;;  %v1834_v46 = vld [vmem:[%s2808_s0 + $0x1a8] sm:$0xff]  ;;  %v1823_v47 = vld [vmem:[%s2808_s0 + $0x150] sm:$0xff]  ;;  %v2107_v49 = vor.u32 %v1769_v40, %v1430_v41 }
  0x10   :  { %936 = vmatpush.bf16.msrb.mxu3 %v1815_v15  ;;  %438 = vmatpush.bf16.msra.mxu2 %v1801_v18  ;;  %v2109_v50 = vor.u32 %v1772_v44, %v1436_v43  ;;  %v1831_v51 = vld [vmem:[%s2808_s0 + $0x190] sm:$0xff]  ;;  %v1822_v52 = vld [vmem:[%s2808_s0 + $0x148] sm:$0xff]  ;;  %v1833_v53 = vld [vmem:[%s2808_s0 + $0x1a0] sm:$0xff] }
  0x11   :  { %v1830_v54 = vld [vmem:[%s2808_s0 + $0x188] sm:$0xff]  ;;  %v1821_v56 = vld [vmem:[%s2808_s0 + $0x140] sm:$0xff]  ;;  %v1832_v57 = vld [vmem:[%s2808_s0 + $0x198] sm:$0xff] }
  0x12   :  { %383 = vmatpush.bf16.msra.mxu0 %v1784_v21  ;;  %v1810_v55 = vld [vmem:[%s2808_s0 + $0xe8] sm:$0xff]  ;;  %v1809_v58 = vld [vmem:[%s2808_s0 + $0xe0] sm:$0xff]  ;;  %v1470_v61 = vld [vmem:[%s2809_s1 + $0x58] sm:$0xf0] }
  0x13   :  { %411 = vmatpush.bf16.msra.mxu1 %v1792_v22  ;;  %v1829_v59 = vld [vmem:[%s2808_s0 + $0x180] sm:$0xff]  ;;  %v1778_v60 = vld [vmem:[%s2809_s1 + $0x4c] sm:$0xf]  ;;  %v1820_v62 = vld [vmem:[%s2808_s0 + $0x138] sm:$0xff] }
  0x14   :  { %937 = vmatpush.bf16.msrb.mxu3 %v1814_v20  ;;  %439 = vmatpush.bf16.msra.mxu2 %v1800_v23  ;;  %v1444_v63 = vld [vmem:[%s2809_s1 + $0x20] sm:$0xf]  ;;  %v1775_v0 = vld [vmem:[%s2809_s1 + $0x2c] sm:$0xf0]  ;;  %v1808_v1 = vld [vmem:[%s2808_s0 + $0xd8] sm:$0xff]  ;;  %v2176_v7 = vor.u32 %v1778_v60, %v1470_v61 }
  0x15   :  { %v1773_v2 = vld [vmem:[%s2809_s1 + $0x24] sm:$0xf]  ;;  %v1446_v3 = vld [vmem:[%s2809_s1 + $0x30] sm:$0xf0]  ;;  %v1828_v4 = vld [vmem:[%s2808_s0 + $0x178] sm:$0xff]  ;;  %v1445_v9 = vor.u32 %v1775_v0, %v1444_v63 }
  0x16   :  { %384 = vmatpush.bf16.msra.mxu0 %v1783_v26  ;;  %v1452_v5 = vld [vmem:[%s2809_s1 + $0x28] sm:$0xf]  ;;  %v1776_v6 = vld [vmem:[%s2809_s1 + $0x34] sm:$0xf0]  ;;  %v1819_v8 = vld [vmem:[%s2808_s0 + $0x130] sm:$0xff]  ;;  %v1449_v10 = vor.u32 %v1773_v2, %v1446_v3 }
  0x17   :  { %412 = vmatpush.bf16.msra.mxu1 %v1791_v27  ;;  %v1453_v11 = vor.u32 %v1776_v6, %v1452_v5  ;;  %v1827_v12 = vld [vmem:[%s2808_s0 + $0x170] sm:$0xff]  ;;  %v1818_v13 = vld [vmem:[%s2808_s0 + $0x128] sm:$0xff]  ;;  %v1817_v16 = vld [vmem:[%s2808_s0 + $0x120] sm:$0xff] }
  0x18   :  { %938 = vmatpush.bf16.msrb.mxu3 %v1813_v25  ;;  %440 = vmatpush.bf16.msra.mxu2 %v1799_v28  ;;  %v1826_v14 = vld [vmem:[%s2808_s0 + $0x168] sm:$0xff]  ;;  %v1825_v17 = vld [vmem:[%s2808_s0 + $0x160] sm:$0xff]  ;;  %v1816_v20 = vld [vmem:[%s2808_s0 + $0x118] sm:$0xff] }
  0x19   :  { %v37_v15 = vld [vmem:[%s2809_s1 + $0x68] sm:$0xff]  ;;  %v1460_v21 = vld [vmem:[%s2809_s1 + $0x40] sm:$0xf]  ;;  %v1779_v22 = vld [vmem:[%s2809_s1 + $0x4c] sm:$0xf0] }
  0x1a   :  { %385 = vmatpush.bf16.msra.mxu0 %v1782_v30  ;;  %v175_v18 = vunpack.c.h.b16 %v37_v15  ;;  %v1777_v23 = vld [vmem:[%s2809_s1 + $0x44] sm:$0xf]  ;;  %v1462_v24 = vld [vmem:[%s2809_s1 + $0x50] sm:$0xf0]  ;;  %v1824_v25 = vld [vmem:[%s2808_s0 + $0x158] sm:$0xff]  ;;  %v174_v35 = vunpack.c.l.b16 %v37_v15 }
  0x1b   :  { %413 = vmatpush.bf16.msra.mxu1 %v1790_v31  ;;  %v1468_v26 = vld [vmem:[%s2809_s1 + $0x48] sm:$0xf]  ;;  %v1780_v27 = vld [vmem:[%s2809_s1 + $0x54] sm:$0xf0]  ;;  %v1465_v30 = vor.u32 %v1777_v23, %v1462_v24  ;;  %v40_v60 = vld [vmem:[%s2810_s2 + $0x10] sm:$0xff] }
  0x1c   :  { %939 = vmatpush.bf16.msrb.mxu3 %v1812_v29  ;;  %441 = vmatpush.bf16.msra.mxu2 %v1798_v32  ;;  %v191_v28 = vpack.c.b16 %v175_v18, %v175_v18  ;;  %v1461_v29 = vor.u32 %v1779_v22, %v1460_v21  ;;  %v1469_v31 = vor.u32 %v1780_v27, %v1468_v26  ;;  %v36_v32 = vld [vmem:[%s2809_s1 + $0x60] sm:$0xff]  ;;  %v1923_v21 = vmov 128.0  }
  0x1d   :  { %v173_v34 = vunpack.c.h.b16 %v36_v32  ;;  %1840 = vrcp.f32 %v1923_v21 }
  0x1e   :  { %386 = vmatpush.bf16.msra.mxu0 %v1781_v33  ;;  %v172_v33 = vunpack.c.l.b16 %v36_v32 }
  0x1f   :  { %414 = vmatpush.bf16.msra.mxu1 %v1789_v36  ;;  %1583 = vmatmul.msk.bf16.gmra.mxu3 %vm366_vm0, %v2097_v45  ;;  %v189_v37 = vpack.c.b16 %v173_v34, %v173_v34 }
  0x20   :  { %940 = vmatpush.bf16.msrb.mxu3 %v1811_v38  ;;  %442 = vmatpush.bf16.msra.mxu2 %v1797_v42  ;;  %v188_v36 = vpack.c.b16 %v172_v33, %v172_v33  ;;  %v190_v38 = vpack.c.b16 %v174_v35, %v174_v35 }
  0x21   :  { %387 = vmatmul.bf16.vlgmr.msra.gmra.mxu0 %v2105_v48 }
  0x22   :  { %964 = vmatpush.bf16.msrb.mxu0 %v1823_v47  ;;  %415 = vmatmul.bf16.vlgmr.msra.gmra.mxu1 %v2107_v49 }
  0x23   :  { %443 = vmatmul.bf16.vlgmr.msra.gmra.mxu2 %v2109_v50  ;;  %992 = vmatpush.bf16.msrb.mxu1 %v1831_v51  ;;  %v1841_v22 = vpop.eup %1840 }
  0x24   :  { %1025 = vmatpush.bf16.msrb.mxu2 %v1834_v46  ;;  %941 = vmatpush.bf16.msrb.mxu3 %v1810_v55  ;;  %v494_v23 = vmul.f32 128.0, %v1841_v22  ;;  %vm498_vm1 = vweird.f32 %v1841_v22 }
  0x26   :  { %965 = vmatpush.bf16.msrb.mxu0 %v1822_v52  ;;  %v495_v24 = vsub.f32 1.0, %v494_v23 }
  0x27   :  { %993 = vmatpush.bf16.msrb.mxu1 %v1830_v54 }
  0x28   :  { %1026 = vmatpush.bf16.msrb.mxu2 %v1833_v53  ;;  %942 = vmatpush.bf16.msrb.mxu3 %v1809_v58 }
  0x2a   :  { %966 = vmatpush.bf16.msrb.mxu0 %v1821_v56 }
  0x2b   :  { %994 = vmatpush.bf16.msrb.mxu1 %v1829_v59 }
  0x2c   :  { %1027 = vmatpush.bf16.msrb.mxu2 %v1832_v57  ;;  %943 = vmatpush.bf16.msrb.mxu3 %v1808_v1 }
  0x2e   :  { %967 = vmatpush.bf16.msrb.mxu0 %v1820_v62 }
  0x2f   :  { %995 = vmatpush.bf16.msrb.mxu1 %v1828_v4  ;;  %1584 = vmatmul.msk.bf16.gmra.mxu3 %vm366_vm0, %v2176_v7 }
  0x31   :  { %392 = vmatmul.bf16.gmra.mxu0 %v1445_v9 }
  0x32   :  { %968 = vmatpush.bf16.msrb.mxu0 %v1819_v8  ;;  %420 = vmatmul.bf16.gmra.mxu1 %v1449_v10 }
  0x33   :  { %448 = vmatmul.bf16.gmra.mxu2 %v1453_v11  ;;  %996 = vmatpush.bf16.msrb.mxu1 %v1827_v12 }
  0x36   :  { %969 = vmatpush.bf16.msrb.mxu0 %v1818_v13 }
  0x37   :  { %997 = vmatpush.bf16.msrb.mxu1 %v1826_v14 }
  0x3a   :  { %970 = vmatpush.bf16.msrb.mxu0 %v1817_v16 }
  0x3b   :  { %998 = vmatpush.bf16.msrb.mxu1 %v1825_v17 }
  0x3e   :  { %971 = vmatpush.bf16.msrb.mxu0 %v1816_v20 }
  0x3f   :  { %999 = vmatpush.bf16.msrb.mxu1 %v1824_v25  ;;  %1585 = vmatmul.msk.bf16.gmra.mxu3 %vm366_vm0, %v191_v28  ;;  %v496_v25 = vmul.f32 %v1841_v22, %v495_v24 }
  0x41   :  { %397 = vmatmul.bf16.gmra.mxu0 %v1461_v29  ;;  %v497_v26 = vadd.f32 %v1841_v22, %v496_v25 }
  0x42   :  { %425 = vmatmul.bf16.gmra.mxu1 %v1465_v30 }
  0x43   :  { %453 = vmatmul.bf16.gmra.mxu2 %v1469_v31  ;;  %v2290_v27 = vsel %vm498_vm1, %v1841_v22, %v497_v26 }
  0x4f   :  { %944 = vmatmul.bf16.vlgmr.msrb.gmra.mxu3 %v2105_v48 }
  0x51   :  { %402 = vmatmul.bf16.gmra.mxu0 %v188_v36 }
  0x52   :  { %430 = vmatmul.bf16.gmra.mxu1 %v189_v37 }
  0x53   :  { %458 = vmatmul.bf16.gmra.mxu2 %v190_v38 }
  0x5f   :  { %949 = vmatmul.bf16.gmra.mxu3 %v1445_v9 }
  0x61   :  { %972 = vmatmul.bf16.vlgmr.msrb.gmra.mxu0 %v2107_v49 }
  0x62   :  { %1000 = vmatmul.bf16.vlgmr.msrb.gmra.mxu1 %v2109_v50 }
  0x63   :  { %1753 = vmatmul.msk.bf16.vlgmr.msrb.gmra.mxu2 %vm366_vm0, %v2018_v19 }
  0x6f   :  { %954 = vmatmul.bf16.gmra.mxu3 %v1461_v29 }
  0x71   :  { %977 = vmatmul.bf16.gmra.mxu0 %v1449_v10 }
  0x72   :  { %1005 = vmatmul.bf16.gmra.mxu1 %v1453_v11 }
  0x73   :  { %1754 = vmatmul.msk.bf16.gmra.mxu2 %vm366_vm0, %v2097_v45 }
  0x7c   :  { %v102_v19 = vpop.permute.xlu0 %101 }
  0x7f   :  { %959 = vmatmul.bf16.gmra.mxu3 %v188_v36  ;;  %v39_v36 = vld [vmem:[%s2810_s2 + $0x8] sm:$0xff] }
  0x81   :  { %982 = vmatmul.bf16.gmra.mxu0 %v1465_v30 }
  0x82   :  { %1010 = vmatmul.bf16.gmra.mxu1 %v1469_v31 }
  0x83   :  { %1755 = vmatmul.msk.bf16.gmra.mxu2 %vm366_vm0, %v2176_v7 }
  0x91   :  { %987 = vmatmul.bf16.gmra.mxu0 %v189_v37 }
  0x92   :  { %1015 = vmatmul.bf16.gmra.mxu1 %v190_v38  ;;  %v472_v39 = vpop.f32.mrf.mxu3 }
  0x93   :  { %1756 = vmatmul.msk.bf16.gmra.mxu2 %vm366_vm0, %v191_v28 }
  0x9a   :  { %v2239_v40 = vpop.f32.mrf.mxu3 }
  0x9e   :  { %v388_v41 = vpop.f32.mrf.mxu0 }
  0x9f   :  { %v416_v42 = vpop.f32.mrf.mxu1  ;;  %v389_v43 = vadd.f32 %v388_v41, %v102_v19 }
  0xa1   :  { %v417_v44 = vadd.f32 %v416_v42, %v389_v43 }
  0xa2   :  { %v2241_v46 = vpop.f32.mrf.mxu3 }
  0xa6   :  { %v444_v45 = vpop.f32.mrf.mxu2  ;;  %v2243_v48 = vpop.f32.mrf.mxu0 }
  0xa7   :  { %v445_v47 = vadd.f32 %v444_v45, %v417_v44  ;;  %v2245_v49 = vpop.f32.mrf.mxu1 }
  0xa9   :  { %v473_v50 = vadd.f32 %v472_v39, %v445_v47 }
  0xaa   :  { %v2247_v51 = vpop.f32.mrf.mxu3 }
  0xab   :  { %491 = vadd.xlane.f32.xlu0 %v473_v50 }
  0xae   :  { %v2249_v52 = vpop.f32.mrf.mxu2  ;;  %v2251_v53 = vpop.f32.mrf.mxu0 }
  0xaf   :  { %v2253_v54 = vpop.f32.mrf.mxu1 }
  0xb2   :  { %v2255_v55 = vpop.f32.mrf.mxu3 }
  0xb6   :  { %v2257_v56 = vpop.f32.mrf.mxu2  ;;  %v2259_v57 = vpop.f32.mrf.mxu0 }
  0xb7   :  { %v2261_v58 = vpop.f32.mrf.mxu1 }
  0xba   :  { %v2263_v59 = vpop.f32.mrf.mxu3 }
  0xbe   :  { %v2268_v61 = vpop.f32.mrf.mxu2  ;;  %v2270_v62 = vpop.f32.mrf.mxu0 }
  0xbf   :  { %111 = vperm.xlu0 %1837, %v40_v60   ;;  %v2272_v63 = vpop.f32.mrf.mxu1 }
  0xc2   :  { %v2274_v0 = vpop.f32.mrf.mxu3 }
  0xc3   :  { %2816 = vst [vmem:[#allocation2_spill] sm:$0xff] %v2274_v0 }
  0xc6   :  { %v2276_v1 = vpop.f32.mrf.mxu2  ;;  %v2278_v2 = vpop.f32.mrf.mxu0 }
  0xc7   :  { %v2280_v3 = vpop.f32.mrf.mxu1 }
  0xca   :  { %v489_v4 = vpop.f32.mrf.mxu3 }
  0xce   :  { %v2282_v5 = vpop.f32.mrf.mxu2  ;;  %v2284_v6 = vpop.f32.mrf.mxu0 }
  0xcf   :  { %v2286_v7 = vpop.f32.mrf.mxu1 }
  0xd2   :  { %v945_v11 = vpop.f32.mrf.mxu3 }
  0xd3   :  { %v946_v13 = vadd.f32 %v945_v11, %v102_v19 }
  0xd6   :  { %v2288_v8 = vpop.f32.mrf.mxu2  ;;  %v405_v9 = vpop.f32.mrf.mxu0 }
  0xd7   :  { %v433_v10 = vpop.f32.mrf.mxu1 }
  0xde   :  { %v461_v12 = vpop.f32.mrf.mxu2  ;;  %v973_v14 = vpop.f32.mrf.mxu0 }
  0xdf   :  { %v974_v15 = vadd.f32 %v973_v14, %v946_v13  ;;  %v1001_v16 = vpop.f32.mrf.mxu1 }
  0xe1   :  { %v1002_v17 = vadd.f32 %v1001_v16, %v974_v15 }
  0xe6   :  { %v1029_v18 = vpop.f32.mrf.mxu2 }
  0xe7   :  { %v1030_v20 = vadd.f32 %v1029_v18, %v1002_v17  ;;  %v2301_v18 = vld [vmem:[%s2811_s3 + $0x10] sm:$0xff] }
  0xe9   :  { %1048 = vadd.xlane.f32.xlu1 %v1030_v20 }
 0x11e   :  { %v492_v28 = vpop.xlane.xlu0 %491 }
 0x11f   :  { %v500_v29 = vmul.f32 %v2290_v27, %v492_v28 }
 0x121   :  { %v501_v30 = vsub.f32 %v473_v50, %v500_v29 }
 0x123   :  { %v502_v31 = vmul.f32 %v501_v30, %v501_v30 }
 0x125   :  { %503 = vadd.xlane.f32.xlu1 %v502_v31 }
 0x15c   :  { %v1049_v32 = vpop.xlane.xlu1 %1048 }
 0x15d   :  { %v1050_v33 = vmul.f32 %v1049_v32, %v2290_v27 }
 0x15f   :  { %v1051_v34 = vsub.f32 %v1030_v20, %v1050_v33  ;;  %v2306_v20 = vld [vmem:[%s2811_s3] sm:$0xff] }
 0x161   :  { %v1052_v35 = vmul.f32 %v1051_v34, %v1051_v34 }
 0x163   :  { %1053 = vadd.xlane.f32.xlu2 %v1052_v35 }
 0x17b   :  { %106 = vperm.xlu2 %1838, %v39_v36  }
 0x198   :  { %v504_v37 = vpop.xlane.xlu1 %503 }
 0x199   :  { %v505_v38 = vmul.f32 %v504_v37, %v2290_v27 }
 0x19b   :  { %v506_v39 = vadd.f32 1e-05, %v505_v38 }
 0x19d   :  { %1842 = vrsqrt.f32 %v506_v39  ;;  %vm513_vm3 = vweird.f32 %v506_v39 }
 0x1a3   :  { %v1843_v19 = vpop.eup %1842 }
 0x1a4   :  { %v508_v41 = vmul.f32 %v1843_v19, %v506_v39  ;;  %vm514_vm2 = vweird.f32 %v1843_v19 }
 0x1a5   :  { %vm515_vm4 = vmor %vm513_vm3, %vm514_vm2 }
 0x1a6   :  { %v509_v42 = vmul.f32 %v1843_v19, %v508_v41 }
 0x1a8   :  { %v510_v43 = vmul.f32 0.5, %v509_v42 }
 0x1aa   :  { %v511_v44 = vsub.f32 1.5, %v510_v43 }
 0x1ac   :  { %v512_v45 = vmul.f32 %v1843_v19, %v511_v44 }
 0x1ae   :  { %v516_v47 = vsel %vm515_vm4, %v1843_v19, %v512_v45 }
 0x1af   :  { %v517_v50 = vmul.f32 %v516_v47, %v501_v30 }
 0x1b1   :  { %v1586_v60 = vmul.f32 -1.442695, %v517_v50 }
 0x1b3   :  { %1844 = vpow2.f32 %v1586_v60 }
 0x1b9   :  { %v1845_v4 = vpop.eup %1844 }
 0x1ba   :  { %v521_v9 = vadd.f32 1.0, %v1845_v4  ;;  %v2319_v4 = vld [vmem:[%s2811_s3 + $0x8] sm:$0xff] }
 0x1bc   :  { %1846 = vrcp.f32 %v521_v9  ;;  %v533_v13 = vand.u32 2147483648, %v521_v9  ;;  %v531_v15 = vand.u32 2147483647, %v521_v9  ;;  %vm527_vm6 = vweird.f32 %v521_v9 }
 0x1be   :  { %v534_v17 = vor.u32 1.1754944e-38, %v533_v13  ;;  %vm532_vm8 = vcmp.eq.f32.partialorder %v531_v15, 8.507059e+37  ;;  %v43_v13 = vld [vmem:[%s2810_s2 + $0x28] sm:$0xff]  ;;  %v42_v15 = vld [vmem:[%s2810_s2 + $0x20] sm:$0xff] }
 0x1c2   :  { %v1847_v10 = vpop.eup %1846 }
 0x1c3   :  { %v523_v11 = vmul.f32 %v1847_v10, %v521_v9  ;;  %vm528_vm5 = vweird.f32 %v1847_v10 }
 0x1c4   :  { %vm529_vm7 = vmor %vm527_vm6, %vm528_vm5 }
 0x1c5   :  { %v524_v12 = vsub.f32 1.0, %v523_v11 }
 0x1c7   :  { %v525_v14 = vmul.f32 %v1847_v10, %v524_v12 }
 0x1c9   :  { %v526_v16 = vadd.f32 %v1847_v10, %v525_v14  ;;  %v41_v14 = vld [vmem:[%s2810_s2 + $0x18] sm:$0xff] }
 0x1cb   :  { %v530_v21 = vsel %vm529_vm7, %v1847_v10, %v526_v16 }
 0x1cc   :  { %v535_v22 = vsel %vm532_vm8, %v534_v17, %v530_v21 }
 0x1cd   :  { %v709_v23 = vmul.f32 %v2301_v18, %v535_v22  ;;  %v697_v24 = vmul.f32 %v2306_v20, %v535_v22  ;;  %v947_v22 = vpop.f32.mrf.mxu3 }
 0x1cf   :  { %710 = vadd.xlane.f32.xlu1 %v709_v23  ;;  %698 = vadd.xlane.f32.xlu2 %v697_v24 }
 0x1d6   :  { %v1054_v25 = vpop.xlane.xlu2 %1053 }
 0x1d7   :  { %v1055_v26 = vmul.f32 %v1054_v25, %v2290_v27  ;;  %v975_v25 = vpop.f32.mrf.mxu0 }
 0x1d9   :  { %v1056_v28 = vadd.f32 1e-05, %v1055_v26 }
 0x1db   :  { %1848 = vrsqrt.f32 %v1056_v28  ;;  %vm1063_vm10 = vweird.f32 %v1056_v28 }
 0x1de   :  { %v107_v16 = vpop.permute.xlu2 %106 }
 0x1df   :  { %v391_v17 = vadd.f32 %v2243_v48, %v107_v16  ;;  %v948_v23 = vadd.f32 %v947_v22, %v107_v16  ;;  %v2342_v48 = vpop.f32.mrf.mxu3 }
 0x1e1   :  { %v1849_v29 = vpop.eup %1848  ;;  %v419_v21 = vadd.f32 %v2245_v49, %v391_v17  ;;  %v976_v26 = vadd.f32 %v975_v25, %v948_v23  ;;  %v2344_v49 = vpop.f32.mrf.mxu0 }
 0x1e2   :  { %v1058_v30 = vmul.f32 %v1849_v29, %v1056_v28  ;;  %vm1064_vm9 = vweird.f32 %v1849_v29 }
 0x1e3   :  { %vm1065_vm11 = vmor %vm1063_vm10, %vm1064_vm9  ;;  %v447_v24 = vadd.f32 %v2249_v52, %v419_v21 }
 0x1e4   :  { %v1059_v31 = vmul.f32 %v1849_v29, %v1058_v30 }
 0x1e5   :  { %v2336_v28 = vadd.f32 %v2239_v40, %v447_v24 }
 0x1e6   :  { %v1060_v32 = vmul.f32 0.5, %v1059_v31  ;;  %v1031_v31 = vpop.f32.mrf.mxu2 }
 0x1e8   :  { %v1061_v33 = vsub.f32 1.5, %v1060_v32 }
 0x1ea   :  { %v1062_v35 = vmul.f32 %v1849_v29, %v1061_v33 }
 0x1ec   :  { %v1066_v36 = vsel %vm1065_vm11, %v1849_v29, %v1062_v35  ;;  %v1003_v29 = vpop.f32.mrf.mxu1 }
 0x1ed   :  { %v1067_v37 = vmul.f32 %v1066_v36, %v1051_v34  ;;  %v2314_v34 = vld [vmem:[%s2811_s3 + $0x18] sm:$0xff]  ;;  %v1004_v30 = vadd.f32 %v1003_v29, %v976_v26  ;;  %v2350_v36 = vpop.f32.mrf.mxu3  ;;  %v2362_v26 = vpop.permute.xlu0 %111 }
 0x1ee   :  { %v2348_v52 = vpop.f32.mrf.mxu2 }
 0x1ef   :  { %v1757_v38 = vmul.f32 -1.442695, %v1067_v37  ;;  %v2339_v32 = vadd.f32 %v1031_v31, %v1004_v30 }
 0x1f1   :  { %1850 = vpow2.f32 %v1757_v38 }
 0x1f4   :  { %v2346_v33 = vpop.f32.mrf.mxu1 }
 0x1f7   :  { %v1851_v39 = vpop.eup %1850 }
 0x1f8   :  { %v1071_v19 = vadd.f32 1.0, %v1851_v39  ;;  %v2352_v39 = vpop.f32.mrf.mxu0 }
 0x1fa   :  { %1852 = vrcp.f32 %v1071_v19  ;;  %v1083_v44 = vand.u32 2147483648, %v1071_v19  ;;  %v1081_v47 = vand.u32 2147483647, %v1071_v19  ;;  %vm1077_vm13 = vweird.f32 %v1071_v19 }
 0x1fc   :  { %v1084_v60 = vor.u32 1.1754944e-38, %v1083_v44  ;;  %vm1082_vm15 = vcmp.eq.f32.partialorder %v1081_v47, 8.507059e+37  ;;  %v955_v47 = vpop.f32.mrf.mxu3 }
 0x200   :  { %v1853_v41 = vpop.eup %1852 }
 0x201   :  { %v1073_v42 = vmul.f32 %v1853_v41, %v1071_v19  ;;  %vm1078_vm12 = vweird.f32 %v1853_v41  ;;  %v2354_v19 = vpop.f32.mrf.mxu1 }
 0x202   :  { %vm1079_vm14 = vmor %vm1077_vm13, %vm1078_vm12 }
 0x203   :  { %v1074_v43 = vsub.f32 1.0, %v1073_v42 }
 0x204   :  { %v957_v25 = vpop.f32.mrf.mxu3 }
 0x205   :  { %v1075_v45 = vmul.f32 %v1853_v41, %v1074_v43  ;;  %v2356_v43 = vpop.f32.mrf.mxu2 }
 0x207   :  { %v1076_v50 = vadd.f32 %v1853_v41, %v1075_v45 }
 0x209   :  { %v1080_v9 = vsel %vm1079_vm14, %v1853_v41, %v1076_v50  ;;  %v983_v50 = vpop.f32.mrf.mxu0 }
 0x20a   :  { %v1085_v10 = vsel %vm1082_vm15, %v1084_v60, %v1080_v9  ;;  %v2358_v60 = vpop.f32.mrf.mxu1 }
 0x20b   :  { %v1260_v11 = vmul.f32 %v2314_v34, %v1085_v10  ;;  %v1248_v12 = vmul.f32 %v2319_v4, %v1085_v10 }
 0x20d   :  { %1261 = vadd.xlane.f32.xlu1 %v1260_v11  ;;  %1249 = vadd.xlane.f32.xlu2 %v1248_v12 }
 0x225   :  { %126 = vperm.xlu2 %1838, %v43_v13  }
 0x226   :  { %116 = vperm.xlu1 %1839, %v41_v14  }
 0x22d   :  { %121 = vperm.xlu2 %1838, %v42_v15   ;;  %v2360_v15 = vpop.f32.mrf.mxu2 }
 0x242   :  { %v711_v35 = vpop.xlane.xlu1 %710  ;;  %v699_v40 = vpop.xlane.xlu2 %698 }
 0x243   :  { %v712_v37 = vrot.slane %v711_v35, 4  ;;  %v700_v38 = vrot.slane %v699_v40, 4 }
 0x245   :  { %v713_v41 = vadd.f32 %v712_v37, %v711_v35  ;;  %v701_v42 = vadd.f32 %v700_v38, %v699_v40  ;;  %v985_v37 = vpop.f32.mrf.mxu0 }
 0x247   :  { %v714_v44 = vrot.slane %v713_v41, 2  ;;  %v702_v45 = vrot.slane %v701_v42, 2 }
 0x249   :  { %v715_v9 = vadd.f32 %v714_v44, %v713_v41  ;;  %v703_v10 = vadd.f32 %v702_v45, %v701_v42  ;;  %v394_v45 = vadd.f32 %v2251_v53, %v2362_v26 }
 0x24b   :  { %v716_v21 = vrot.slane %v715_v9, 1  ;;  %v704_v22 = vrot.slane %v703_v10, 1 }
 0x24d   :  { %v717_v31 = vadd.f32 %v716_v21, %v715_v9  ;;  %v705_v35 = vadd.f32 %v704_v22, %v703_v10  ;;  %v1041_v9 = vpop.f32.mrf.mxu2 }
 0x250   :  { %537 = vadd.xlane.f32.xlu1 %v2336_v28 }
 0x258   :  { %1087 = vadd.xlane.f32.xlu1 %v2339_v32 }
 0x280   :  { %v1262_v11 = vpop.xlane.xlu1 %1261  ;;  %v1250_v12 = vpop.xlane.xlu2 %1249 }
 0x281   :  { %v1263_v13 = vrot.slane %v1262_v11, 4  ;;  %v1251_v14 = vrot.slane %v1250_v12, 4 }
 0x283   :  { %v1264_v16 = vadd.f32 %v1263_v13, %v1262_v11  ;;  %v1252_v17 = vadd.f32 %v1251_v14, %v1250_v12  ;;  %v1013_v11 = vpop.f32.mrf.mxu1 }
 0x285   :  { %v1265_v23 = vrot.slane %v1264_v16, 2  ;;  %v1253_v24 = vrot.slane %v1252_v17, 2 }
 0x287   :  { %v1266_v29 = vadd.f32 %v1265_v23, %v1264_v16  ;;  %v1254_v30 = vadd.f32 %v1253_v24, %v1252_v17  ;;  %v718_v16 = vmul.f32 0.022097087, %v717_v31  ;;  %v706_v17 = vmul.f32 0.022097087, %v705_v35 }
 0x288   :  { %v127_v40 = vpop.permute.xlu2 %126 }
 0x289   :  { %v1267_v38 = vrot.slane %v1266_v29, 1  ;;  %v1255_v41 = vrot.slane %v1254_v30, 1  ;;  %v401_v42 = vadd.f32 %v2278_v2, %v127_v40  ;;  %v958_v44 = vadd.f32 %v957_v25, %v127_v40 }
 0x28a   :  { %v422_v2 = vadd.f32 %v2253_v54, %v394_v45 }
 0x28b   :  { %v1268_v12 = vadd.f32 %v1267_v38, %v1266_v29  ;;  %v1256_v13 = vadd.f32 %v1255_v41, %v1254_v30  ;;  %v429_v14 = vadd.f32 %v2280_v3, %v401_v42  ;;  %v986_v0 = vadd.f32 %v985_v37, %v958_v44 }
 0x28c   :  { %v450_v38 = vadd.f32 %v2257_v56, %v422_v2 }
 0x28d   :  { %v1269_v10 = vmul.f32 0.022097087, %v1268_v12  ;;  %v1257_v21 = vmul.f32 0.022097087, %v1256_v13  ;;  %v1014_v22 = vadd.f32 %v1013_v11, %v986_v0  ;;  %v457_v23 = vadd.f32 %v2282_v5, %v429_v14 }
 0x28e   :  { %v2382_v42 = vadd.f32 %v2241_v46, %v450_v38 }
 0x28f   :  { %v1294_v24 = vmax.f32 %v718_v16, %v1269_v10  ;;  %v1270_v25 = vmax.f32 %v706_v17, %v1257_v21  ;;  %v2370_v40 = vadd.f32 %v1041_v9, %v1014_v22  ;;  %v2373_v53 = vadd.f32 %v2263_v59, %v457_v23 }
 0x290   :  { %v2375_v29 = vpop.permute.xlu2 %121 }
 0x291   :  { %v1295_v3 = vsub.f32 %v718_v16, %v1294_v24  ;;  %v1298_v30 = vsub.f32 %v1269_v10, %v1294_v24  ;;  %v1271_v31 = vsub.f32 %v706_v17, %v1270_v25  ;;  %v1274_v35 = vsub.f32 %v1257_v21, %v1270_v25  ;;  %1207 = vadd.xlane.f32.xlu1 %v2370_v40 }
 0x292   :  { %v956_v0 = vadd.f32 %v955_v47, %v2375_v29  ;;  %657 = vadd.xlane.f32.xlu0 %v2373_v53 }
 0x293   :  { %v1296_v54 = vmul.f32 1.442695, %v1295_v3  ;;  %v1299_v5 = vmul.f32 1.442695, %v1298_v30  ;;  %v1272_v37 = vmul.f32 1.442695, %v1271_v31 }
 0x294   :  { %v1275_v41 = vmul.f32 1.442695, %v1274_v35  ;;  %v984_v59 = vadd.f32 %v983_v50, %v956_v0 }
 0x295   :  { %1854 = vpow2.f32 %v1296_v54 }
 0x296   :  { %1856 = vpow2.f32 %v1299_v5  ;;  %v1012_v47 = vadd.f32 %v2358_v60, %v984_v59 }
 0x297   :  { %1858 = vpow2.f32 %v1272_v37 }
 0x298   :  { %1860 = vpow2.f32 %v1275_v41  ;;  %v117_v44 = vpop.permute.xlu1 %116  ;;  %v2391_v17 = vadd.f32 %v2360_v15, %v1012_v47  ;;  %v951_v47 = vadd.f32 %v2342_v48, %v2362_v26 }
 0x299   :  { %v396_v45 = vadd.f32 %v2259_v57, %v117_v44  ;;  %576 = vadd.xlane.f32.xlu1 %v2382_v42  ;;  %v953_v56 = vadd.f32 %v2350_v36, %v117_v44 }
 0x29b   :  { %v1855_v11 = vpop.eup %1854  ;;  %v424_v12 = vadd.f32 %v2261_v58, %v396_v45  ;;  %v981_v9 = vadd.f32 %v2352_v39, %v953_v56 }
 0x29c   :  { %v1857_v13 = vpop.eup %1856 }
 0x29d   :  { %v1859_v14 = vpop.eup %1858  ;;  %v1301_v50 = vadd.f32 %v1857_v13, %v1855_v11  ;;  %v452_v16 = vadd.f32 %v2268_v61, %v424_v12  ;;  %v1009_v58 = vadd.f32 %v2354_v19, %v981_v9  ;;  %v399_v12 = vadd.f32 %v2270_v62, %v2375_v29 }
 0x29e   :  { %v1861_v46 = vpop.eup %1860 }
 0x29f   :  { %1862 = vrcp.f32 %v1301_v50  ;;  %v1277_v57 = vadd.f32 %v1861_v46, %v1859_v14  ;;  %v2395_v60 = vadd.f32 %v2247_v51, %v452_v16  ;;  %v2401_v15 = vadd.f32 %v2356_v43, %v1009_v58 }
 0x2a0   :  { %v1313_v39 = vand.u32 2147483648, %v1301_v50  ;;  %v1311_v2 = vand.u32 2147483647, %v1301_v50  ;;  %vm1307_vm1 = vweird.f32 %v1301_v50 }
 0x2a1   :  { %1864 = vrcp.f32 %v1277_v57  ;;  %597 = vadd.xlane.f32.xlu2 %v2395_v60  ;;  %1186 = vadd.xlane.f32.xlu1 %v2391_v17  ;;  %v1289_v24 = vand.u32 2147483648, %v1277_v57  ;;  %v1287_v19 = vand.u32 2147483647, %v1277_v57  ;;  %vm1283_vm4 = vweird.f32 %v1277_v57 }
 0x2a2   :  { %v1314_v30 = vor.u32 1.1754944e-38, %v1313_v39  ;;  %vm1312_vm5 = vcmp.eq.f32.partialorder %v1311_v2, 8.507059e+37 }
 0x2a3   :  { %v1290_v35 = vor.u32 1.1754944e-38, %v1289_v24  ;;  %vm1288_vm7 = vcmp.eq.f32.partialorder %v1287_v19, 8.507059e+37 }
 0x2a5   :  { %v1863_v36 = vpop.eup %1862 }
 0x2a6   :  { %v1303_v61 = vmul.f32 %v1863_v36, %v1301_v50  ;;  %vm1308_vm0 = vweird.f32 %v1863_v36 }
 0x2a7   :  { %v1865_v10 = vpop.eup %1864  ;;  %vm1309_vm3 = vmor %vm1307_vm1, %vm1308_vm0 }
 0x2a8   :  { %v1279_v21 = vmul.f32 %v1865_v10, %v1277_v57  ;;  %v1304_v22 = vsub.f32 1.0, %v1303_v61  ;;  %vm1284_vm2 = vweird.f32 %v1865_v10 }
 0x2a9   :  { %1147 = vadd.xlane.f32.xlu2 %v2401_v15  ;;  %vm1285_vm6 = vmor %vm1283_vm4, %vm1284_vm2 }
 0x2aa   :  { %v1280_v51 = vsub.f32 1.0, %v1279_v21  ;;  %v1305_v23 = vmul.f32 %v1863_v36, %v1304_v22 }
 0x2ac   :  { %v1281_v25 = vmul.f32 %v1865_v10, %v1280_v51  ;;  %v1306_v3 = vadd.f32 %v1863_v36, %v1305_v23 }
 0x2ae   :  { %v1282_v31 = vadd.f32 %v1865_v10, %v1281_v25  ;;  %v1310_v43 = vsel %vm1309_vm3, %v1863_v36, %v1306_v3 }
 0x2af   :  { %v1315_v0 = vsel %vm1312_vm5, %v1314_v30, %v1310_v43 }
 0x2b0   :  { %v1286_v54 = vsel %vm1285_vm6, %v1865_v10, %v1282_v31  ;;  %v1317_v5 = vmul.f32 %v1857_v13, %v1315_v0  ;;  %v1316_v37 = vmul.f32 %v1855_v11, %v1315_v0  ;;  %v979_v11 = vadd.f32 %v2344_v49, %v951_v47 }
 0x2b1   :  { %v1291_v38 = vsel %vm1288_vm7, %v1290_v35, %v1286_v54 }
 0x2b2   :  { %v1293_v41 = vmul.f32 %v1861_v46, %v1291_v38  ;;  %v1366_v59 = vmul.f32 %v2314_v34, %v1317_v5  ;;  %v1292_v44 = vmul.f32 %v1859_v14, %v1291_v38  ;;  %v1319_v45 = vmul.f32 %v2301_v18, %v1316_v37 }
 0x2b3   :  { %v427_v46 = vadd.f32 %v2272_v63, %v399_v12  ;;  %v1007_v62 = vadd.f32 %v2346_v33, %v979_v11 }
 0x2b4   :  { %v1364_v56 = vmul.f32 %v2319_v4, %v1293_v41  ;;  %v1318_v50 = vmul.f32 %v1292_v44, %v2306_v20 }
 0x2b5   :  { %v455_v20 = vadd.f32 %v2276_v1, %v427_v46  ;;  %v2425_v4 = vadd.f32 %v2348_v52, %v1007_v62 }
 0x2b6   :  { %v1367_v16 = vadd.f32 %v1366_v59, %v1364_v56  ;;  %v1320_v13 = vadd.f32 %v1319_v45, %v1318_v50 }
 0x2b7   :  { %v483_v48 = vadd.f32 %v2255_v55, %v455_v20 }
 0x2b8   :  { %v2415_v14 = vadd.f32 %v2314_v34, %v1367_v16  ;;  %v2418_v57 = vadd.f32 %v2301_v18, %v1320_v13 }
 0x2ba   :  { %1369 = vadd.xlane.f32.xlu2 %v2415_v14  ;;  %1322 = vadd.xlane.f32.xlu0 %v2418_v57 }
 0x2c2   :  { %636 = vadd.xlane.f32.xlu0 %v483_v48  ;;  %1126 = vadd.xlane.f32.xlu2 %v2425_v4 }
 0x2c3   :  { %v538_v63 = vpop.xlane.xlu1 %537 }
 0x2c4   :  { %v539_v18 = vmul.f32 %v538_v63, %v2290_v27 }
 0x2c6   :  { %v2431_v34 = vsub.f32 %v2336_v28, %v539_v18 }
 0x2c8   :  { %v541_v49 = vmul.f32 %v2431_v34, %v2431_v34 }
 0x2ca   :  { %542 = vadd.xlane.f32.xlu0 %v541_v49  ;;  %v44_v49 = vld [vmem:[%s2810_s2 + $0x30] sm:$0xff] }
 0x2cb   :  { %v1088_v33 = vpop.xlane.xlu1 %1087 }
 0x2cc   :  { %v1089_v1 = vmul.f32 %v1088_v33, %v2290_v27 }
 0x2ce   :  { %v2437_v52 = vsub.f32 %v2339_v32, %v1089_v1 }
 0x2d0   :  { %v1091_v55 = vmul.f32 %v2437_v52, %v2437_v52 }
 0x2d2   :  { %1092 = vadd.xlane.f32.xlu0 %v1091_v55 }
 0x304   :  { %v1208_v26 = vpop.xlane.xlu1 %1207 }
 0x305   :  { %v658_v29 = vpop.xlane.xlu0 %657  ;;  %v1209_v58 = vmul.f32 %v1208_v26, %v2290_v27 }
 0x306   :  { %v659_v9 = vmul.f32 %v658_v29, %v2290_v27 }
 0x307   :  { %v2449_v32 = vsub.f32 %v2370_v40, %v1209_v58 }
 0x308   :  { %v2443_v28 = vsub.f32 %v2373_v53, %v659_v9 }
 0x309   :  { %v1211_v21 = vmul.f32 %v2449_v32, %v2449_v32 }
 0x30a   :  { %v661_v36 = vmul.f32 %v2443_v28, %v2443_v28 }
 0x30c   :  { %662 = vadd.xlane.f32.xlu1 %v661_v36  ;;  %v577_v61 = vpop.xlane.xlu1 %576 }
 0x30d   :  { %v578_v10 = vmul.f32 %v577_v61, %v2290_v27 }
 0x30f   :  { %v2456_v39 = vsub.f32 %v2382_v42, %v578_v10 }
 0x311   :  { %v580_v24 = vmul.f32 %v2456_v39, %v2456_v39 }
 0x314   :  { %1212 = vadd.xlane.f32.xlu1 %v1211_v21  ;;  %v598_v22 = vpop.xlane.xlu2 %597  ;;  %v1187_v23 = vpop.xlane.xlu1 %1186 }
 0x315   :  { %v599_v53 = vmul.f32 %v598_v22, %v2290_v27  ;;  %v1188_v2 = vmul.f32 %v1187_v23, %v2290_v27 }
 0x317   :  { %v2459_v51 = vsub.f32 %v2395_v60, %v599_v53  ;;  %v2468_v42 = vsub.f32 %v2391_v17, %v1188_v2 }
 0x319   :  { %v601_v40 = vmul.f32 %v2459_v51, %v2459_v51  ;;  %v1190_v30 = vmul.f32 %v2468_v42, %v2468_v42 }
 0x31b   :  { %602 = vadd.xlane.f32.xlu2 %v601_v40 }
 0x31c   :  { %581 = vadd.xlane.f32.xlu1 %v580_v24  ;;  %v1148_v25 = vpop.xlane.xlu2 %1147 }
 0x31d   :  { %v1149_v19 = vmul.f32 %v1148_v25, %v2290_v27 }
 0x31f   :  { %v2471_v60 = vsub.f32 %v2401_v15, %v1149_v19 }
 0x321   :  { %v1151_v3 = vmul.f32 %v2471_v60, %v2471_v60 }
 0x323   :  { %1152 = vadd.xlane.f32.xlu2 %v1151_v3 }
 0x324   :  { %1191 = vadd.xlane.f32.xlu1 %v1190_v30 }
 0x32d   :  { %v1370_v31 = vpop.xlane.xlu2 %1369  ;;  %v1323_v43 = vpop.xlane.xlu0 %1322 }
 0x32e   :  { %v1371_v35 = vrot.slane %v1370_v31, 4  ;;  %v1324_v0 = vrot.slane %v1323_v43, 4 }
 0x330   :  { %v1372_v54 = vadd.f32 %v1371_v35, %v1370_v31  ;;  %v1325_v5 = vadd.f32 %v1324_v0, %v1323_v43 }
 0x332   :  { %v1373_v37 = vrot.slane %v1372_v54, 2  ;;  %v1326_v17 = vrot.slane %v1325_v5, 2 }
 0x334   :  { %v1374_v38 = vadd.f32 %v1373_v37, %v1372_v54  ;;  %v1327_v41 = vadd.f32 %v1326_v17, %v1325_v5 }
 0x335   :  { %v637_v15 = vpop.xlane.xlu0 %636  ;;  %v1127_v11 = vpop.xlane.xlu2 %1126 }
 0x336   :  { %v1375_v59 = vrot.slane %v1374_v38, 1  ;;  %v1328_v44 = vrot.slane %v1327_v41, 1  ;;  %v638_v45 = vmul.f32 %v637_v15, %v2290_v27  ;;  %v1128_v62 = vmul.f32 %v1127_v11, %v2290_v27 }
 0x338   :  { %v1376_v47 = vadd.f32 %v1375_v59, %v1374_v38  ;;  %v1329_v12 = vadd.f32 %v1328_v44, %v1327_v41  ;;  %v2478_v56 = vsub.f32 %v483_v48, %v638_v45  ;;  %v2492_v48 = vsub.f32 %v2425_v4, %v1128_v62 }
 0x33a   :  { %v640_v50 = vmul.f32 %v2478_v56, %v2478_v56  ;;  %v1377_v16 = vmul.f32 0.0009765625, %v1376_v47  ;;  %v1330_v13 = vmul.f32 0.0009765625, %v1329_v12 }
 0x33c   :  { %641 = vadd.xlane.f32.xlu0 %v640_v50  ;;  %v2483_v46 = vsub.f32 %v2415_v14, %v1377_v16  ;;  %v2489_v63 = vsub.f32 %v2418_v57, %v1330_v13  ;;  %v1130_v14 = vmul.f32 %v2492_v48, %v2492_v48 }
 0x33d   :  { %v543_v33 = vpop.xlane.xlu0 %542 }
 0x33e   :  { %v1379_v20 = vmul.f32 %v2483_v46, %v2483_v46  ;;  %v1332_v18 = vmul.f32 %v2489_v63, %v2489_v63  ;;  %v544_v1 = vmul.f32 %v543_v33, %v2290_v27 }
 0x340   :  { %1380 = vadd.xlane.f32.xlu2 %v1379_v20  ;;  %v545_v55 = vadd.f32 1e-05, %v544_v1 }
 0x342   :  { %1866 = vrsqrt.f32 %v545_v55  ;;  %vm552_vm9 = vweird.f32 %v545_v55 }
 0x344   :  { %1333 = vadd.xlane.f32.xlu0 %v1332_v18 }
 0x345   :  { %v1093_v57 = vpop.xlane.xlu0 %1092 }
 0x346   :  { %v1094_v4 = vmul.f32 %v1093_v57, %v2290_v27 }
 0x348   :  { %1131 = vadd.xlane.f32.xlu2 %v1130_v14  ;;  %v1095_v26 = vadd.f32 1e-05, %v1094_v4  ;;  %v1867_v29 = vpop.eup %1866 }
 0x349   :  { %v547_v58 = vmul.f32 %v1867_v29, %v545_v55  ;;  %vm553_vm8 = vweird.f32 %v1867_v29 }
 0x34a   :  { %1868 = vrsqrt.f32 %v1095_v26  ;;  %vm554_vm11 = vmor %vm552_vm9, %vm553_vm8  ;;  %vm1102_vm12 = vweird.f32 %v1095_v26 }
 0x34b   :  { %v548_v61 = vmul.f32 %v1867_v29, %v547_v58 }
 0x34d   :  { %v549_v53 = vmul.f32 0.5, %v548_v61 }
 0x34f   :  { %v550_v2 = vsub.f32 1.5, %v549_v53 }
 0x350   :  { %v1869_v9 = vpop.eup %1868 }
 0x351   :  { %v1097_v36 = vmul.f32 %v1869_v9, %v1095_v26  ;;  %v551_v3 = vmul.f32 %v1867_v29, %v550_v2  ;;  %vm1103_vm10 = vweird.f32 %v1869_v9 }
 0x352   :  { %vm1104_vm13 = vmor %vm1102_vm12, %vm1103_vm10 }
 0x353   :  { %v1098_v10 = vmul.f32 %v1869_v9, %v1097_v36  ;;  %v555_v0 = vsel %vm554_vm11, %v1867_v29, %v551_v3 }
 0x354   :  { %v556_v15 = vmul.f32 %v555_v0, %v2431_v34 }
 0x355   :  { %v1099_v40 = vmul.f32 0.5, %v1098_v10 }
 0x356   :  { %v1587_v16 = vmul.f32 -1.442695, %v556_v15 }
 0x357   :  { %v1100_v24 = vsub.f32 1.5, %v1099_v40 }
 0x358   :  { %131 = vperm.xlu0 %1837, %v44_v49  }
 0x359   :  { %v1101_v43 = vmul.f32 %v1869_v9, %v1100_v24 }
 0x35b   :  { %v1105_v37 = vsel %vm1104_vm13, %v1869_v9, %v1101_v43 }
 0x35c   :  { %v1106_v47 = vmul.f32 %v1105_v37, %v2437_v52 }
 0x35e   :  { %v1758_v62 = vmul.f32 -1.442695, %v1106_v47 }
 0x37f   :  { %v663_v21 = vpop.xlane.xlu1 %662 }
 0x380   :  { %v664_v22 = vmul.f32 %v663_v21, %v2290_v27 }
 0x382   :  { %v665_v23 = vadd.f32 1e-05, %v664_v22 }
 0x384   :  { %1870 = vrsqrt.f32 %v665_v23  ;;  %vm672_vm15 = vweird.f32 %v665_v23 }
 0x387   :  { %v1213_v25 = vpop.xlane.xlu1 %1212 }
 0x388   :  { %v1214_v19 = vmul.f32 %v1213_v25, %v2290_v27 }
 0x38a   :  { %v1871_v30 = vpop.eup %1870  ;;  %v1215_v31 = vadd.f32 1e-05, %v1214_v19 }
 0x38b   :  { %v667_v35 = vmul.f32 %v1871_v30, %v665_v23  ;;  %vm673_vm14 = vweird.f32 %v1871_v30 }
 0x38c   :  { %1872 = vrsqrt.f32 %v1215_v31  ;;  %vm674_vm0 = vmor %vm672_vm15, %vm673_vm14  ;;  %vm1222_vm2 = vweird.f32 %v1215_v31 }
 0x38d   :  { %v668_v54 = vmul.f32 %v1871_v30, %v667_v35 }
 0x38e   :  { %v603_v5 = vpop.xlane.xlu2 %602 }
 0x38f   :  { %v669_v17 = vmul.f32 0.5, %v668_v54  ;;  %v604_v38 = vmul.f32 %v603_v5, %v2290_v27  ;;  %v582_v41 = vpop.xlane.xlu1 %581 }
 0x390   :  { %v583_v20 = vmul.f32 %v582_v41, %v2290_v27 }
 0x391   :  { %v670_v59 = vsub.f32 1.5, %v669_v17  ;;  %v605_v44 = vadd.f32 1e-05, %v604_v38 }
 0x392   :  { %v1873_v45 = vpop.eup %1872  ;;  %v2512_v26 = vadd.f32 1e-05, %v583_v20 }
 0x393   :  { %v671_v12 = vmul.f32 %v1871_v30, %v670_v59  ;;  %v1217_v50 = vmul.f32 %v1873_v45, %v1215_v31  ;;  %1874 = vrsqrt.f32 %v605_v44  ;;  %vm1223_vm1 = vweird.f32 %v1873_v45 }
 0x394   :  { %1876 = vpow2.f32 %v1587_v16  ;;  %vm1224_vm3 = vmor %vm1222_vm2, %vm1223_vm1  ;;  %vm612_vm5 = vweird.f32 %v605_v44  ;;  %v2547_v16 = vpop.f32.mrf.mxu3  ;;  %vm591_vm13 = vweird.f32 %v2512_v26 }
 0x395   :  { %v675_v13 = vsel %vm674_vm0, %v1871_v30, %v671_v12  ;;  %v1218_v11 = vmul.f32 %v1873_v45, %v1217_v50  ;;  %1878 = vpow2.f32 %v1758_v62 }
 0x396   :  { %v1153_v18 = vpop.xlane.xlu2 %1152  ;;  %v676_v34 = vmul.f32 %v675_v13, %v2443_v28 }
 0x397   :  { %v1219_v14 = vmul.f32 0.5, %v1218_v11  ;;  %v1154_v49 = vmul.f32 %v1153_v18, %v2290_v27  ;;  %v1192_v33 = vpop.xlane.xlu1 %1191  ;;  %v2549_v18 = vpop.f32.mrf.mxu0 }
 0x398   :  { %v1193_v52 = vmul.f32 %v1192_v33, %v2290_v27  ;;  %v1589_v9 = vmul.f32 -1.442695, %v676_v34 }
 0x399   :  { %v1875_v57 = vpop.eup %1874  ;;  %v1220_v1 = vsub.f32 1.5, %v1219_v14  ;;  %v1155_v4 = vadd.f32 1e-05, %v1154_v49 }
 0x39a   :  { %v607_v55 = vmul.f32 %v1875_v57, %v605_v44  ;;  %v2514_v29 = vadd.f32 1e-05, %v1193_v52  ;;  %v1877_v61 = vpop.eup %1876  ;;  %vm613_vm4 = vweird.f32 %v1875_v57 }
 0x39b   :  { %v1221_v58 = vmul.f32 %v1873_v45, %v1220_v1  ;;  %1880 = vrsqrt.f32 %v1155_v4  ;;  %v1879_v22 = vpop.eup %1878  ;;  %v2519_v2 = vadd.f32 1.0, %v1877_v61  ;;  %vm614_vm6 = vmor %vm612_vm5, %vm613_vm4  ;;  %vm1162_vm8 = vweird.f32 %v1155_v4 }
 0x39c   :  { %v608_v28 = vmul.f32 %v1875_v57, %v607_v55  ;;  %1882 = vrsqrt.f32 %v2514_v29  ;;  %v2523_v3 = vadd.f32 1.0, %v1879_v22  ;;  %v2564_v55 = vpop.f32.mrf.mxu2  ;;  %vm1201_vm12 = vweird.f32 %v2514_v29 }
 0x39d   :  { %v1225_v36 = vsel %vm1224_vm3, %v1873_v45, %v1221_v58  ;;  %1884 = vrsqrt.f32 %v2512_v26 }
 0x39e   :  { %v1226_v10 = vmul.f32 %v1225_v36, %v2449_v32  ;;  %v609_v21 = vmul.f32 0.5, %v608_v28  ;;  %1886 = vpow2.f32 %v1589_v9 }
 0x3a0   :  { %v1760_v53 = vmul.f32 -1.442695, %v1226_v10  ;;  %v610_v23 = vsub.f32 1.5, %v609_v21 }
 0x3a1   :  { %v1881_v40 = vpop.eup %1880 }
 0x3a2   :  { %1888 = vpow2.f32 %v1760_v53  ;;  %v611_v24 = vmul.f32 %v1875_v57, %v610_v23  ;;  %v1157_v25 = vmul.f32 %v1881_v40, %v1155_v4  ;;  %v2521_v19 = vpop.eup %1882  ;;  %vm1163_vm7 = vweird.f32 %v1881_v40  ;;  %v962_v23 = vpop.f32.mrf.mxu3 }
 0x3a3   :  { %v2525_v32 = vpop.eup %1884  ;;  %1890 = vrcp.f32 %v2519_v2  ;;  %v1196_v54 = vmul.f32 %v2521_v19, %v2514_v29  ;;  %vm1164_vm9 = vmor %vm1162_vm8, %vm1163_vm7  ;;  %vm1202_vm10 = vweird.f32 %v2521_v19 }
 0x3a4   :  { %v615_v30 = vsel %vm614_vm6, %v1875_v57, %v611_v24  ;;  %v1158_v31 = vmul.f32 %v1881_v40, %v1157_v25  ;;  %v1887_v43 = vpop.eup %1886  ;;  %1892 = vrcp.f32 %v2523_v3  ;;  %v586_v38 = vmul.f32 %v2525_v32, %v2512_v26  ;;  %v2560_v57 = vpop.f32.mrf.mxu1  ;;  %vm2592_vm14 = vmor %vm1201_vm12, %vm1202_vm10 }
 0x3a5   :  { %v616_v35 = vmul.f32 %v615_v30, %v2459_v51  ;;  %v2532_v17 = vadd.f32 1.0, %v1887_v43  ;;  %v1197_v59 = vmul.f32 %v2521_v19, %v1196_v54  ;;  %vm592_vm11 = vweird.f32 %v2525_v32  ;;  %v990_v43 = vpop.f32.mrf.mxu0 }
 0x3a6   :  { %v1159_v0 = vmul.f32 0.5, %v1158_v31  ;;  %v587_v45 = vmul.f32 %v2525_v32, %v586_v38  ;;  %vm2609_vm15 = vmor %vm591_vm13, %vm592_vm11 }
 0x3a7   :  { %v1588_v5 = vmul.f32 -1.442695, %v616_v35  ;;  %v1198_v13 = vmul.f32 0.5, %v1197_v59  ;;  %v692_v53 = vand.u32 2147483648, %v2532_v17  ;;  %vm686_vm4 = vweird.f32 %v2532_v17 }
 0x3a8   :  { %v1889_v37 = vpop.eup %1888  ;;  %v1160_v41 = vsub.f32 1.5, %v1159_v0  ;;  %v588_v14 = vmul.f32 0.5, %v587_v45 }
 0x3a9   :  { %v2536_v15 = vadd.f32 1.0, %v1889_v37  ;;  %1894 = vpow2.f32 %v1588_v5  ;;  %v2540_v44 = vpop.eup %1890  ;;  %v1199_v4 = vsub.f32 1.5, %v1198_v13  ;;  %v2599_v45 = vor.u32 1.1754944e-38, %v692_v53 }
 0x3aa   :  { %v1161_v51 = vmul.f32 %v1881_v40, %v1160_v41  ;;  %v2544_v12 = vpop.eup %1892  ;;  %v562_v52 = vmul.f32 %v2540_v44, %v2519_v2  ;;  %v589_v28 = vsub.f32 1.5, %v588_v14 }
 0x3ab   :  { %1896 = vrcp.f32 %v2536_v15  ;;  %vm1236_vm0 = vweird.f32 %v2536_v15 }
 0x3ac   :  { %1898 = vrcp.f32 %v2532_v17  ;;  %v1165_v47 = vsel %vm1164_vm9, %v1881_v40, %v1161_v51  ;;  %v563_v10 = vsub.f32 1.0, %v562_v52  ;;  %v1200_v40 = vmul.f32 %v2521_v19, %v1199_v4  ;;  %v1018_v59 = vpop.f32.mrf.mxu1 }
 0x3ad   :  { %v1166_v50 = vmul.f32 %v1165_v47, %v2471_v60  ;;  %v1112_v60 = vmul.f32 %v2544_v12, %v2523_v3  ;;  %v2580_v35 = vmul.f32 %v2525_v32, %v589_v28  ;;  %v1242_v47 = vand.u32 2147483648, %v2536_v15 }
 0x3ae   :  { %v2587_v41 = vmul.f32 %v2540_v44, %v563_v10  ;;  %v1204_v26 = vsel %vm2592_vm14, %v2521_v19, %v1200_v40  ;;  %v690_v4 = vand.u32 2147483647, %v2532_v17 }
 0x3af   :  { %v1895_v11 = vpop.eup %1894  ;;  %v1759_v62 = vmul.f32 -1.442695, %v1166_v50  ;;  %v642_v20 = vpop.xlane.xlu0 %641  ;;  %v1113_v21 = vsub.f32 1.0, %v1112_v60  ;;  %v594_v19 = vsel %vm2609_vm15, %v2525_v32, %v2580_v35  ;;  %v1205_v28 = vmul.f32 %v1204_v26, %v2468_v42  ;;  %v1357_v35 = vld [vmem:[%s2812_s4] sm:$0xff] }
 0x3b0   :  { %v2551_v34 = vadd.f32 1.0, %v1895_v11  ;;  %v643_v49 = vmul.f32 %v642_v20, %v2290_v27  ;;  %v1046_v50 = vpop.f32.mrf.mxu2  ;;  %v1243_v10 = vor.u32 1.1754944e-38, %v1242_v47 }
 0x3b1   :  { %v2554_v33 = vpop.eup %1896  ;;  %1900 = vpow2.f32 %v1759_v62  ;;  %v2597_v51 = vmul.f32 %v2544_v12, %v1113_v21  ;;  %v1240_v62 = vand.u32 2147483647, %v2536_v15 }
 0x3b2   :  { %v2562_v1 = vpop.eup %1898  ;;  %v1232_v9 = vmul.f32 %v2554_v33, %v2536_v15  ;;  %1902 = vrcp.f32 %v2551_v34  ;;  %v2569_v36 = vadd.f32 1e-05, %v643_v49  ;;  %vm1237_vm2 = vweird.f32 %v2554_v33 }
 0x3b3   :  { %v1381_v58 = vpop.xlane.xlu2 %1380  ;;  %v682_v22 = vmul.f32 %v2562_v1, %v2532_v17  ;;  %vm687_vm1 = vweird.f32 %v2562_v1  ;;  %vm2634_vm3 = vcmp.eq.f32.partialorder %v1240_v62, 8.507059e+37  ;;  %vm626_vm5 = vweird.f32 %v2551_v34  ;;  %vm2652_vm7 = vmor %vm1236_vm0, %vm1237_vm2 }
 0x3b4   :  { %v1382_v61 = vrot.slane %v1381_v58, 4  ;;  %1904 = vrsqrt.f32 %v2569_v36  ;;  %v1233_v30 = vsub.f32 1.0, %v1232_v9  ;;  %vm651_vm6 = vweird.f32 %v2569_v36  ;;  %vm2690_vm14 = vmor %vm686_vm4, %vm687_vm1 }
 0x3b5   :  { %v683_v38 = vsub.f32 1.0, %v682_v22  ;;  %v632_v23 = vand.u32 2147483648, %v2551_v34  ;;  %vm691_vm2 = vcmp.eq.f32.partialorder %v690_v4, 8.507059e+37 }
 0x3b6   :  { %v1383_v24 = vadd.f32 %v1382_v61, %v1381_v58  ;;  %v1234_v13 = vmul.f32 %v2554_v33, %v1233_v30 }
 0x3b7   :  { %v1901_v25 = vpop.eup %1900  ;;  %v1334_v31 = vpop.xlane.xlu0 %1333  ;;  %v684_v58 = vmul.f32 %v2562_v1, %v683_v38  ;;  %v633_v32 = vor.u32 1.1754944e-38, %v632_v23 }
 0x3b8   :  { %v2582_v0 = vadd.f32 1.0, %v1901_v25  ;;  %v1384_v54 = vrot.slane %v1383_v24, 2  ;;  %v1335_v5 = vrot.slane %v1334_v31, 4  ;;  %v2584_v37 = vpop.eup %1902 }
 0x3b9   :  { %v622_v60 = vmul.f32 %v2584_v37, %v2551_v34  ;;  %v2643_v43 = vadd.f32 %v2562_v1, %v684_v58  ;;  %vm627_vm11 = vweird.f32 %v2584_v37 }
 0x3ba   :  { %1906 = vrcp.f32 %v2582_v0  ;;  %v1385_v20 = vadd.f32 %v1384_v54, %v1383_v24  ;;  %v1336_v14 = vadd.f32 %v1335_v5, %v1334_v31  ;;  %v2614_v52 = vpop.eup %1904  ;;  %v630_v5 = vand.u32 2147483647, %v2551_v34  ;;  %vm2704_vm1 = vmor %vm626_vm5, %vm627_vm11 }
 0x3bb   :  { %v1132_v49 = vpop.xlane.xlu2 %1131  ;;  %v646_v61 = vmul.f32 %v2614_v52, %v2569_v36  ;;  %v623_v24 = vsub.f32 1.0, %v622_v60  ;;  %v1182_v26 = vand.u32 2147483648, %v2582_v0  ;;  %vm652_vm8 = vweird.f32 %v2614_v52 }
 0x3bc   :  { %v1133_v9 = vmul.f32 %v1132_v49, %v2290_v27  ;;  %v1386_v21 = vrot.slane %v1385_v20, 1  ;;  %v1337_v22 = vrot.slane %v1336_v14, 2  ;;  %v1235_v27 = vadd.f32 %v2554_v33, %v1234_v13  ;;  %vm653_vm12 = vmor %vm651_vm6, %vm652_vm8 }
 0x3bd   :  { %v647_v42 = vmul.f32 %v2614_v52, %v646_v61  ;;  %v624_v62 = vmul.f32 %v2584_v37, %v623_v24  ;;  %v1180_v49 = vand.u32 2147483647, %v2582_v0  ;;  %vm1176_vm10 = vweird.f32 %v2582_v0 }
 0x3be   :  { %v2630_v53 = vadd.f32 1e-05, %v1133_v9  ;;  %v1387_v25 = vadd.f32 %v1386_v21, %v1385_v20  ;;  %v1338_v30 = vadd.f32 %v1337_v22, %v1336_v14  ;;  %v1239_v13 = vsel %vm2652_vm7, %v2554_v33, %v1235_v27  ;;  %v1765_v21 = vld [vmem:[%s2812_s4 + $0x8] sm:$0xff] }
 0x3bf   :  { %v648_v54 = vmul.f32 0.5, %v647_v42  ;;  %v1244_v61 = vsel %vm2634_vm3, %v1243_v10, %v1239_v13  ;;  %v1183_v36 = vor.u32 1.1754944e-38, %v1182_v26  ;;  %v625_v27 = vadd.f32 %v2584_v37, %v624_v62 }
 0x3c0   :  { %v1907_v40 = vpop.eup %1906  ;;  %1908 = vrsqrt.f32 %v2630_v53  ;;  %v1388_v38 = vmul.f32 0.0009765625, %v1387_v25  ;;  %v1339_v29 = vrot.slane %v1338_v30, 1  ;;  %vm1181_vm0 = vcmp.eq.f32.partialorder %v1180_v49, 8.507059e+37 }
 0x3c1   :  { %v1172_v31 = vmul.f32 %v1907_v40, %v2582_v0  ;;  %1910 = vtanh.f32 %v1205_v28  ;;  %v649_v50 = vsub.f32 1.5, %v648_v54  ;;  %vm1177_vm9 = vweird.f32 %v1907_v40 }
 0x3c2   :  { %v2662_v20 = vadd.f32 1e-05, %v1388_v38  ;;  %v1340_v14 = vadd.f32 %v1339_v29, %v1338_v30  ;;  %vm1178_vm13 = vmor %vm1176_vm10, %vm1177_vm9  ;;  %vm567_vm3 = vweird.f32 %v2540_v44  ;;  %vm631_vm15 = vcmp.eq.f32.partialorder %v630_v5, 8.507059e+37 }
 0x3c3   :  { %v1173_v47 = vsub.f32 1.0, %v1172_v31  ;;  %v650_v60 = vmul.f32 %v2614_v52, %v649_v50  ;;  %v1406_v31 = vmul.f32 %v1765_v21, %v1244_v61  ;;  %vm1141_vm5 = vweird.f32 %v2630_v53 }
 0x3c4   :  { %1912 = vrsqrt.f32 %v2662_v20  ;;  %v1341_v33 = vmul.f32 0.0009765625, %v1340_v14  ;;  %vm1117_vm6 = vweird.f32 %v2544_v12  ;;  %v1122_v61 = vand.u32 2147483648, %v2523_v3 }
 0x3c5   :  { %v1174_v15 = vmul.f32 %v1907_v40, %v1173_v47  ;;  %v654_v22 = vsel %vm653_vm12, %v2614_v52, %v650_v60  ;;  %v2829_v60 = vld [vmem:[#allocation2_spill] sm:$0xff]  ;;  %vm1116_vm9 = vweird.f32 %v2523_v3  ;;  %vm1396_vm10 = vweird.f32 %v2662_v20 }
 0x3c6   :  { %v2666_v9 = vpop.eup %1908  ;;  %v655_v42 = vmul.f32 %v654_v22, %v2478_v56  ;;  %v2684_v24 = vadd.f32 1e-05, %v1341_v33  ;;  %v689_v56 = vsel %vm2690_vm14, %v2562_v1, %v2643_v43  ;;  %v595_v1 = vmul.f32 %v594_v19, %v2456_v39  ;;  %vm2769_vm11 = vmor %vm1116_vm9, %vm1117_vm6 }
 0x3c7   :  { %v1911_v58 = vpop.eup %1910  ;;  %v1175_v28 = vadd.f32 %v1907_v40, %v1174_v15  ;;  %v1136_v0 = vmul.f32 %v2666_v9, %v2630_v53  ;;  %v629_v43 = vsel %vm2704_vm1, %v2584_v37, %v625_v27  ;;  %vm1142_vm4 = vweird.f32 %v2666_v9 }
 0x3c8   :  { %1914 = vtanh.f32 %v655_v42  ;;  %v694_v39 = vsel %vm691_vm2, %v2599_v45, %v689_v56  ;;  %v634_v4 = vsel %vm631_vm15, %v633_v32, %v629_v43  ;;  %vm1143_vm7 = vmor %vm1141_vm5, %vm1142_vm4  ;;  %v1115_v53 = vadd.f32 %v2544_v12, %v2597_v51 }
 0x3c9   :  { %v1179_v52 = vsel %vm1178_vm13, %v1907_v40, %v1175_v28  ;;  %v1137_v25 = vmul.f32 %v2666_v9, %v1136_v0  ;;  %1916 = vrsqrt.f32 %v2684_v24  ;;  %v1358_v62 = vmul.f32 %v1357_v35, %v694_v39 }
 0x3ca   :  { %v1184_v30 = vsel %vm1181_vm0, %v1183_v36, %v1179_v52  ;;  %v132_v54 = vpop.permute.xlu0 %131  ;;  %v2710_v47 = vpop.eup %1912  ;;  %1918 = vtanh.f32 %v595_v1  ;;  %vm566_vm12 = vweird.f32 %v2519_v2  ;;  %v1123_v27 = vor.u32 1.1754944e-38, %v1122_v61 }
 0x3cb   :  { %v1403_v38 = vmul.f32 %v1911_v58, %v1184_v30  ;;  %v1138_v29 = vmul.f32 0.5, %v1137_v25  ;;  %v404_v59 = vadd.f32 %v2284_v6, %v132_v54  ;;  %v961_v26 = vadd.f32 %v2547_v16, %v132_v54  ;;  %vm2789_vm14 = vmor %vm566_vm12, %vm567_vm3 }
 0x3cc   :  { %v1391_v50 = vmul.f32 %v2710_v47, %v2662_v20  ;;  %vm1397_vm8 = vweird.f32 %v2710_v47  ;;  %v1119_v20 = vsel %vm2769_vm11, %v2544_v12, %v1115_v53  ;;  %vm1349_vm2 = vweird.f32 %v2684_v24 }
 0x3cd   :  { %v1407_v6 = vadd.f32 %v1406_v31, %v1403_v38  ;;  %v1139_v11 = vsub.f32 1.5, %v1138_v29  ;;  %v432_v17 = vadd.f32 %v2286_v7, %v404_v59  ;;  %v989_v16 = vadd.f32 %v2549_v18, %v961_v26  ;;  %vm2780_vm13 = vmor %vm1396_vm10, %vm1397_vm8 }
 0x3ce   :  { %v1392_v37 = vmul.f32 %v2710_v47, %v1391_v50  ;;  %v1915_v45 = vpop.eup %1914 }
 0x3cf   :  { %1767 = vst [vmem:[%s2813_s6 + $0x8] sm:$0xff] %v1407_v6  ;;  %v1140_v19 = vmul.f32 %v2666_v9, %v1139_v11  ;;  %v460_v7 = vadd.f32 %v2288_v8, %v432_v17  ;;  %v1017_v18 = vadd.f32 %v2560_v57, %v989_v16  ;;  %v1917_v13 = vpop.eup %1916  ;;  %v1356_v14 = vmul.f32 %v1915_v45, %v634_v4 }
 0x3d0   :  { %v1393_v34 = vmul.f32 0.5, %v1392_v37  ;;  %v1344_v15 = vmul.f32 %v1917_v13, %v2684_v24  ;;  %vm1350_vm0 = vweird.f32 %v1917_v13  ;;  %v1919_v42 = vpop.eup %1918 }
 0x3d1   :  { %v1144_v5 = vsel %vm1143_vm7, %v2666_v9, %v1140_v19  ;;  %v488_v33 = vadd.f32 %v2829_v60, %v460_v7  ;;  %v1359_v58 = vadd.f32 %v1358_v62, %v1356_v14  ;;  %v1045_v57 = vadd.f32 %v2564_v55, %v1017_v18  ;;  %vm1351_vm4 = vmor %vm1349_vm2, %vm1350_vm0 }
 0x3d2   :  { %v1145_v49 = vmul.f32 %v1144_v5, %v2492_v48  ;;  %v1394_v8 = vsub.f32 1.5, %v1393_v34  ;;  %v1345_v28 = vmul.f32 %v1917_v13, %v1344_v15  ;;  %v565_v48 = vadd.f32 %v2540_v44, %v2587_v41 }
 0x3d3   :  { %1362 = vst [vmem:[%s2814_s7] sm:$0xff] %v488_v33  ;;  %v1120_v55 = vand.u32 2147483647, %v2523_v3  ;;  %v572_v9 = vand.u32 2147483648, %v2519_v2  ;;  %v570_v41 = vand.u32 2147483647, %v2519_v2 }
 0x3d4   :  { %1920 = vtanh.f32 %v1145_v49  ;;  %1361 = vst [vmem:[%s2813_s6] sm:$0xff] %v1359_v58  ;;  %v1395_v51 = vmul.f32 %v2710_v47, %v1394_v8  ;;  %v1346_v21 = vmul.f32 0.5, %v1345_v28  ;;  %v569_v10 = vsel %vm2789_vm14, %v2540_v44, %v565_v48 }
 0x3d5   :  { %1768 = vst [vmem:[%s2814_s7 + $0x8] sm:$0xff] %v1045_v57  ;;  %vm1121_vm1 = vcmp.eq.f32.partialorder %v1120_v55, 8.507059e+37  ;;  %v573_v52 = vor.u32 1.1754944e-38, %v572_v9  ;;  %vm571_vm3 = vcmp.eq.f32.partialorder %v570_v41, 8.507059e+37 }
 0x3d6   :  { %v1399_v2 = vsel %vm2780_vm13, %v2710_v47, %v1395_v51  ;;  %v1347_v36 = vsub.f32 1.5, %v1346_v21  ;;  %v1124_v25 = vsel %vm1121_vm1, %v1123_v27, %v1119_v20 }
 0x3d7   :  { %v1400_v30 = vmul.f32 %v1399_v2, %v2483_v46  ;;  %v574_v56 = vsel %vm571_vm3, %v573_v52, %v569_v10 }
 0x3d8   :  { %v1348_v23 = vmul.f32 %v1917_v13, %v1347_v36  ;;  %v1354_v38 = vmul.f32 %v1919_v42, %v574_v56 }
 0x3da   :  { %v1921_v12 = vpop.eup %1920  ;;  %v1352_v54 = vsel %vm1351_vm4, %v1917_v13, %v1348_v23 }
 0x3db   :  { %v1401_v31 = vmul.f32 %v1921_v12, %v1124_v25  ;;  %v1353_v40 = vmul.f32 %v1352_v54, %v2489_v63 }
 0x3dd   :  { %v1402_v29 = vadd.f32 %v1401_v31, %v1400_v30  ;;  %v1355_v59 = vadd.f32 %v1354_v38, %v1353_v40 }
 0x3df   :  { %1766 = vst [vmem:[%s2815_s5 + $0x8] sm:$0xff] %v1402_v29 }
 0x3e0   :  { %1360 = vst [vmem:[%s2815_s5] sm:$0xff] %v1355_v59 }

</bundles_post_ra>
